<compile_context>
chip_gen: v7x
topology: tpu7x:2x2x1
jax: 0.10.0
libtpu: 0.0.40
codegen_flags: <defaults>
</compile_context>

<pallas_src>
import functools

import numpy as np

import jax
import jax.numpy as jnp
from jax.experimental import pallas as pl
from jax.experimental.pallas import tpu as pltpu

EPS = 1e-5            # nn.BatchNorm2d default eps
_STAT_CHUNK = 1024    # rows per BN-stats chunk (bounds the hidden y*y temp)


def _vmem_spec():
    # whole-array block resident in VMEM (all operands here are small)
    return pl.BlockSpec(memory_space=pltpu.MemorySpace.VMEM)


def _fold_mat(ow, c):
    # (ow*c, c) 0/1 matrix: right-multiplying per-column sums collapses the
    # OW channel groups into per-channel sums (MXU op).
    eye = np.eye(c, dtype=np.float32)
    return jnp.asarray(np.concatenate([eye] * ow, axis=0))


def _bcast_mat(ow, c):
    # (c, ow*c) 0/1 matrix: broadcasts per-channel scale/shift back to the
    # (ow, c) lane layout (MXU op).
    eye = np.eye(c, dtype=np.float32)
    return jnp.asarray(np.concatenate([eye] * ow, axis=1))


def _structured_tap_weights(k, win, ow):
    """Fold the 3 column taps + stride-2 column selection + zero padding of a
    3x3 / stride-2 / pad-1 conv into 3 dense (win*cin, ow*cout) matrices, one
    per kernel row.  k: (3, 3, cin, cout)."""
    cin, cout = k.shape[2], k.shape[3]
    sel = np.zeros((win, ow, 3), np.float32)
    for o in range(ow):
        for dj in range(3):
            w = 2 * o + dj - 1
            if 0 <= w < win:
                sel[w, o, dj] = 1.0
    sel = jnp.asarray(sel)
    taps = []
    for di in range(3):
        wdi = jnp.einsum('wod,dic->wioc', sel, k[di])   # (win, cin, ow, cout)
        taps.append(wdi.reshape(win * cin, ow * cout).astype(jnp.bfloat16))
    return taps


def _stack2(a, b):
    # Row-stack two (1, k) vectors into a (2, k) matrix via broadcast+select
    # (avoids relying on sublane concatenation support).
    k = a.shape[1]
    rows = jax.lax.broadcasted_iota(jnp.int32, (2, k), 0)
    return jnp.where(rows == 0, jnp.broadcast_to(a, (2, k)),
                     jnp.broadcast_to(b, (2, k)))


def _bn_relu(y, gb_ref, fold_ref, bcast_ref, cnt):
    """Train-mode BatchNorm2d (biased batch stats) + ReLU on a conv output of
    shape (m, ow*c) whose lanes are (ow, c) channel groups."""
    m, owc = y.shape
    s1 = jnp.zeros((1, owc), jnp.float32)
    s2 = jnp.zeros((1, owc), jnp.float32)
    for r0 in range(0, m, _STAT_CHUNK):       # chunked: bounds the y*y temp
        blk = y[r0:min(r0 + _STAT_CHUNK, m), :]
        s1 = s1 + jnp.sum(blk, axis=0, keepdims=True)
        s2 = s2 + jnp.sum(blk * blk, axis=0, keepdims=True)
    # batched stat fold: one (2, owc) x (owc, c) MXU op
    stats = jnp.dot(_stack2(s1, s2), fold_ref[pl.ds(0, owc), :],
                    preferred_element_type=jnp.float32) * (1.0 / cnt)
    mean = stats[0:1, :]
    var = jnp.maximum(stats[1:2, :] - mean * mean, 0.0)
    scale = gb_ref[0:1, :] * jax.lax.rsqrt(var + EPS)   # gamma / sqrt(var+eps)
    shift = gb_ref[1:2, :] - mean * scale               # beta - mean * scale
    # batched broadcast back to the (ow, c) lane layout: one (2,c)x(c,owc) op
    ss_t = jnp.dot(_stack2(scale, shift), bcast_ref[:, pl.ds(0, owc)],
                   preferred_element_type=jnp.float32)
    return jnp.maximum(y * ss_t[0:1, :] + ss_t[1:2, :], 0.0)


def omniglot_cnn_forward(x, params):
    conv_params = params["conv"]
    wl, bl = params["linear"]
    num_layers = len(conv_params)
    hidden = conv_params[0][0].shape[-1]
    out_size = wl.shape[1]

    # matches torch: x = x.view(-1, 1, 28, 28)
    x = x.reshape(-1, 1, 28, 28).astype(jnp.float32)
    n = x.shape[0]

    # layer geometry for 3x3 / stride 2 / pad 1: 28 -> 14 -> 7 -> 4 -> 2
    geom = []
    h = w = 28
    for _ in range(num_layers):
        oh, ow = (h + 1) // 2, (w + 1) // 2
        geom.append((h, w, oh, ow))
        h, w = oh, ow
    oh_last, ow_last = geom[-1][2], geom[-1][3]
    ow_max = geom[0][3]

    # ---- cheap JAX-side prep (runs once per call under jit) ----------------
    # layer-1 input (cin = 1): pack the 3 H taps along lanes so the conv is a
    # SINGLE K = 3*28 matmul.  Rows are (output-row-major, batch-minor).
    _h0, w0, oh0, ow0 = geom[0]
    img = x[:, 0]                                      # (n, 28, 28)
    imgp = jnp.pad(img, ((0, 0), (1, 1), (0, 0)))      # (n, 30, 28), H pad
    x_l1 = jnp.concatenate(
        [imgp[:, di:di + 2 * oh0:2, :] for di in range(3)], axis=-1)
    x_l1 = jnp.transpose(x_l1, (1, 0, 2)).reshape(oh0 * n, 3 * w0)
    x_l1 = x_l1.astype(jnp.bfloat16)

    # conv bias is unused: a per-channel constant is exactly cancelled by the
    # train-mode BatchNorm mean subtraction (and it is 0 at init).
    w_l0 = jnp.concatenate(
        _structured_tap_weights(conv_params[0][0], w0, ow0), axis=0)

    inputs = [x_l1, w_l0]
    for l in range(1, num_layers):
        inputs.extend(_structured_tap_weights(
            conv_params[l][0], geom[l][1], geom[l][3]))
    for l in range(num_layers):
        gamma, beta = conv_params[l][2], conv_params[l][3]
        inputs.append(jnp.concatenate(
            [gamma.reshape(1, hidden), beta.reshape(1, hidden)],
            axis=0).astype(jnp.float32))               # (2, hidden)
    # BN fold/broadcast matrices: built once, max size, sliced per layer.
    inputs.append(_fold_mat(ow_max, hidden))           # (ow_max*h, h)  f32
    inputs.append(_bcast_mat(ow_max, hidden))          # (h, ow_max*h)  f32

    # head: spatial mean folded into pre-tiled / pre-scaled linear weights;
    # output lane-padded to a multiple of 128 for a lane-dense store.
    out_pad = ((out_size + 127) // 128) * 128
    w_head = (jnp.concatenate([wl] * ow_last, axis=0)
              / float(oh_last * ow_last)).astype(jnp.float32)
    w_head = jnp.pad(w_head, ((0, 0), (0, out_pad - out_size)))
    b_head = jnp.pad(bl.reshape(1, out_size).astype(jnp.float32),
                     ((0, 0), (0, out_pad - out_size)))
    inputs.extend([w_head, b_head])

    # ---- scratch: row-parity-split H-padded inputs of layers 2..L ----------
    scratch_shapes = []
    scratch_bytes = 0
    for l in range(1, num_layers):
        lanes = geom[l][1] * hidden
        oh_l = geom[l][2]
        scratch_shapes.append(                      # even padded rows
            pltpu.VMEM(((oh_l + 1) * n, lanes), jnp.bfloat16))
        scratch_shapes.append(                      # odd padded rows
            pltpu.VMEM((oh_l * n, lanes), jnp.bfloat16))
        scratch_bytes += (2 * oh_l + 1) * n * lanes * 2

    # VMEM budget derived from the actual shapes (perf review / v7x 64 MiB)
    in_bytes = sum(int(np.prod(a.shape)) * a.dtype.itemsize for a in inputs)
    y_bytes = max(g[2] * g[3] for g in geom) * n * hidden * 4
    est = in_bytes + scratch_bytes + 5 * y_bytes + n * out_pad * 4 + (2 << 20)
    vmem_limit = max(32 << 20, min(int(est), 96 << 20))
    try:
        cap = int(pltpu.get_tpu_info().vmem_capacity_bytes) * 3 // 4
        vmem_limit = min(vmem_limit, max(cap, 16 << 20))
    except Exception:
        vmem_limit = min(vmem_limit, 48 << 20)

    n_lay = num_layers

    def kernel(*refs):
        x1_ref, wl0_ref = refs[0], refs[1]
        idx = 2
        tap_refs = []
        for _ in range(n_lay - 1):
            tap_refs.append(refs[idx:idx + 3])
            idx += 3
        gb_refs = refs[idx:idx + n_lay]
        idx += n_lay
        fold_ref, bcast_ref = refs[idx], refs[idx + 1]
        wh_ref, bh_ref = refs[idx + 2], refs[idx + 3]
        out_ref = refs[idx + 4]
        idx += 5
        phase_refs = []
        for _ in range(n_lay - 1):
            phase_refs.append((refs[idx], refs[idx + 1]))
            idx += 2

        # zero ONLY the padding-row slabs (all interior slabs are fully
        # overwritten by the fused scatter; odd buffers never hold pad reads).
        for l in range(1, n_lay):
            hin_l, win_l, oh_l = geom[l][0], geom[l][1], geom[l][2]
            pe, _po = phase_refs[l - 1]
            zrow = jnp.zeros((n, win_l * hidden), jnp.bfloat16)
            pe[pl.ds(0, n), :] = zrow                  # padded row 0
            if hin_l % 2 == 1:                         # padded row hin+1 is
                pe[pl.ds(oh_l * n, n), :] = zrow       # read only if hin odd

        def scatter(act_bf, oh_l, nxt):
            # fused epilogue: output row r -> next layer's padded row r+1,
            # split by padded-row parity, no intermediate stage buffer.
            pe, po = phase_refs[nxt - 1]
            for r in range(oh_l):
                p = r + 1
                dst, slot = (pe, p // 2) if p % 2 == 0 else (po, p // 2)
                dst[pl.ds(slot * n, n), :] = act_bf[r * n:(r + 1) * n, :]

        # ---- layer 1: single K-packed matmul (3 H taps along K) ------------
        oh_c, ow_c = geom[0][2], geom[0][3]
        y = jnp.dot(x1_ref[...], wl0_ref[...],
                    preferred_element_type=jnp.float32)
        act = _bn_relu(y, gb_refs[0], fold_ref, bcast_ref,
                       float(oh_c * ow_c * n))
        if n_lay > 1:
            scatter(act.astype(jnp.bfloat16), oh_c, 1)

        # ---- layers 2..L: 3-tap structured-matmul conv + BN + ReLU ----------
        for l in range(1, n_lay):
            oh_c, ow_c = geom[l][2], geom[l][3]
            pe, po = phase_refs[l - 1]
            w0r, w1r, w2r = tap_refs[l - 1]
            m = oh_c * n
            y = jnp.dot(pe[pl.ds(0, m), :], w0r[...],
                        preferred_element_type=jnp.float32)
            y = y + jnp.dot(po[pl.ds(0, m), :], w1r[...],
                            preferred_element_type=jnp.float32)
            y = y + jnp.dot(pe[pl.ds(n, m), :], w2r[...],
                            preferred_element_type=jnp.float32)
            act = _bn_relu(y, gb_refs[l], fold_ref, bcast_ref,
                           float(oh_c * ow_c * n))
            if l + 1 < n_lay:
                scatter(act.astype(jnp.bfloat16), oh_c, l + 1)

        # ---- head: spatial mean folded into pre-scaled linear weight --------
        hsum = act[0:n, :]
        for r in range(1, oh_last):
            hsum = hsum + act[r * n:(r + 1) * n, :]
        out_ref[...] = (jnp.dot(hsum, wh_ref[...],
                                preferred_element_type=jnp.float32)
                        + bh_ref[...])

    out = pl.pallas_call(
        kernel,
        out_shape=jax.ShapeDtypeStruct((n, out_pad), jnp.float32),
        in_specs=[_vmem_spec() for _ in inputs],
        out_specs=_vmem_spec(),
        scratch_shapes=scratch_shapes,
        compiler_params=pltpu.CompilerParams(vmem_limit_bytes=vmem_limit),
    )(*inputs)
    return out[:, :out_size]


def init_params(key, output_size=5, hidden_size=32, layers=4):
    """Deterministic init mirroring the PyTorch module's __init__."""
    params = {"conv": []}
    cin = 1
    for _ in range(layers):
        key, k1, k2 = jax.random.split(key, 3)
        # Conv2d 3x3: xavier_uniform (gain=1), bias = 0  (maml_init_)
        fan_in, fan_out = cin * 9, hidden_size * 9
        bound = (6.0 / (fan_in + fan_out)) ** 0.5
        k = jax.random.uniform(k1, (3, 3, cin, hidden_size),
                               jnp.float32, -bound, bound)
        b = jnp.zeros((hidden_size,), jnp.float32)
        # BatchNorm2d: weight ~ U(0,1), bias = 0
        gamma = jax.random.uniform(k2, (hidden_size,), jnp.float32, 0.0, 1.0)
        beta = jnp.zeros((hidden_size,), jnp.float32)
        params["conv"].append((k, b, gamma, beta))
        cin = hidden_size
    # Linear: weight ~ N(0,1), bias = 0 ; stored pre-transposed (hidden, out)
    key, kl = jax.random.split(key)
    wl = jax.random.normal(kl, (hidden_size, output_size), jnp.float32)
    bl = jnp.zeros((output_size,), jnp.float32)
    params["linear"] = (wl, bl)
    return params


def _reference_forward(x, params):
    """Pure-JAX f32 reference of the PyTorch train-mode forward."""
    conv_params = params["conv"]
    wl, bl = params["linear"]
    h = x.reshape(-1, 1, 28, 28).astype(jnp.float32)
    for k, b, gamma, beta in conv_params:
        h = jax.lax.conv_general_dilated(
            h, k, window_strides=(2, 2), padding=((1, 1), (1, 1)),
            dimension_numbers=("NCHW", "HWIO", "NCHW"))
        h = h + b.reshape(1, -1, 1, 1)
        mean = jnp.mean(h, axis=(0, 2, 3), keepdims=True)
        var = jnp.mean(jnp.square(h - mean), axis=(0, 2, 3), keepdims=True)
        h = (h - mean) * jax.lax.rsqrt(var + EPS)
        h = h * gamma.reshape(1, -1, 1, 1) + beta.reshape(1, -1, 1, 1)
        h = jnp.maximum(h, 0.0)
    feat = jnp.mean(h, axis=(2, 3))
    return feat @ wl + bl.reshape(1, -1)


if __name__ == "__main__":
    key = jax.random.PRNGKey(0)
    kx, kp = jax.random.split(key)
    # batch = 16: still small, and a multiple of 16 so every (row, batch) slab
    # is bf16-sublane aligned (perf review); images are the module's 1x28x28.
    x = jax.random.normal(kx, (16, 1, 28, 28), jnp.float32)
    params = init_params(kp, output_size=5, hidden_size=32, layers=4)

    fwd = jax.jit(functools.partial(omniglot_cnn_forward, params=params))
    out = fwd(x)
    jax.block_until_ready(out)
    assert out.shape == (16, 5) and out.dtype == jnp.float32

    # loose-tolerance check vs an f32 JAX reference (kernel uses bf16 matmuls)
    ref = _reference_forward(x, params)
    err = float(jnp.max(jnp.abs(out - ref)))
    ref_scale = float(jnp.max(jnp.abs(ref)))
    assert err <= 0.1 * max(1.0, ref_scale), (err, ref_scale)

    # TODO(synk): BatchNorm running_mean/var buffer updates are not modeled
    # (they do not affect the training-mode forward output).
    print("KERNEL_OK")
</pallas_src>

<mosaic_0001>
module attributes {stable_mosaic.version = 11 : i64} {
  func.func @kernel(%arg0: memref<224x84xbf16, #tpu.memory_space<vmem>>, %arg1: memref<84x448xbf16, #tpu.memory_space<vmem>>, %arg2: memref<448x224xbf16, #tpu.memory_space<vmem>>, %arg3: memref<448x224xbf16, #tpu.memory_space<vmem>>, %arg4: memref<448x224xbf16, #tpu.memory_space<vmem>>, %arg5: memref<224x128xbf16, #tpu.memory_space<vmem>>, %arg6: memref<224x128xbf16, #tpu.memory_space<vmem>>, %arg7: memref<224x128xbf16, #tpu.memory_space<vmem>>, %arg8: memref<128x64xbf16, #tpu.memory_space<vmem>>, %arg9: memref<128x64xbf16, #tpu.memory_space<vmem>>, %arg10: memref<128x64xbf16, #tpu.memory_space<vmem>>, %arg11: memref<2x32xf32, #tpu.memory_space<vmem>>, %arg12: memref<2x32xf32, #tpu.memory_space<vmem>>, %arg13: memref<2x32xf32, #tpu.memory_space<vmem>>, %arg14: memref<2x32xf32, #tpu.memory_space<vmem>>, %arg15: memref<448x32xf32, #tpu.memory_space<vmem>>, %arg16: memref<32x448xf32, #tpu.memory_space<vmem>>, %arg17: memref<64x128xf32, #tpu.memory_space<vmem>>, %arg18: memref<1x128xf32, #tpu.memory_space<vmem>>, %arg19: memref<16x128xf32, #tpu.memory_space<vmem>>, %arg20: memref<128x448xbf16, #tpu.memory_space<vmem>>, %arg21: memref<112x448xbf16, #tpu.memory_space<vmem>>, %arg22: memref<80x224xbf16, #tpu.memory_space<vmem>>, %arg23: memref<64x224xbf16, #tpu.memory_space<vmem>>, %arg24: memref<48x128xbf16, #tpu.memory_space<vmem>>, %arg25: memref<32x128xbf16, #tpu.memory_space<vmem>>) attributes {dimension_semantics = [], scalar_prefetch = 0 : i64, scratch_operands = 6 : i64, tpu.core_type = #tpu.core_type<tc>} {
    %cst = arith.constant 0.000000e+00 : bf16
    %0 = vector.broadcast %cst : bf16 to vector<16x448xbf16>
    %c0 = arith.constant 0 : index
    %c0_0 = arith.constant 0 : index
    %1 = vector.load %arg20[%c0, %c0_0] : memref<128x448xbf16, #tpu.memory_space<vmem>>, vector<16x448xbf16>
    tpu.vector_store %arg20[%c0, %c0_0], %0 {strides = array<i32>} : memref<128x448xbf16, #tpu.memory_space<vmem>>, vector<16x448xbf16>,
    %cst_1 = arith.constant 0.000000e+00 : bf16
    %2 = vector.broadcast %cst_1 : bf16 to vector<16x224xbf16>
    %c0_2 = arith.constant 0 : index
    %c0_3 = arith.constant 0 : index
    %3 = vector.load %arg22[%c0_2, %c0_3] : memref<80x224xbf16, #tpu.memory_space<vmem>>, vector<16x224xbf16>
    tpu.vector_store %arg22[%c0_2, %c0_3], %2 {strides = array<i32>} : memref<80x224xbf16, #tpu.memory_space<vmem>>, vector<16x224xbf16>,
    %c64 = arith.constant 64 : index
    %c0_4 = arith.constant 0 : index
    %4 = vector.load %arg22[%c64, %c0_4] : memref<80x224xbf16, #tpu.memory_space<vmem>>, vector<16x224xbf16>
    tpu.vector_store %arg22[%c64, %c0_4], %2 {strides = array<i32>} : memref<80x224xbf16, #tpu.memory_space<vmem>>, vector<16x224xbf16>,
    %cst_5 = arith.constant 0.000000e+00 : bf16
    %5 = vector.broadcast %cst_5 : bf16 to vector<16x128xbf16>
    %c0_6 = arith.constant 0 : index
    %c0_7 = arith.constant 0 : index
    %6 = vector.load %arg24[%c0_6, %c0_7] : memref<48x128xbf16, #tpu.memory_space<vmem>>, vector<16x128xbf16>
    tpu.vector_store %arg24[%c0_6, %c0_7], %5 {strides = array<i32>} : memref<48x128xbf16, #tpu.memory_space<vmem>>, vector<16x128xbf16>,
    %c0_8 = arith.constant 0 : index
    %c0_9 = arith.constant 0 : index
    %7 = vector.load %arg0[%c0_8, %c0_9] : memref<224x84xbf16, #tpu.memory_space<vmem>>, vector<224x84xbf16>
    %c0_10 = arith.constant 0 : index
    %c0_11 = arith.constant 0 : index
    %8 = vector.load %arg1[%c0_10, %c0_11] : memref<84x448xbf16, #tpu.memory_space<vmem>>, vector<84x448xbf16>
    %cst_12 = arith.constant dense<0.000000e+00> : vector<224x448xf32>
    %9 = tpu.matmul %7, %8, %cst_12 {dimension_numbers = #tpu.dot_dimension_numbers<[1], [0], [0], [1], [0, 0, 1, 1], [], []>} : vector<224x84xbf16>, vector<84x448xbf16>, vector<224x448xf32> -> vector<224x448xf32>
    %cst_13 = arith.constant 0.000000e+00 : f32
    %10 = vector.broadcast %cst_13 : f32 to vector<1x448xf32>
    %cst_14 = arith.constant 0.000000e+00 : f32
    %11 = vector.broadcast %cst_14 : f32 to vector<1x448xf32>
    %cst_15 = arith.constant dense<0.000000e+00> : vector<448xf32>
    %12 = vector.multi_reduction <add>, %9, %cst_15 [0] : vector<224x448xf32> to vector<448xf32>
    %13 = vector.shape_cast %12 : vector<448xf32> to vector<1x448xf32>
    %14 = arith.addf %10, %13 : vector<1x448xf32>
    %15 = arith.mulf %9, %9 : vector<224x448xf32>
    %cst_16 = arith.constant dense<0.000000e+00> : vector<448xf32>
    %16 = vector.multi_reduction <add>, %15, %cst_16 [0] : vector<224x448xf32> to vector<448xf32>
    %17 = vector.shape_cast %16 : vector<448xf32> to vector<1x448xf32>
    %18 = arith.addf %11, %17 : vector<1x448xf32>
    %19 = tpu.iota {dimensions = array<i32: 0>} : vector<2x448xi32>
    %c0_i32 = arith.constant 0 : i32
    %20 = vector.broadcast %c0_i32 : i32 to vector<2x448xi32>
    %21 = arith.cmpi eq, %19, %20 : vector<2x448xi32>
    %22 = vector.shape_cast %14 : vector<1x448xf32> to vector<1x448xf32>
    %23 = vector.broadcast %22 : vector<1x448xf32> to vector<2x448xf32>
    %24 = vector.shape_cast %18 : vector<1x448xf32> to vector<1x448xf32>
    %25 = vector.broadcast %24 : vector<1x448xf32> to vector<2x448xf32>
    %26 = arith.select %21, %23, %25 : vector<2x448xi1>, vector<2x448xf32>
    %c0_17 = arith.constant 0 : index
    %c0_18 = arith.constant 0 : index
    %27 = vector.load %arg15[%c0_17, %c0_18] : memref<448x32xf32, #tpu.memory_space<vmem>>, vector<448x32xf32>
    %cst_19 = arith.constant dense<0.000000e+00> : vector<2x32xf32>
    %28 = tpu.matmul %26, %27, %cst_19 {dimension_numbers = #tpu.dot_dimension_numbers<[1], [0], [0], [1], [0, 0, 1, 1], [], []>} : vector<2x448xf32>, vector<448x32xf32>, vector<2x32xf32> -> vector<2x32xf32>
    %cst_20 = arith.constant 3.18877544E-4 : f32
    %29 = vector.broadcast %cst_20 : f32 to vector<2x32xf32>
    %30 = arith.mulf %28, %29 : vector<2x32xf32>
    %31 = vector.extract_strided_slice %30 {offsets = [0, 0], sizes = [1, 32], strides = [1, 1]} : vector<2x32xf32> to vector<1x32xf32>
    %32 = vector.extract_strided_slice %30 {offsets = [1, 0], sizes = [1, 32], strides = [1, 1]} : vector<2x32xf32> to vector<1x32xf32>
    %33 = arith.mulf %31, %31 : vector<1x32xf32>
    %34 = arith.subf %32, %33 : vector<1x32xf32>
    %cst_21 = arith.constant 0.000000e+00 : f32
    %35 = vector.broadcast %cst_21 : f32 to vector<1x32xf32>
    %36 = arith.maximumf %34, %35 : vector<1x32xf32>
    %c0_22 = arith.constant 0 : index
    %c0_23 = arith.constant 0 : index
    %37 = vector.load %arg11[%c0_22, %c0_23] : memref<2x32xf32, #tpu.memory_space<vmem>>, vector<1x32xf32>
    %cst_24 = arith.constant 9.99999974E-6 : f32
    %38 = vector.broadcast %cst_24 : f32 to vector<1x32xf32>
    %39 = arith.addf %36, %38 : vector<1x32xf32>
    %40 = math.rsqrt %39 : vector<1x32xf32>
    %41 = arith.mulf %37, %40 : vector<1x32xf32>
    %c1 = arith.constant 1 : index
    %c0_25 = arith.constant 0 : index
    %42 = vector.load %arg11[%c1, %c0_25] : memref<2x32xf32, #tpu.memory_space<vmem>>, vector<1x32xf32>
    %43 = arith.mulf %31, %41 : vector<1x32xf32>
    %44 = arith.subf %42, %43 : vector<1x32xf32>
    %45 = tpu.iota {dimensions = array<i32: 0>} : vector<2x32xi32>
    %c0_i32_26 = arith.constant 0 : i32
    %46 = vector.broadcast %c0_i32_26 : i32 to vector<2x32xi32>
    %47 = arith.cmpi eq, %45, %46 : vector<2x32xi32>
    %48 = vector.shape_cast %41 : vector<1x32xf32> to vector<1x32xf32>
    %49 = vector.broadcast %48 : vector<1x32xf32> to vector<2x32xf32>
    %50 = vector.shape_cast %44 : vector<1x32xf32> to vector<1x32xf32>
    %51 = vector.broadcast %50 : vector<1x32xf32> to vector<2x32xf32>
    %52 = arith.select %47, %49, %51 : vector<2x32xi1>, vector<2x32xf32>
    %c0_27 = arith.constant 0 : index
    %c0_28 = arith.constant 0 : index
    %53 = vector.load %arg16[%c0_27, %c0_28] : memref<32x448xf32, #tpu.memory_space<vmem>>, vector<32x448xf32>
    %cst_29 = arith.constant dense<0.000000e+00> : vector<2x448xf32>
    %54 = tpu.matmul %52, %53, %cst_29 {dimension_numbers = #tpu.dot_dimension_numbers<[1], [0], [0], [1], [0, 0, 1, 1], [], []>} : vector<2x32xf32>, vector<32x448xf32>, vector<2x448xf32> -> vector<2x448xf32>
    %55 = vector.extract_strided_slice %54 {offsets = [0, 0], sizes = [1, 448], strides = [1, 1]} : vector<2x448xf32> to vector<1x448xf32>
    %56 = vector.broadcast %55 : vector<1x448xf32> to vector<224x448xf32>
    %57 = arith.mulf %9, %56 : vector<224x448xf32>
    %58 = vector.extract_strided_slice %54 {offsets = [1, 0], sizes = [1, 448], strides = [1, 1]} : vector<2x448xf32> to vector<1x448xf32>
    %59 = vector.broadcast %58 : vector<1x448xf32> to vector<224x448xf32>
    %60 = arith.addf %57, %59 : vector<224x448xf32>
    %cst_30 = arith.constant 0.000000e+00 : f32
    %61 = vector.broadcast %cst_30 : f32 to vector<224x448xf32>
    %62 = arith.maximumf %60, %61 : vector<224x448xf32>
    %63 = arith.truncf %62 : vector<224x448xf32> to vector<224x448xbf16>
    %64 = vector.extract_strided_slice %63 {offsets = [0, 0], sizes = [16, 448], strides = [1, 1]} : vector<224x448xbf16> to vector<16x448xbf16>
    %c0_31 = arith.constant 0 : index
    %c0_32 = arith.constant 0 : index
    %65 = vector.load %arg21[%c0_31, %c0_32] : memref<112x448xbf16, #tpu.memory_space<vmem>>, vector<16x448xbf16>
    tpu.vector_store %arg21[%c0_31, %c0_32], %64 {strides = array<i32>} : memref<112x448xbf16, #tpu.memory_space<vmem>>, vector<16x448xbf16>,
    %66 = vector.extract_strided_slice %63 {offsets = [16, 0], sizes = [16, 448], strides = [1, 1]} : vector<224x448xbf16> to vector<16x448xbf16>
    %c16 = arith.constant 16 : index
    %c0_33 = arith.constant 0 : index
    %67 = vector.load %arg20[%c16, %c0_33] : memref<128x448xbf16, #tpu.memory_space<vmem>>, vector<16x448xbf16>
    tpu.vector_store %arg20[%c16, %c0_33], %66 {strides = array<i32>} : memref<128x448xbf16, #tpu.memory_space<vmem>>, vector<16x448xbf16>,
    %68 = vector.extract_strided_slice %63 {offsets = [32, 0], sizes = [16, 448], strides = [1, 1]} : vector<224x448xbf16> to vector<16x448xbf16>
    %c16_34 = arith.constant 16 : index
    %c0_35 = arith.constant 0 : index
    %69 = vector.load %arg21[%c16_34, %c0_35] : memref<112x448xbf16, #tpu.memory_space<vmem>>, vector<16x448xbf16>
    tpu.vector_store %arg21[%c16_34, %c0_35], %68 {strides = array<i32>} : memref<112x448xbf16, #tpu.memory_space<vmem>>, vector<16x448xbf16>,
    %70 = vector.extract_strided_slice %63 {offsets = [48, 0], sizes = [16, 448], strides = [1, 1]} : vector<224x448xbf16> to vector<16x448xbf16>
    %c32 = arith.constant 32 : index
    %c0_36 = arith.constant 0 : index
    %71 = vector.load %arg20[%c32, %c0_36] : memref<128x448xbf16, #tpu.memory_space<vmem>>, vector<16x448xbf16>
    tpu.vector_store %arg20[%c32, %c0_36], %70 {strides = array<i32>} : memref<128x448xbf16, #tpu.memory_space<vmem>>, vector<16x448xbf16>,
    %72 = vector.extract_strided_slice %63 {offsets = [64, 0], sizes = [16, 448], strides = [1, 1]} : vector<224x448xbf16> to vector<16x448xbf16>
    %c32_37 = arith.constant 32 : index
    %c0_38 = arith.constant 0 : index
    %73 = vector.load %arg21[%c32_37, %c0_38] : memref<112x448xbf16, #tpu.memory_space<vmem>>, vector<16x448xbf16>
    tpu.vector_store %arg21[%c32_37, %c0_38], %72 {strides = array<i32>} : memref<112x448xbf16, #tpu.memory_space<vmem>>, vector<16x448xbf16>,
    %74 = vector.extract_strided_slice %63 {offsets = [80, 0], sizes = [16, 448], strides = [1, 1]} : vector<224x448xbf16> to vector<16x448xbf16>
    %c48 = arith.constant 48 : index
    %c0_39 = arith.constant 0 : index
    %75 = vector.load %arg20[%c48, %c0_39] : memref<128x448xbf16, #tpu.memory_space<vmem>>, vector<16x448xbf16>
    tpu.vector_store %arg20[%c48, %c0_39], %74 {strides = array<i32>} : memref<128x448xbf16, #tpu.memory_space<vmem>>, vector<16x448xbf16>,
    %76 = vector.extract_strided_slice %63 {offsets = [96, 0], sizes = [16, 448], strides = [1, 1]} : vector<224x448xbf16> to vector<16x448xbf16>
    %c48_40 = arith.constant 48 : index
    %c0_41 = arith.constant 0 : index
    %77 = vector.load %arg21[%c48_40, %c0_41] : memref<112x448xbf16, #tpu.memory_space<vmem>>, vector<16x448xbf16>
    tpu.vector_store %arg21[%c48_40, %c0_41], %76 {strides = array<i32>} : memref<112x448xbf16, #tpu.memory_space<vmem>>, vector<16x448xbf16>,
    %78 = vector.extract_strided_slice %63 {offsets = [112, 0], sizes = [16, 448], strides = [1, 1]} : vector<224x448xbf16> to vector<16x448xbf16>
    %c64_42 = arith.constant 64 : index
    %c0_43 = arith.constant 0 : index
    %79 = vector.load %arg20[%c64_42, %c0_43] : memref<128x448xbf16, #tpu.memory_space<vmem>>, vector<16x448xbf16>
    tpu.vector_store %arg20[%c64_42, %c0_43], %78 {strides = array<i32>} : memref<128x448xbf16, #tpu.memory_space<vmem>>, vector<16x448xbf16>,
    %80 = vector.extract_strided_slice %63 {offsets = [128, 0], sizes = [16, 448], strides = [1, 1]} : vector<224x448xbf16> to vector<16x448xbf16>
    %c64_44 = arith.constant 64 : index
    %c0_45 = arith.constant 0 : index
    %81 = vector.load %arg21[%c64_44, %c0_45] : memref<112x448xbf16, #tpu.memory_space<vmem>>, vector<16x448xbf16>
    tpu.vector_store %arg21[%c64_44, %c0_45], %80 {strides = array<i32>} : memref<112x448xbf16, #tpu.memory_space<vmem>>, vector<16x448xbf16>,
    %82 = vector.extract_strided_slice %63 {offsets = [144, 0], sizes = [16, 448], strides = [1, 1]} : vector<224x448xbf16> to vector<16x448xbf16>
    %c80 = arith.constant 80 : index
    %c0_46 = arith.constant 0 : index
    %83 = vector.load %arg20[%c80, %c0_46] : memref<128x448xbf16, #tpu.memory_space<vmem>>, vector<16x448xbf16>
    tpu.vector_store %arg20[%c80, %c0_46], %82 {strides = array<i32>} : memref<128x448xbf16, #tpu.memory_space<vmem>>, vector<16x448xbf16>,
    %84 = vector.extract_strided_slice %63 {offsets = [160, 0], sizes = [16, 448], strides = [1, 1]} : vector<224x448xbf16> to vector<16x448xbf16>
    %c80_47 = arith.constant 80 : index
    %c0_48 = arith.constant 0 : index
    %85 = vector.load %arg21[%c80_47, %c0_48] : memref<112x448xbf16, #tpu.memory_space<vmem>>, vector<16x448xbf16>
    tpu.vector_store %arg21[%c80_47, %c0_48], %84 {strides = array<i32>} : memref<112x448xbf16, #tpu.memory_space<vmem>>, vector<16x448xbf16>,
    %86 = vector.extract_strided_slice %63 {offsets = [176, 0], sizes = [16, 448], strides = [1, 1]} : vector<224x448xbf16> to vector<16x448xbf16>
    %c96 = arith.constant 96 : index
    %c0_49 = arith.constant 0 : index
    %87 = vector.load %arg20[%c96, %c0_49] : memref<128x448xbf16, #tpu.memory_space<vmem>>, vector<16x448xbf16>
    tpu.vector_store %arg20[%c96, %c0_49], %86 {strides = array<i32>} : memref<128x448xbf16, #tpu.memory_space<vmem>>, vector<16x448xbf16>,
    %88 = vector.extract_strided_slice %63 {offsets = [192, 0], sizes = [16, 448], strides = [1, 1]} : vector<224x448xbf16> to vector<16x448xbf16>
    %c96_50 = arith.constant 96 : index
    %c0_51 = arith.constant 0 : index
    %89 = vector.load %arg21[%c96_50, %c0_51] : memref<112x448xbf16, #tpu.memory_space<vmem>>, vector<16x448xbf16>
    tpu.vector_store %arg21[%c96_50, %c0_51], %88 {strides = array<i32>} : memref<112x448xbf16, #tpu.memory_space<vmem>>, vector<16x448xbf16>,
    %90 = vector.extract_strided_slice %63 {offsets = [208, 0], sizes = [16, 448], strides = [1, 1]} : vector<224x448xbf16> to vector<16x448xbf16>
    %c112 = arith.constant 112 : index
    %c0_52 = arith.constant 0 : index
    %91 = vector.load %arg20[%c112, %c0_52] : memref<128x448xbf16, #tpu.memory_space<vmem>>, vector<16x448xbf16>
    tpu.vector_store %arg20[%c112, %c0_52], %90 {strides = array<i32>} : memref<128x448xbf16, #tpu.memory_space<vmem>>, vector<16x448xbf16>,
    %c0_53 = arith.constant 0 : index
    %c0_54 = arith.constant 0 : index
    %92 = vector.load %arg20[%c0_53, %c0_54] : memref<128x448xbf16, #tpu.memory_space<vmem>>, vector<112x448xbf16>
    %c0_55 = arith.constant 0 : index
    %c0_56 = arith.constant 0 : index
    %93 = vector.load %arg2[%c0_55, %c0_56] : memref<448x224xbf16, #tpu.memory_space<vmem>>, vector<448x224xbf16>
    %cst_57 = arith.constant dense<0.000000e+00> : vector<112x224xf32>
    %94 = tpu.matmul %92, %93, %cst_57 {dimension_numbers = #tpu.dot_dimension_numbers<[1], [0], [0], [1], [0, 0, 1, 1], [], []>} : vector<112x448xbf16>, vector<448x224xbf16>, vector<112x224xf32> -> vector<112x224xf32>
    %c0_58 = arith.constant 0 : index
    %c0_59 = arith.constant 0 : index
    %95 = vector.load %arg21[%c0_58, %c0_59] : memref<112x448xbf16, #tpu.memory_space<vmem>>, vector<112x448xbf16>
    %c0_60 = arith.constant 0 : index
    %c0_61 = arith.constant 0 : index
    %96 = vector.load %arg3[%c0_60, %c0_61] : memref<448x224xbf16, #tpu.memory_space<vmem>>, vector<448x224xbf16>
    %cst_62 = arith.constant dense<0.000000e+00> : vector<112x224xf32>
    %97 = tpu.matmul %95, %96, %cst_62 {dimension_numbers = #tpu.dot_dimension_numbers<[1], [0], [0], [1], [0, 0, 1, 1], [], []>} : vector<112x448xbf16>, vector<448x224xbf16>, vector<112x224xf32> -> vector<112x224xf32>
    %98 = arith.addf %94, %97 : vector<112x224xf32>
    %c16_63 = arith.constant 16 : index
    %c0_64 = arith.constant 0 : index
    %99 = vector.load %arg20[%c16_63, %c0_64] : memref<128x448xbf16, #tpu.memory_space<vmem>>, vector<112x448xbf16>
    %c0_65 = arith.constant 0 : index
    %c0_66 = arith.constant 0 : index
    %100 = vector.load %arg4[%c0_65, %c0_66] : memref<448x224xbf16, #tpu.memory_space<vmem>>, vector<448x224xbf16>
    %cst_67 = arith.constant dense<0.000000e+00> : vector<112x224xf32>
    %101 = tpu.matmul %99, %100, %cst_67 {dimension_numbers = #tpu.dot_dimension_numbers<[1], [0], [0], [1], [0, 0, 1, 1], [], []>} : vector<112x448xbf16>, vector<448x224xbf16>, vector<112x224xf32> -> vector<112x224xf32>
    %102 = arith.addf %98, %101 : vector<112x224xf32>
    %cst_68 = arith.constant 0.000000e+00 : f32
    %103 = vector.broadcast %cst_68 : f32 to vector<1x224xf32>
    %cst_69 = arith.constant 0.000000e+00 : f32
    %104 = vector.broadcast %cst_69 : f32 to vector<1x224xf32>
    %cst_70 = arith.constant dense<0.000000e+00> : vector<224xf32>
    %105 = vector.multi_reduction <add>, %102, %cst_70 [0] : vector<112x224xf32> to vector<224xf32>
    %106 = vector.shape_cast %105 : vector<224xf32> to vector<1x224xf32>
    %107 = arith.addf %103, %106 : vector<1x224xf32>
    %108 = arith.mulf %102, %102 : vector<112x224xf32>
    %cst_71 = arith.constant dense<0.000000e+00> : vector<224xf32>
    %109 = vector.multi_reduction <add>, %108, %cst_71 [0] : vector<112x224xf32> to vector<224xf32>
    %110 = vector.shape_cast %109 : vector<224xf32> to vector<1x224xf32>
    %111 = arith.addf %104, %110 : vector<1x224xf32>
    %112 = tpu.iota {dimensions = array<i32: 0>} : vector<2x224xi32>
    %c0_i32_72 = arith.constant 0 : i32
    %113 = vector.broadcast %c0_i32_72 : i32 to vector<2x224xi32>
    %114 = arith.cmpi eq, %112, %113 : vector<2x224xi32>
    %115 = vector.shape_cast %107 : vector<1x224xf32> to vector<1x224xf32>
    %116 = vector.broadcast %115 : vector<1x224xf32> to vector<2x224xf32>
    %117 = vector.shape_cast %111 : vector<1x224xf32> to vector<1x224xf32>
    %118 = vector.broadcast %117 : vector<1x224xf32> to vector<2x224xf32>
    %119 = arith.select %114, %116, %118 : vector<2x224xi1>, vector<2x224xf32>
    %c0_73 = arith.constant 0 : index
    %c0_74 = arith.constant 0 : index
    %120 = vector.load %arg15[%c0_73, %c0_74] : memref<448x32xf32, #tpu.memory_space<vmem>>, vector<224x32xf32>
    %cst_75 = arith.constant dense<0.000000e+00> : vector<2x32xf32>
    %121 = tpu.matmul %119, %120, %cst_75 {dimension_numbers = #tpu.dot_dimension_numbers<[1], [0], [0], [1], [0, 0, 1, 1], [], []>} : vector<2x224xf32>, vector<224x32xf32>, vector<2x32xf32> -> vector<2x32xf32>
    %cst_76 = arith.constant 0.00127551018 : f32
    %122 = vector.broadcast %cst_76 : f32 to vector<2x32xf32>
    %123 = arith.mulf %121, %122 : vector<2x32xf32>
    %124 = vector.extract_strided_slice %123 {offsets = [0, 0], sizes = [1, 32], strides = [1, 1]} : vector<2x32xf32> to vector<1x32xf32>
    %125 = vector.extract_strided_slice %123 {offsets = [1, 0], sizes = [1, 32], strides = [1, 1]} : vector<2x32xf32> to vector<1x32xf32>
    %126 = arith.mulf %124, %124 : vector<1x32xf32>
    %127 = arith.subf %125, %126 : vector<1x32xf32>
    %cst_77 = arith.constant 0.000000e+00 : f32
    %128 = vector.broadcast %cst_77 : f32 to vector<1x32xf32>
    %129 = arith.maximumf %127, %128 : vector<1x32xf32>
    %c0_78 = arith.constant 0 : index
    %c0_79 = arith.constant 0 : index
    %130 = vector.load %arg12[%c0_78, %c0_79] : memref<2x32xf32, #tpu.memory_space<vmem>>, vector<1x32xf32>
    %cst_80 = arith.constant 9.99999974E-6 : f32
    %131 = vector.broadcast %cst_80 : f32 to vector<1x32xf32>
    %132 = arith.addf %129, %131 : vector<1x32xf32>
    %133 = math.rsqrt %132 : vector<1x32xf32>
    %134 = arith.mulf %130, %133 : vector<1x32xf32>
    %c1_81 = arith.constant 1 : index
    %c0_82 = arith.constant 0 : index
    %135 = vector.load %arg12[%c1_81, %c0_82] : memref<2x32xf32, #tpu.memory_space<vmem>>, vector<1x32xf32>
    %136 = arith.mulf %124, %134 : vector<1x32xf32>
    %137 = arith.subf %135, %136 : vector<1x32xf32>
    %138 = tpu.iota {dimensions = array<i32: 0>} : vector<2x32xi32>
    %c0_i32_83 = arith.constant 0 : i32
    %139 = vector.broadcast %c0_i32_83 : i32 to vector<2x32xi32>
    %140 = arith.cmpi eq, %138, %139 : vector<2x32xi32>
    %141 = vector.shape_cast %134 : vector<1x32xf32> to vector<1x32xf32>
    %142 = vector.broadcast %141 : vector<1x32xf32> to vector<2x32xf32>
    %143 = vector.shape_cast %137 : vector<1x32xf32> to vector<1x32xf32>
    %144 = vector.broadcast %143 : vector<1x32xf32> to vector<2x32xf32>
    %145 = arith.select %140, %142, %144 : vector<2x32xi1>, vector<2x32xf32>
    %c0_84 = arith.constant 0 : index
    %c0_85 = arith.constant 0 : index
    %146 = vector.load %arg16[%c0_84, %c0_85] : memref<32x448xf32, #tpu.memory_space<vmem>>, vector<32x224xf32>
    %cst_86 = arith.constant dense<0.000000e+00> : vector<2x224xf32>
    %147 = tpu.matmul %145, %146, %cst_86 {dimension_numbers = #tpu.dot_dimension_numbers<[1], [0], [0], [1], [0, 0, 1, 1], [], []>} : vector<2x32xf32>, vector<32x224xf32>, vector<2x224xf32> -> vector<2x224xf32>
    %148 = vector.extract_strided_slice %147 {offsets = [0, 0], sizes = [1, 224], strides = [1, 1]} : vector<2x224xf32> to vector<1x224xf32>
    %149 = vector.broadcast %148 : vector<1x224xf32> to vector<112x224xf32>
    %150 = arith.mulf %102, %149 : vector<112x224xf32>
    %151 = vector.extract_strided_slice %147 {offsets = [1, 0], sizes = [1, 224], strides = [1, 1]} : vector<2x224xf32> to vector<1x224xf32>
    %152 = vector.broadcast %151 : vector<1x224xf32> to vector<112x224xf32>
    %153 = arith.addf %150, %152 : vector<112x224xf32>
    %cst_87 = arith.constant 0.000000e+00 : f32
    %154 = vector.broadcast %cst_87 : f32 to vector<112x224xf32>
    %155 = arith.maximumf %153, %154 : vector<112x224xf32>
    %156 = arith.truncf %155 : vector<112x224xf32> to vector<112x224xbf16>
    %157 = vector.extract_strided_slice %156 {offsets = [0, 0], sizes = [16, 224], strides = [1, 1]} : vector<112x224xbf16> to vector<16x224xbf16>
    %c0_88 = arith.constant 0 : index
    %c0_89 = arith.constant 0 : index
    %158 = vector.load %arg23[%c0_88, %c0_89] : memref<64x224xbf16, #tpu.memory_space<vmem>>, vector<16x224xbf16>
    tpu.vector_store %arg23[%c0_88, %c0_89], %157 {strides = array<i32>} : memref<64x224xbf16, #tpu.memory_space<vmem>>, vector<16x224xbf16>,
    %159 = vector.extract_strided_slice %156 {offsets = [16, 0], sizes = [16, 224], strides = [1, 1]} : vector<112x224xbf16> to vector<16x224xbf16>
    %c16_90 = arith.constant 16 : index
    %c0_91 = arith.constant 0 : index
    %160 = vector.load %arg22[%c16_90, %c0_91] : memref<80x224xbf16, #tpu.memory_space<vmem>>, vector<16x224xbf16>
    tpu.vector_store %arg22[%c16_90, %c0_91], %159 {strides = array<i32>} : memref<80x224xbf16, #tpu.memory_space<vmem>>, vector<16x224xbf16>,
    %161 = vector.extract_strided_slice %156 {offsets = [32, 0], sizes = [16, 224], strides = [1, 1]} : vector<112x224xbf16> to vector<16x224xbf16>
    %c16_92 = arith.constant 16 : index
    %c0_93 = arith.constant 0 : index
    %162 = vector.load %arg23[%c16_92, %c0_93] : memref<64x224xbf16, #tpu.memory_space<vmem>>, vector<16x224xbf16>
    tpu.vector_store %arg23[%c16_92, %c0_93], %161 {strides = array<i32>} : memref<64x224xbf16, #tpu.memory_space<vmem>>, vector<16x224xbf16>,
    %163 = vector.extract_strided_slice %156 {offsets = [48, 0], sizes = [16, 224], strides = [1, 1]} : vector<112x224xbf16> to vector<16x224xbf16>
    %c32_94 = arith.constant 32 : index
    %c0_95 = arith.constant 0 : index
    %164 = vector.load %arg22[%c32_94, %c0_95] : memref<80x224xbf16, #tpu.memory_space<vmem>>, vector<16x224xbf16>
    tpu.vector_store %arg22[%c32_94, %c0_95], %163 {strides = array<i32>} : memref<80x224xbf16, #tpu.memory_space<vmem>>, vector<16x224xbf16>,
    %165 = vector.extract_strided_slice %156 {offsets = [64, 0], sizes = [16, 224], strides = [1, 1]} : vector<112x224xbf16> to vector<16x224xbf16>
    %c32_96 = arith.constant 32 : index
    %c0_97 = arith.constant 0 : index
    %166 = vector.load %arg23[%c32_96, %c0_97] : memref<64x224xbf16, #tpu.memory_space<vmem>>, vector<16x224xbf16>
    tpu.vector_store %arg23[%c32_96, %c0_97], %165 {strides = array<i32>} : memref<64x224xbf16, #tpu.memory_space<vmem>>, vector<16x224xbf16>,
    %167 = vector.extract_strided_slice %156 {offsets = [80, 0], sizes = [16, 224], strides = [1, 1]} : vector<112x224xbf16> to vector<16x224xbf16>
    %c48_98 = arith.constant 48 : index
    %c0_99 = arith.constant 0 : index
    %168 = vector.load %arg22[%c48_98, %c0_99] : memref<80x224xbf16, #tpu.memory_space<vmem>>, vector<16x224xbf16>
    tpu.vector_store %arg22[%c48_98, %c0_99], %167 {strides = array<i32>} : memref<80x224xbf16, #tpu.memory_space<vmem>>, vector<16x224xbf16>,
    %169 = vector.extract_strided_slice %156 {offsets = [96, 0], sizes = [16, 224], strides = [1, 1]} : vector<112x224xbf16> to vector<16x224xbf16>
    %c48_100 = arith.constant 48 : index
    %c0_101 = arith.constant 0 : index
    %170 = vector.load %arg23[%c48_100, %c0_101] : memref<64x224xbf16, #tpu.memory_space<vmem>>, vector<16x224xbf16>
    tpu.vector_store %arg23[%c48_100, %c0_101], %169 {strides = array<i32>} : memref<64x224xbf16, #tpu.memory_space<vmem>>, vector<16x224xbf16>,
    %c0_102 = arith.constant 0 : index
    %c0_103 = arith.constant 0 : index
    %171 = vector.load %arg22[%c0_102, %c0_103] : memref<80x224xbf16, #tpu.memory_space<vmem>>, vector<64x224xbf16>
    %c0_104 = arith.constant 0 : index
    %c0_105 = arith.constant 0 : index
    %172 = vector.load %arg5[%c0_104, %c0_105] : memref<224x128xbf16, #tpu.memory_space<vmem>>, vector<224x128xbf16>
    %cst_106 = arith.constant dense<0.000000e+00> : vector<64x128xf32>
    %173 = tpu.matmul %171, %172, %cst_106 {dimension_numbers = #tpu.dot_dimension_numbers<[1], [0], [0], [1], [0, 0, 1, 1], [], []>} : vector<64x224xbf16>, vector<224x128xbf16>, vector<64x128xf32> -> vector<64x128xf32>
    %c0_107 = arith.constant 0 : index
    %c0_108 = arith.constant 0 : index
    %174 = vector.load %arg23[%c0_107, %c0_108] : memref<64x224xbf16, #tpu.memory_space<vmem>>, vector<64x224xbf16>
    %c0_109 = arith.constant 0 : index
    %c0_110 = arith.constant 0 : index
    %175 = vector.load %arg6[%c0_109, %c0_110] : memref<224x128xbf16, #tpu.memory_space<vmem>>, vector<224x128xbf16>
    %cst_111 = arith.constant dense<0.000000e+00> : vector<64x128xf32>
    %176 = tpu.matmul %174, %175, %cst_111 {dimension_numbers = #tpu.dot_dimension_numbers<[1], [0], [0], [1], [0, 0, 1, 1], [], []>} : vector<64x224xbf16>, vector<224x128xbf16>, vector<64x128xf32> -> vector<64x128xf32>
    %177 = arith.addf %173, %176 : vector<64x128xf32>
    %c16_112 = arith.constant 16 : index
    %c0_113 = arith.constant 0 : index
    %178 = vector.load %arg22[%c16_112, %c0_113] : memref<80x224xbf16, #tpu.memory_space<vmem>>, vector<64x224xbf16>
    %c0_114 = arith.constant 0 : index
    %c0_115 = arith.constant 0 : index
    %179 = vector.load %arg7[%c0_114, %c0_115] : memref<224x128xbf16, #tpu.memory_space<vmem>>, vector<224x128xbf16>
    %cst_116 = arith.constant dense<0.000000e+00> : vector<64x128xf32>
    %180 = tpu.matmul %178, %179, %cst_116 {dimension_numbers = #tpu.dot_dimension_numbers<[1], [0], [0], [1], [0, 0, 1, 1], [], []>} : vector<64x224xbf16>, vector<224x128xbf16>, vector<64x128xf32> -> vector<64x128xf32>
    %181 = arith.addf %177, %180 : vector<64x128xf32>
    %cst_117 = arith.constant 0.000000e+00 : f32
    %182 = vector.broadcast %cst_117 : f32 to vector<1x128xf32>
    %cst_118 = arith.constant 0.000000e+00 : f32
    %183 = vector.broadcast %cst_118 : f32 to vector<1x128xf32>
    %cst_119 = arith.constant dense<0.000000e+00> : vector<128xf32>
    %184 = vector.multi_reduction <add>, %181, %cst_119 [0] : vector<64x128xf32> to vector<128xf32>
    %185 = vector.shape_cast %184 : vector<128xf32> to vector<1x128xf32>
    %186 = arith.addf %182, %185 : vector<1x128xf32>
    %187 = arith.mulf %181, %181 : vector<64x128xf32>
    %cst_120 = arith.constant dense<0.000000e+00> : vector<128xf32>
    %188 = vector.multi_reduction <add>, %187, %cst_120 [0] : vector<64x128xf32> to vector<128xf32>
    %189 = vector.shape_cast %188 : vector<128xf32> to vector<1x128xf32>
    %190 = arith.addf %183, %189 : vector<1x128xf32>
    %191 = tpu.iota {dimensions = array<i32: 0>} : vector<2x128xi32>
    %c0_i32_121 = arith.constant 0 : i32
    %192 = vector.broadcast %c0_i32_121 : i32 to vector<2x128xi32>
    %193 = arith.cmpi eq, %191, %192 : vector<2x128xi32>
    %194 = vector.shape_cast %186 : vector<1x128xf32> to vector<1x128xf32>
    %195 = vector.broadcast %194 : vector<1x128xf32> to vector<2x128xf32>
    %196 = vector.shape_cast %190 : vector<1x128xf32> to vector<1x128xf32>
    %197 = vector.broadcast %196 : vector<1x128xf32> to vector<2x128xf32>
    %198 = arith.select %193, %195, %197 : vector<2x128xi1>, vector<2x128xf32>
    %c0_122 = arith.constant 0 : index
    %c0_123 = arith.constant 0 : index
    %199 = vector.load %arg15[%c0_122, %c0_123] : memref<448x32xf32, #tpu.memory_space<vmem>>, vector<128x32xf32>
    %cst_124 = arith.constant dense<0.000000e+00> : vector<2x32xf32>
    %200 = tpu.matmul %198, %199, %cst_124 {dimension_numbers = #tpu.dot_dimension_numbers<[1], [0], [0], [1], [0, 0, 1, 1], [], []>} : vector<2x128xf32>, vector<128x32xf32>, vector<2x32xf32> -> vector<2x32xf32>
    %cst_125 = arith.constant 3.906250e-03 : f32
    %201 = vector.broadcast %cst_125 : f32 to vector<2x32xf32>
    %202 = arith.mulf %200, %201 : vector<2x32xf32>
    %203 = vector.extract_strided_slice %202 {offsets = [0, 0], sizes = [1, 32], strides = [1, 1]} : vector<2x32xf32> to vector<1x32xf32>
    %204 = vector.extract_strided_slice %202 {offsets = [1, 0], sizes = [1, 32], strides = [1, 1]} : vector<2x32xf32> to vector<1x32xf32>
    %205 = arith.mulf %203, %203 : vector<1x32xf32>
    %206 = arith.subf %204, %205 : vector<1x32xf32>
    %cst_126 = arith.constant 0.000000e+00 : f32
    %207 = vector.broadcast %cst_126 : f32 to vector<1x32xf32>
    %208 = arith.maximumf %206, %207 : vector<1x32xf32>
    %c0_127 = arith.constant 0 : index
    %c0_128 = arith.constant 0 : index
    %209 = vector.load %arg13[%c0_127, %c0_128] : memref<2x32xf32, #tpu.memory_space<vmem>>, vector<1x32xf32>
    %cst_129 = arith.constant 9.99999974E-6 : f32
    %210 = vector.broadcast %cst_129 : f32 to vector<1x32xf32>
    %211 = arith.addf %208, %210 : vector<1x32xf32>
    %212 = math.rsqrt %211 : vector<1x32xf32>
    %213 = arith.mulf %209, %212 : vector<1x32xf32>
    %c1_130 = arith.constant 1 : index
    %c0_131 = arith.constant 0 : index
    %214 = vector.load %arg13[%c1_130, %c0_131] : memref<2x32xf32, #tpu.memory_space<vmem>>, vector<1x32xf32>
    %215 = arith.mulf %203, %213 : vector<1x32xf32>
    %216 = arith.subf %214, %215 : vector<1x32xf32>
    %217 = tpu.iota {dimensions = array<i32: 0>} : vector<2x32xi32>
    %c0_i32_132 = arith.constant 0 : i32
    %218 = vector.broadcast %c0_i32_132 : i32 to vector<2x32xi32>
    %219 = arith.cmpi eq, %217, %218 : vector<2x32xi32>
    %220 = vector.shape_cast %213 : vector<1x32xf32> to vector<1x32xf32>
    %221 = vector.broadcast %220 : vector<1x32xf32> to vector<2x32xf32>
    %222 = vector.shape_cast %216 : vector<1x32xf32> to vector<1x32xf32>
    %223 = vector.broadcast %222 : vector<1x32xf32> to vector<2x32xf32>
    %224 = arith.select %219, %221, %223 : vector<2x32xi1>, vector<2x32xf32>
    %c0_133 = arith.constant 0 : index
    %c0_134 = arith.constant 0 : index
    %225 = vector.load %arg16[%c0_133, %c0_134] : memref<32x448xf32, #tpu.memory_space<vmem>>, vector<32x128xf32>
    %cst_135 = arith.constant dense<0.000000e+00> : vector<2x128xf32>
    %226 = tpu.matmul %224, %225, %cst_135 {dimension_numbers = #tpu.dot_dimension_numbers<[1], [0], [0], [1], [0, 0, 1, 1], [], []>} : vector<2x32xf32>, vector<32x128xf32>, vector<2x128xf32> -> vector<2x128xf32>
    %227 = vector.extract_strided_slice %226 {offsets = [0, 0], sizes = [1, 128], strides = [1, 1]} : vector<2x128xf32> to vector<1x128xf32>
    %228 = vector.broadcast %227 : vector<1x128xf32> to vector<64x128xf32>
    %229 = arith.mulf %181, %228 : vector<64x128xf32>
    %230 = vector.extract_strided_slice %226 {offsets = [1, 0], sizes = [1, 128], strides = [1, 1]} : vector<2x128xf32> to vector<1x128xf32>
    %231 = vector.broadcast %230 : vector<1x128xf32> to vector<64x128xf32>
    %232 = arith.addf %229, %231 : vector<64x128xf32>
    %cst_136 = arith.constant 0.000000e+00 : f32
    %233 = vector.broadcast %cst_136 : f32 to vector<64x128xf32>
    %234 = arith.maximumf %232, %233 : vector<64x128xf32>
    %235 = arith.truncf %234 : vector<64x128xf32> to vector<64x128xbf16>
    %236 = vector.extract_strided_slice %235 {offsets = [0, 0], sizes = [16, 128], strides = [1, 1]} : vector<64x128xbf16> to vector<16x128xbf16>
    %c0_137 = arith.constant 0 : index
    %c0_138 = arith.constant 0 : index
    %237 = vector.load %arg25[%c0_137, %c0_138] : memref<32x128xbf16, #tpu.memory_space<vmem>>, vector<16x128xbf16>
    tpu.vector_store %arg25[%c0_137, %c0_138], %236 {strides = array<i32>} : memref<32x128xbf16, #tpu.memory_space<vmem>>, vector<16x128xbf16>,
    %238 = vector.extract_strided_slice %235 {offsets = [16, 0], sizes = [16, 128], strides = [1, 1]} : vector<64x128xbf16> to vector<16x128xbf16>
    %c16_139 = arith.constant 16 : index
    %c0_140 = arith.constant 0 : index
    %239 = vector.load %arg24[%c16_139, %c0_140] : memref<48x128xbf16, #tpu.memory_space<vmem>>, vector<16x128xbf16>
    tpu.vector_store %arg24[%c16_139, %c0_140], %238 {strides = array<i32>} : memref<48x128xbf16, #tpu.memory_space<vmem>>, vector<16x128xbf16>,
    %240 = vector.extract_strided_slice %235 {offsets = [32, 0], sizes = [16, 128], strides = [1, 1]} : vector<64x128xbf16> to vector<16x128xbf16>
    %c16_141 = arith.constant 16 : index
    %c0_142 = arith.constant 0 : index
    %241 = vector.load %arg25[%c16_141, %c0_142] : memref<32x128xbf16, #tpu.memory_space<vmem>>, vector<16x128xbf16>
    tpu.vector_store %arg25[%c16_141, %c0_142], %240 {strides = array<i32>} : memref<32x128xbf16, #tpu.memory_space<vmem>>, vector<16x128xbf16>,
    %242 = vector.extract_strided_slice %235 {offsets = [48, 0], sizes = [16, 128], strides = [1, 1]} : vector<64x128xbf16> to vector<16x128xbf16>
    %c32_143 = arith.constant 32 : index
    %c0_144 = arith.constant 0 : index
    %243 = vector.load %arg24[%c32_143, %c0_144] : memref<48x128xbf16, #tpu.memory_space<vmem>>, vector<16x128xbf16>
    tpu.vector_store %arg24[%c32_143, %c0_144], %242 {strides = array<i32>} : memref<48x128xbf16, #tpu.memory_space<vmem>>, vector<16x128xbf16>,
    %c0_145 = arith.constant 0 : index
    %c0_146 = arith.constant 0 : index
    %244 = vector.load %arg24[%c0_145, %c0_146] : memref<48x128xbf16, #tpu.memory_space<vmem>>, vector<32x128xbf16>
    %c0_147 = arith.constant 0 : index
    %c0_148 = arith.constant 0 : index
    %245 = vector.load %arg8[%c0_147, %c0_148] : memref<128x64xbf16, #tpu.memory_space<vmem>>, vector<128x64xbf16>
    %cst_149 = arith.constant dense<0.000000e+00> : vector<32x64xf32>
    %246 = tpu.matmul %244, %245, %cst_149 {dimension_numbers = #tpu.dot_dimension_numbers<[1], [0], [0], [1], [0, 0, 1, 1], [], []>} : vector<32x128xbf16>, vector<128x64xbf16>, vector<32x64xf32> -> vector<32x64xf32>
    %c0_150 = arith.constant 0 : index
    %c0_151 = arith.constant 0 : index
    %247 = vector.load %arg25[%c0_150, %c0_151] : memref<32x128xbf16, #tpu.memory_space<vmem>>, vector<32x128xbf16>
    %c0_152 = arith.constant 0 : index
    %c0_153 = arith.constant 0 : index
    %248 = vector.load %arg9[%c0_152, %c0_153] : memref<128x64xbf16, #tpu.memory_space<vmem>>, vector<128x64xbf16>
    %cst_154 = arith.constant dense<0.000000e+00> : vector<32x64xf32>
    %249 = tpu.matmul %247, %248, %cst_154 {dimension_numbers = #tpu.dot_dimension_numbers<[1], [0], [0], [1], [0, 0, 1, 1], [], []>} : vector<32x128xbf16>, vector<128x64xbf16>, vector<32x64xf32> -> vector<32x64xf32>
    %250 = arith.addf %246, %249 : vector<32x64xf32>
    %c16_155 = arith.constant 16 : index
    %c0_156 = arith.constant 0 : index
    %251 = vector.load %arg24[%c16_155, %c0_156] : memref<48x128xbf16, #tpu.memory_space<vmem>>, vector<32x128xbf16>
    %c0_157 = arith.constant 0 : index
    %c0_158 = arith.constant 0 : index
    %252 = vector.load %arg10[%c0_157, %c0_158] : memref<128x64xbf16, #tpu.memory_space<vmem>>, vector<128x64xbf16>
    %cst_159 = arith.constant dense<0.000000e+00> : vector<32x64xf32>
    %253 = tpu.matmul %251, %252, %cst_159 {dimension_numbers = #tpu.dot_dimension_numbers<[1], [0], [0], [1], [0, 0, 1, 1], [], []>} : vector<32x128xbf16>, vector<128x64xbf16>, vector<32x64xf32> -> vector<32x64xf32>
    %254 = arith.addf %250, %253 : vector<32x64xf32>
    %cst_160 = arith.constant 0.000000e+00 : f32
    %255 = vector.broadcast %cst_160 : f32 to vector<1x64xf32>
    %cst_161 = arith.constant 0.000000e+00 : f32
    %256 = vector.broadcast %cst_161 : f32 to vector<1x64xf32>
    %cst_162 = arith.constant dense<0.000000e+00> : vector<64xf32>
    %257 = vector.multi_reduction <add>, %254, %cst_162 [0] : vector<32x64xf32> to vector<64xf32>
    %258 = vector.shape_cast %257 : vector<64xf32> to vector<1x64xf32>
    %259 = arith.addf %255, %258 : vector<1x64xf32>
    %260 = arith.mulf %254, %254 : vector<32x64xf32>
    %cst_163 = arith.constant dense<0.000000e+00> : vector<64xf32>
    %261 = vector.multi_reduction <add>, %260, %cst_163 [0] : vector<32x64xf32> to vector<64xf32>
    %262 = vector.shape_cast %261 : vector<64xf32> to vector<1x64xf32>
    %263 = arith.addf %256, %262 : vector<1x64xf32>
    %264 = tpu.iota {dimensions = array<i32: 0>} : vector<2x64xi32>
    %c0_i32_164 = arith.constant 0 : i32
    %265 = vector.broadcast %c0_i32_164 : i32 to vector<2x64xi32>
    %266 = arith.cmpi eq, %264, %265 : vector<2x64xi32>
    %267 = vector.shape_cast %259 : vector<1x64xf32> to vector<1x64xf32>
    %268 = vector.broadcast %267 : vector<1x64xf32> to vector<2x64xf32>
    %269 = vector.shape_cast %263 : vector<1x64xf32> to vector<1x64xf32>
    %270 = vector.broadcast %269 : vector<1x64xf32> to vector<2x64xf32>
    %271 = arith.select %266, %268, %270 : vector<2x64xi1>, vector<2x64xf32>
    %c0_165 = arith.constant 0 : index
    %c0_166 = arith.constant 0 : index
    %272 = vector.load %arg15[%c0_165, %c0_166] : memref<448x32xf32, #tpu.memory_space<vmem>>, vector<64x32xf32>
    %cst_167 = arith.constant dense<0.000000e+00> : vector<2x32xf32>
    %273 = tpu.matmul %271, %272, %cst_167 {dimension_numbers = #tpu.dot_dimension_numbers<[1], [0], [0], [1], [0, 0, 1, 1], [], []>} : vector<2x64xf32>, vector<64x32xf32>, vector<2x32xf32> -> vector<2x32xf32>
    %cst_168 = arith.constant 1.562500e-02 : f32
    %274 = vector.broadcast %cst_168 : f32 to vector<2x32xf32>
    %275 = arith.mulf %273, %274 : vector<2x32xf32>
    %276 = vector.extract_strided_slice %275 {offsets = [0, 0], sizes = [1, 32], strides = [1, 1]} : vector<2x32xf32> to vector<1x32xf32>
    %277 = vector.extract_strided_slice %275 {offsets = [1, 0], sizes = [1, 32], strides = [1, 1]} : vector<2x32xf32> to vector<1x32xf32>
    %278 = arith.mulf %276, %276 : vector<1x32xf32>
    %279 = arith.subf %277, %278 : vector<1x32xf32>
    %cst_169 = arith.constant 0.000000e+00 : f32
    %280 = vector.broadcast %cst_169 : f32 to vector<1x32xf32>
    %281 = arith.maximumf %279, %280 : vector<1x32xf32>
    %c0_170 = arith.constant 0 : index
    %c0_171 = arith.constant 0 : index
    %282 = vector.load %arg14[%c0_170, %c0_171] : memref<2x32xf32, #tpu.memory_space<vmem>>, vector<1x32xf32>
    %cst_172 = arith.constant 9.99999974E-6 : f32
    %283 = vector.broadcast %cst_172 : f32 to vector<1x32xf32>
    %284 = arith.addf %281, %283 : vector<1x32xf32>
    %285 = math.rsqrt %284 : vector<1x32xf32>
    %286 = arith.mulf %282, %285 : vector<1x32xf32>
    %c1_173 = arith.constant 1 : index
    %c0_174 = arith.constant 0 : index
    %287 = vector.load %arg14[%c1_173, %c0_174] : memref<2x32xf32, #tpu.memory_space<vmem>>, vector<1x32xf32>
    %288 = arith.mulf %276, %286 : vector<1x32xf32>
    %289 = arith.subf %287, %288 : vector<1x32xf32>
    %290 = tpu.iota {dimensions = array<i32: 0>} : vector<2x32xi32>
    %c0_i32_175 = arith.constant 0 : i32
    %291 = vector.broadcast %c0_i32_175 : i32 to vector<2x32xi32>
    %292 = arith.cmpi eq, %290, %291 : vector<2x32xi32>
    %293 = vector.shape_cast %286 : vector<1x32xf32> to vector<1x32xf32>
    %294 = vector.broadcast %293 : vector<1x32xf32> to vector<2x32xf32>
    %295 = vector.shape_cast %289 : vector<1x32xf32> to vector<1x32xf32>
    %296 = vector.broadcast %295 : vector<1x32xf32> to vector<2x32xf32>
    %297 = arith.select %292, %294, %296 : vector<2x32xi1>, vector<2x32xf32>
    %c0_176 = arith.constant 0 : index
    %c0_177 = arith.constant 0 : index
    %298 = vector.load %arg16[%c0_176, %c0_177] : memref<32x448xf32, #tpu.memory_space<vmem>>, vector<32x64xf32>
    %cst_178 = arith.constant dense<0.000000e+00> : vector<2x64xf32>
    %299 = tpu.matmul %297, %298, %cst_178 {dimension_numbers = #tpu.dot_dimension_numbers<[1], [0], [0], [1], [0, 0, 1, 1], [], []>} : vector<2x32xf32>, vector<32x64xf32>, vector<2x64xf32> -> vector<2x64xf32>
    %300 = vector.extract_strided_slice %299 {offsets = [0, 0], sizes = [1, 64], strides = [1, 1]} : vector<2x64xf32> to vector<1x64xf32>
    %301 = vector.broadcast %300 : vector<1x64xf32> to vector<32x64xf32>
    %302 = arith.mulf %254, %301 : vector<32x64xf32>
    %303 = vector.extract_strided_slice %299 {offsets = [1, 0], sizes = [1, 64], strides = [1, 1]} : vector<2x64xf32> to vector<1x64xf32>
    %304 = vector.broadcast %303 : vector<1x64xf32> to vector<32x64xf32>
    %305 = arith.addf %302, %304 : vector<32x64xf32>
    %cst_179 = arith.constant 0.000000e+00 : f32
    %306 = vector.broadcast %cst_179 : f32 to vector<32x64xf32>
    %307 = arith.maximumf %305, %306 : vector<32x64xf32>
    %308 = vector.extract_strided_slice %307 {offsets = [0, 0], sizes = [16, 64], strides = [1, 1]} : vector<32x64xf32> to vector<16x64xf32>
    %309 = vector.extract_strided_slice %307 {offsets = [16, 0], sizes = [16, 64], strides = [1, 1]} : vector<32x64xf32> to vector<16x64xf32>
    %310 = arith.addf %308, %309 : vector<16x64xf32>
    %c0_180 = arith.constant 0 : index
    %c0_181 = arith.constant 0 : index
    %311 = vector.load %arg17[%c0_180, %c0_181] : memref<64x128xf32, #tpu.memory_space<vmem>>, vector<64x128xf32>
    %cst_182 = arith.constant dense<0.000000e+00> : vector<16x128xf32>
    %312 = tpu.matmul %310, %311, %cst_182 {dimension_numbers = #tpu.dot_dimension_numbers<[1], [0], [0], [1], [0, 0, 1, 1], [], []>} : vector<16x64xf32>, vector<64x128xf32>, vector<16x128xf32> -> vector<16x128xf32>
    %c0_183 = arith.constant 0 : index
    %c0_184 = arith.constant 0 : index
    %313 = vector.load %arg18[%c0_183, %c0_184] : memref<1x128xf32, #tpu.memory_space<vmem>>, vector<1x128xf32>
    %314 = vector.broadcast %313 : vector<1x128xf32> to vector<16x128xf32>
    %315 = arith.addf %312, %314 : vector<16x128xf32>
    %c0_185 = arith.constant 0 : index
    %c0_186 = arith.constant 0 : index
    %316 = vector.load %arg19[%c0_185, %c0_186] : memref<16x128xf32, #tpu.memory_space<vmem>>, vector<16x128xf32>
    tpu.vector_store %arg19[%c0_185, %c0_186], %315 {strides = array<i32>} : memref<16x128xf32, #tpu.memory_space<vmem>>, vector<16x128xf32>,
    return
  }
}

</mosaic_0001>

<bundles_post_ra>
// kernel: omniglot_cnn_forward.1
= control target key start
LH: loop header
LB: loop body
LE: loop exit
PB: predicated region body
PF: predicated region fallthrough
CT: control target
= control target key end

     0   :  { %v7222_v1 = vmov 0   ;;  %vm347_vm0 = vcmask 1041408   ;;  %vm304_vm1 = vcmask 687104   ;;  %vm66_vm2 = vcmask 523264   ;;  %s10371_s1 = inlined_call_operand.vmem [shape: bf16[84,448], index: 1, kind: input, shape index: {}]   ;;  %s10372_s0 = inlined_call_operand.vmem [shape: bf16[224,84], index: 0, kind: input, shape index: {}]   ;;  %s10373_s15 = inlined_call_operand.vmem [shape: f32[448,32], index: 15, kind: input, shape index: {}]   ;;  %s10374_s16 = inlined_call_operand.vmem [shape: f32[32,448], index: 16, kind: input, shape index: {}]   ;;  %s10375_s3 = inlined_call_operand.vmem [shape: bf16[448,224], index: 3, kind: input, shape index: {}]   ;;  %s10376_s11 = inlined_call_operand.vmem [shape: f32[2,32], index: 11, kind: input, shape index: {}]   ;;  %s10377_s2 = inlined_call_operand.vmem [shape: bf16[448,224], index: 2, kind: input, shape index: {}]   ;;  %s10378_s4 = inlined_call_operand.vmem [shape: bf16[448,224], index: 4, kind: input, shape index: {}]   ;;  %s10379_s6 = inlined_call_operand.vmem [shape: bf16[224,128], index: 6, kind: input, shape index: {}]   ;;  %s10380_s12 = inlined_call_operand.vmem [shape: f32[2,32], index: 12, kind: input, shape index: {}]   ;;  %s10381_s5 = inlined_call_operand.vmem [shape: bf16[224,128], index: 5, kind: input, shape index: {}]   ;;  %s10382_s7 = inlined_call_operand.vmem [shape: bf16[224,128], index: 7, kind: input, shape index: {}]   ;;  %s10383_s9 = inlined_call_operand.vmem [shape: bf16[128,64], index: 9, kind: input, shape index: {}]   ;;  %s10384_s13 = inlined_call_operand.vmem [shape: f32[2,32], index: 13, kind: input, shape index: {}]   ;;  %s10385_s8 = inlined_call_operand.vmem [shape: bf16[128,64], index: 8, kind: input, shape index: {}]   ;;  %s10386_s10 = inlined_call_operand.vmem [shape: bf16[128,64], index: 10, kind: input, shape index: {}]   ;;  %s10387_s17 = inlined_call_operand.vmem [shape: f32[64,128], index: 17, kind: input, shape index: {}]   ;;  %s10388_s14 = inlined_call_operand.vmem [shape: f32[2,32], index: 14, kind: input, shape index: {}]   ;;  %s10389_s18 = inlined_call_operand.vmem [shape: f32[1,128], index: 18, kind: input, shape index: {}]   ;;  %s10390_s19 = inlined_call_operand.vmem [shape: f32[16,128], index: 19, kind: output, shape index: {}]  }
   0x1   :  { %10479 = sst [smem:[#allocation90_spill]] %s10371_s1  ;;  %392 = vmatprep.mubr.bf16.mxu0 %v7222_v1  ;;  %63 = vst [vmem:[#allocation2] sm:$0xff] %v7222_v1  ;;  %565 = vmatprep.mubr.bf16.mxu1 %v7222_v1  ;;  %67 = vst.msk [vmem:[#allocation2 + $0x18] sm:$0xff] %vm66_vm2, %v7222_v1  ;;  %v10395_v49 = vmov 0.0|0.0   ;;  %vm1394_vm4 = vcmask 261120   ;;  %vm69_vm5 = vcmask 785408  }
   0x2   :  { %10480 = sst [smem:[#allocation91_spill]] %s10372_s0  ;;  %s10483_s20 = sld [smem:[#allocation90_spill]]  ;;  %vm7225_vm6 = vmmov 0  }
   0x3   :  { %10481 = sst [smem:[#allocation92_spill]] %s10373_s15  ;;  %s10484_s22 = sld [smem:[#allocation91_spill]] }
   0x4   :  { %10482 = sst [smem:[#allocation93_spill]] %s10374_s16 }
   0x5   :  { %s10568_s15 = sld [smem:[#allocation93_spill]] }
   0x8   :  { %v6845_v0 = vld [vmem:[%s10483_s20 + $0x4] ss:$16 sps:$4 sm:$0xff]   ;;  %v6847_v2 = vld [vmem:[%s10483_s20 + $0xc] ss:$16 sps:$4 sm:$0xff]   ;;  %v6849_v3 = vld [vmem:[%s10483_s20] ss:$16 sps:$4 sm:$0xff]  }
   0x9   :  { %360 = vmatprep.subr.bf16.mxu0 %v6845_v0  ;;  %v6850_v4 = vld [vmem:[%s10483_s20 + $0x8] ss:$16 sps:$4 sm:$0xff]   ;;  %533 = vmatprep.subr.bf16.mxu1 %v6847_v2  ;;  %v6851_v5 = vld [vmem:[%s10483_s20 + $0x24] ss:$16 sps:$4 sm:$0xff]   ;;  %v6853_v6 = vld [vmem:[%s10483_s20 + $0x2c] ss:$16 sps:$4 sm:$0xff]  }
   0xa   :  { %361 = vmatpush1.bf16.msra.mxu0 %v6849_v3  ;;  %534 = vmatpush1.bf16.msra.mxu1 %v6850_v4  ;;  %v6855_v7 = vld [vmem:[%s10483_s20 + $0x20] ss:$16 sps:$4 sm:$0xff]   ;;  %v6856_v8 = vld [vmem:[%s10483_s20 + $0x28] ss:$16 sps:$4 sm:$0xff]   ;;  %v6857_v9 = vld [vmem:[%s10483_s20 + $0x44] ss:$16 sps:$4 sm:$0xff]  }
   0xb   :  { %362 = vmatprep.subr.bf16.mxu0 %v6851_v5  ;;  %535 = vmatprep.subr.bf16.mxu1 %v6853_v6  ;;  %v6859_v10 = vld [vmem:[%s10483_s20 + $0x4c] ss:$16 sps:$4 sm:$0xff]   ;;  %v6861_v11 = vld [vmem:[%s10483_s20 + $0x40] ss:$16 sps:$4 sm:$0xff]   ;;  %v6862_v12 = vld [vmem:[%s10483_s20 + $0x48] ss:$16 sps:$4 sm:$0xff]  }
   0xc   :  { %v6863_v13 = vld [vmem:[%s10483_s20 + $0x64] ss:$16 sps:$4 sm:$0xff]   ;;  %v6865_v14 = vld [vmem:[%s10483_s20 + $0x6c] ss:$16 sps:$4 sm:$0xff]   ;;  %v6867_v15 = vld [vmem:[%s10483_s20 + $0x60] ss:$16 sps:$4 sm:$0xff]  }
   0xd   :  { %v6868_v16 = vld [vmem:[%s10483_s20 + $0x68] ss:$16 sps:$4 sm:$0xff]   ;;  %v6869_v17 = vld [vmem:[%s10483_s20 + $0x84] ss:$16 sps:$4 sm:$0xff]   ;;  %v6871_v18 = vld [vmem:[%s10483_s20 + $0x8c] ss:$16 sps:$4 sm:$0xff]  }
   0xe   :  { %363 = vmatpush1.bf16.msra.mxu0 %v6855_v7  ;;  %536 = vmatpush1.bf16.msra.mxu1 %v6856_v8  ;;  %v122_v19 = vld [vmem:[%s10483_s20 + $0xa0] sm:$0x33]  ;;  %v123_v20 = vld [vmem:[%s10483_s20 + $0xa8] sm:$0x33]  ;;  %v6881_v31 = vld [vmem:[%s10484_s22 + $0x10] sm:$0xff]  }
   0xf   :  { %364 = vmatprep.subr.bf16.mxu0 %v6857_v9  ;;  %537 = vmatprep.subr.bf16.mxu1 %v6859_v10  ;;  %v6873_v21 = vld [vmem:[%s10483_s20 + $0x80] ss:$16 sps:$4 sm:$0xff]   ;;  %v6874_v22 = vld [vmem:[%s10483_s20 + $0x88] ss:$16 sps:$4 sm:$0xff]   ;;  %v5886_v23 = vcombine.high %v122_v19, %v122_v19  ;;  %v5888_v24 = vcombine.high %v123_v20, %v123_v20  ;;  %v5885_v25 = vcombine.low %v122_v19, %v122_v19  ;;  %s10485_s20 = sld [smem:[#allocation92_spill]] }
  0x10   :  { %v5887_v26 = vcombine.low %v123_v20, %v123_v20  ;;  %v6879_v29 = vld [vmem:[%s10484_s22] sm:$0xff]   ;;  %v6880_v30 = vld [vmem:[%s10484_s22 + $0x8] sm:$0xff]   ;;  %v6882_v32 = vld [vmem:[%s10484_s22 + $0x18] sm:$0xff]  }
  0x11   :  { %v349_v27 = vsel %vm347_vm0, %v5885_v25, 0  ;;  %v6883_v33 = vld [vmem:[%s10484_s22 + $0x20] sm:$0xff]   ;;  %v6884_v34 = vld [vmem:[%s10484_s22 + $0x28] sm:$0xff]   ;;  %v6885_v35 = vld [vmem:[%s10484_s22 + $0x30] sm:$0xff]  }
  0x12   :  { %365 = vmatpush1.bf16.msra.mxu0 %v6861_v11  ;;  %538 = vmatpush1.bf16.msra.mxu1 %v6862_v12  ;;  %v355_v28 = vsel %vm347_vm0, %v5887_v26, 0  ;;  %v6886_v36 = vld [vmem:[%s10484_s22 + $0x38] sm:$0xff]   ;;  %v6887_v37 = vld [vmem:[%s10484_s22 + $0x40] sm:$0xff]   ;;  %v6888_v38 = vld [vmem:[%s10484_s22 + $0x48] sm:$0xff]  }
  0x13   :  { %366 = vmatprep.subr.bf16.mxu0 %v6863_v13  ;;  %539 = vmatprep.subr.bf16.mxu1 %v6865_v14  ;;  %v6889_v39 = vld [vmem:[%s10484_s22 + $0x50] sm:$0xff]   ;;  %v6890_v40 = vld [vmem:[%s10484_s22 + $0x58] sm:$0xff]   ;;  %v6891_v41 = vld [vmem:[%s10484_s22 + $0x60] sm:$0xff]  }
  0x14   :  { %v6892_v42 = vld [vmem:[%s10484_s22 + $0x68] sm:$0xff]  }
  0x15   :  { %v1169_v43 = vld [vmem:[%s10485_s20 + $0x80] sm:$0xff]  ;;  %v1170_v44 = vld [vmem:[%s10485_s20 + $0x88] sm:$0xff]  ;;  %v1171_v53 = vld [vmem:[%s10485_s20 + $0x90] sm:$0xff] }
  0x16   :  { %367 = vmatpush1.bf16.msra.mxu0 %v6867_v15  ;;  %540 = vmatpush1.bf16.msra.mxu1 %v6868_v16  ;;  %v1153_v45 = vld [vmem:[%s10485_s20] sm:$0xff]  ;;  %v6463_v46 = vpack.c.bf16 %v1170_v44, %v1169_v43  ;;  %v1154_v47 = vld [vmem:[%s10485_s20 + $0x8] sm:$0xff]  ;;  %v1172_v54 = vld [vmem:[%s10485_s20 + $0x98] sm:$0xff] }
  0x17   :  { %368 = vmatprep.subr.bf16.mxu0 %v6869_v17  ;;  %541 = vmatprep.subr.bf16.mxu1 %v6871_v18  ;;  %v6465_v48 = vpack.c.bf16 %v1154_v47, %v1153_v45  ;;  %v1185_v50 = vld [vmem:[%s10485_s20 + $0x100] sm:$0xff]  ;;  %v1186_v51 = vld [vmem:[%s10485_s20 + $0x108] sm:$0xff]  ;;  %v1187_v55 = vld [vmem:[%s10485_s20 + $0x110] sm:$0xff]  ;;  %v6467_v56 = vpack.c.bf16 %v1172_v54, %v1171_v53 }
  0x18   :  { %v6496_v52 = vpack.c.bf16 %v1186_v51, %v1185_v50  ;;  %v1188_v57 = vld [vmem:[%s10485_s20 + $0x118] sm:$0xff]  ;;  %v1155_v58 = vld [vmem:[%s10485_s20 + $0x10] sm:$0xff]  ;;  %v1189_v62 = vld [vmem:[%s10485_s20 + $0x120] sm:$0xff] }
  0x19   :  { %v1156_v59 = vld [vmem:[%s10485_s20 + $0x18] sm:$0xff]  ;;  %v6499_v60 = vpack.c.bf16 %v1188_v57, %v1187_v55  ;;  %v1190_v63 = vld [vmem:[%s10485_s20 + $0x128] sm:$0xff]  ;;  %v1157_v4 = vld [vmem:[%s10485_s20 + $0x20] sm:$0xff] }
  0x1a   :  { %369 = vmatpush1.bf16.msra.mxu0 %v6873_v21  ;;  %542 = vmatpush1.bf16.msra.mxu1 %v6874_v22  ;;  %v6469_v61 = vpack.c.bf16 %v1156_v59, %v1155_v58  ;;  %v6502_v0 = vpack.c.bf16 %v1190_v63, %v1189_v62  ;;  %v1174_v2 = vld [vmem:[%s10485_s20 + $0xa8] sm:$0xff]  ;;  %v1191_v6 = vld [vmem:[%s10485_s20 + $0x130] sm:$0xff]  ;;  %v1192_v8 = vld [vmem:[%s10485_s20 + $0x138] sm:$0xff] }
  0x1b   :  { %5889 = vmatprep.subr.msk.bf16.mxu0 %vm347_vm0, %v5886_v23  ;;  %5904 = vmatprep.subr.msk.bf16.mxu1 %vm347_vm0, %v5888_v24  ;;  %v1158_v5 = vld [vmem:[%s10485_s20 + $0x28] sm:$0xff]  ;;  %v6505_v9 = vpack.c.bf16 %v1192_v8, %v1191_v6  ;;  %v1175_v10 = vld [vmem:[%s10485_s20 + $0xb0] sm:$0xff]  ;;  %v1176_v11 = vld [vmem:[%s10485_s20 + $0xb8] sm:$0xff] }
  0x1c   :  { %v6473_v7 = vpack.c.bf16 %v1158_v5, %v1157_v4  ;;  %v1193_v12 = vld [vmem:[%s10485_s20 + $0x140] sm:$0xff]  ;;  %v6475_v13 = vpack.c.bf16 %v1176_v11, %v1175_v10  ;;  %v1194_v14 = vld [vmem:[%s10485_s20 + $0x148] sm:$0xff]  ;;  %v1159_v16 = vld [vmem:[%s10485_s20 + $0x30] sm:$0xff] }
  0x1d   :  { %v6508_v15 = vpack.c.bf16 %v1194_v14, %v1193_v12  ;;  %v1160_v17 = vld [vmem:[%s10485_s20 + $0x38] sm:$0xff]  ;;  %v1195_v19 = vld [vmem:[%s10485_s20 + $0x150] sm:$0xff]  ;;  %v1177_v22 = vld [vmem:[%s10485_s20 + $0xc0] sm:$0xff] }
  0x1e   :  { %371 = vmatpush1.bf16.msra.mxu0 %v349_v27  ;;  %544 = vmatpush1.bf16.msra.mxu1 %v355_v28  ;;  %v6477_v18 = vpack.c.bf16 %v1160_v17, %v1159_v16  ;;  %v1196_v20 = vld [vmem:[%s10485_s20 + $0x158] sm:$0xff]  ;;  %v1178_v23 = vld [vmem:[%s10485_s20 + $0xc8] sm:$0xff]  ;;  %v1161_v24 = vld [vmem:[%s10485_s20 + $0x40] sm:$0xff] }
  0x1f   :  { %6464 = vmatprep.subr.bf16.mxu0 %v6463_v46  ;;  %6495 = vmatprep.subr.bf16.mxu1 %v10395_v49  ;;  %v6511_v21 = vpack.c.bf16 %v1196_v20, %v1195_v19  ;;  %v6479_v25 = vpack.c.bf16 %v1178_v23, %v1177_v22  ;;  %v1162_v26 = vld [vmem:[%s10485_s20 + $0x48] sm:$0xff]  ;;  %v1197_v28 = vld [vmem:[%s10485_s20 + $0x160] sm:$0xff]  ;;  %v1204_v51 = vld [vmem:[%s10485_s20 + $0x198] sm:$0xff] }
  0x20   :  { %v6481_v27 = vpack.c.bf16 %v1162_v26, %v1161_v24  ;;  %v1181_v43 = vld [vmem:[%s10485_s20 + $0xe0] sm:$0xff]  ;;  %v1182_v44 = vld [vmem:[%s10485_s20 + $0xe8] sm:$0xff]  ;;  %v1183_v53 = vld [vmem:[%s10485_s20 + $0xf0] sm:$0xff] }
  0x21   :  { %5890 = vmatmul.mubr.msk.bf16.vlgmr.msra.gmra.mrb[0].mxu0 %vm304_vm1, %v6879_v29  ;;  %5905 = vmatmul.mubr.msk.bf16.vlgmr.msra.gmra.mrb[0].mxu1 %vm304_vm1, %v6879_v29  ;;  %v1198_v29 = vld [vmem:[%s10485_s20 + $0x168] sm:$0xff]  ;;  %v6487_v45 = vpack.c.bf16 %v1182_v44, %v1181_v43  ;;  %v1165_v46 = vld [vmem:[%s10485_s20 + $0x60] sm:$0xff]  ;;  %v1184_v54 = vld [vmem:[%s10485_s20 + $0xf8] sm:$0xff] }
  0x22   :  { %402 = vmatprep.mubr.bf16.mxu0 %v7222_v1  ;;  %575 = vmatprep.mubr.bf16.mxu1 %v7222_v1  ;;  %v1166_v47 = vld [vmem:[%s10485_s20 + $0x68] sm:$0xff]  ;;  %v1205_v55 = vld [vmem:[%s10485_s20 + $0x1a0] sm:$0xff]  ;;  %v1167_v58 = vld [vmem:[%s10485_s20 + $0x70] sm:$0xff] }
  0x23   :  { %6466 = vmatpush3.bf16.msra.mxu0 %v6465_v48  ;;  %6497 = vmatpush1.bf16.msra.mxu1 %v6496_v52  ;;  %v1203_v48 = vld [vmem:[%s10485_s20 + $0x190] sm:$0xff]  ;;  %v6489_v50 = vpack.c.bf16 %v1166_v47, %v1165_v46  ;;  %v1206_v57 = vld [vmem:[%s10485_s20 + $0x1a8] sm:$0xff]  ;;  %v1168_v59 = vld [vmem:[%s10485_s20 + $0x78] sm:$0xff] }
  0x24   :  { %6498 = vmatprep.subr.bf16.mxu1 %v10395_v49  ;;  %6468 = vmatprep.subr.bf16.mxu0 %v6467_v56  ;;  %v6523_v52 = vpack.c.bf16 %v1204_v51, %v1203_v48  ;;  %v6491_v56 = vpack.c.bf16 %v1184_v54, %v1183_v53  ;;  %v1207_v62 = vld [vmem:[%s10485_s20 + $0x1b0] sm:$0xff]  ;;  %v1208_v63 = vld [vmem:[%s10485_s20 + $0x1b8] sm:$0xff] }
  0x27   :  { %6500 = vmatpush1.bf16.msra.mxu1 %v6499_v60  ;;  %6470 = vmatpush3.bf16.msra.mxu0 %v6469_v61  ;;  %v6526_v60 = vpack.c.bf16 %v1206_v57, %v1205_v55  ;;  %v6493_v61 = vpack.c.bf16 %v1168_v59, %v1167_v58 }
  0x28   :  { %6501 = vmatprep.subr.bf16.mxu1 %v10395_v49 }
  0x29   :  { %5891 = vmatmul.mubr.msk.bf16.gmra.mrb[4].mxu0 %vm304_vm1, %v6880_v30  ;;  %5906 = vmatmul.mubr.msk.bf16.gmra.mrb[4].mxu1 %vm304_vm1, %v6880_v30  ;;  %v6514_v30 = vpack.c.bf16 %v1198_v29, %v1197_v28 }
  0x2a   :  { %412 = vmatprep.mubr.bf16.mxu0 %v7222_v1  ;;  %585 = vmatprep.mubr.bf16.mxu1 %v7222_v1 }
  0x2b   :  { %6503 = vmatpush1.bf16.msra.mxu1 %v6502_v0  ;;  %v6529_v0 = vpack.c.bf16 %v1208_v63, %v1207_v62 }
  0x2c   :  { %6504 = vmatprep.subr.bf16.mxu1 %v10395_v49 }
  0x2f   :  { %6506 = vmatpush1.bf16.msra.mxu1 %v6505_v9 }
  0x30   :  { %6507 = vmatprep.subr.bf16.mxu1 %v10395_v49 }
  0x31   :  { %5892 = vmatmul.mubr.msk.bf16.gmra.mrb[8].mxu0 %vm304_vm1, %v6881_v31  ;;  %5907 = vmatmul.mubr.msk.bf16.gmra.mrb[8].mxu1 %vm304_vm1, %v6881_v31  ;;  %v1179_v31 = vld [vmem:[%s10485_s20 + $0xd0] sm:$0xff] }
  0x32   :  { %422 = vmatprep.mubr.bf16.mxu0 %v7222_v1  ;;  %595 = vmatprep.mubr.bf16.mxu1 %v7222_v1 }
  0x33   :  { %6509 = vmatpush1.bf16.msra.mxu1 %v6508_v15 }
  0x34   :  { %6510 = vmatprep.subr.bf16.mxu1 %v10395_v49 }
  0x37   :  { %6512 = vmatpush1.bf16.msra.mxu1 %v6511_v21 }
  0x38   :  { %6513 = vmatprep.subr.bf16.mxu1 %v10395_v49 }
  0x39   :  { %5893 = vmatmul.mubr.msk.bf16.gmra.mrb[12].mxu0 %vm304_vm1, %v6882_v32  ;;  %5908 = vmatmul.mubr.msk.bf16.gmra.mrb[12].mxu1 %vm304_vm1, %v6882_v32  ;;  %v1180_v32 = vld [vmem:[%s10485_s20 + $0xd8] sm:$0xff] }
  0x3a   :  { %432 = vmatprep.mubr.bf16.mxu0 %v7222_v1  ;;  %605 = vmatprep.mubr.bf16.mxu1 %v7222_v1 }
  0x3b   :  { %6515 = vmatpush1.bf16.msra.mxu1 %v6514_v30 }
  0x3c   :  { %6516 = vmatprep.subr.bf16.mxu1 %v10395_v49 }
  0x41   :  { %5894 = vmatmul.mubr.msk.bf16.gmra.mrb[16].mxu0 %vm304_vm1, %v6883_v33  ;;  %5909 = vmatmul.mubr.msk.bf16.gmra.mrb[16].mxu1 %vm304_vm1, %v6883_v33  ;;  %v1199_v33 = vld [vmem:[%s10485_s20 + $0x170] sm:$0xff] }
  0x42   :  { %442 = vmatprep.mubr.bf16.mxu0 %v7222_v1  ;;  %615 = vmatprep.mubr.bf16.mxu1 %v7222_v1 }
  0x49   :  { %5895 = vmatmul.mubr.msk.bf16.gmra.mrb[20].mxu0 %vm304_vm1, %v6884_v34  ;;  %5910 = vmatmul.mubr.msk.bf16.gmra.mrb[20].mxu1 %vm304_vm1, %v6884_v34  ;;  %v6483_v34 = vpack.c.bf16 %v1180_v32, %v1179_v31 }
  0x4a   :  { %452 = vmatprep.mubr.bf16.mxu0 %v7222_v1  ;;  %625 = vmatprep.mubr.bf16.mxu1 %v7222_v1 }
  0x51   :  { %5896 = vmatmul.mubr.msk.bf16.gmra.mrb[24].mxu0 %vm304_vm1, %v6885_v35  ;;  %5911 = vmatmul.mubr.msk.bf16.gmra.mrb[24].mxu1 %vm304_vm1, %v6885_v35  ;;  %v1200_v35 = vld [vmem:[%s10485_s20 + $0x178] sm:$0xff] }
  0x52   :  { %462 = vmatprep.mubr.bf16.mxu0 %v7222_v1  ;;  %635 = vmatprep.mubr.bf16.mxu1 %v7222_v1 }
  0x59   :  { %5897 = vmatmul.mubr.msk.bf16.gmra.mrb[28].mxu0 %vm304_vm1, %v6886_v36  ;;  %5912 = vmatmul.mubr.msk.bf16.gmra.mrb[28].mxu1 %vm304_vm1, %v6886_v36  ;;  %v1163_v36 = vld [vmem:[%s10485_s20 + $0x50] sm:$0xff] }
  0x5a   :  { %472 = vmatprep.mubr.bf16.mxu0 %v7222_v1  ;;  %645 = vmatprep.mubr.bf16.mxu1 %v7222_v1 }
  0x61   :  { %5898 = vmatmul.mubr.msk.bf16.gmra.mrb[32].mxu0 %vm304_vm1, %v6887_v37  ;;  %5913 = vmatmul.mubr.msk.bf16.gmra.mrb[32].mxu1 %vm304_vm1, %v6887_v37  ;;  %v1164_v37 = vld [vmem:[%s10485_s20 + $0x58] sm:$0xff] }
  0x62   :  { %482 = vmatprep.mubr.bf16.mxu0 %v7222_v1  ;;  %655 = vmatprep.mubr.bf16.mxu1 %v7222_v1 }
  0x69   :  { %5899 = vmatmul.mubr.msk.bf16.gmra.mrb[36].mxu0 %vm304_vm1, %v6888_v38  ;;  %5914 = vmatmul.mubr.msk.bf16.gmra.mrb[36].mxu1 %vm304_vm1, %v6888_v38  ;;  %v6517_v38 = vpack.c.bf16 %v1200_v35, %v1199_v33 }
  0x6a   :  { %492 = vmatprep.mubr.bf16.mxu0 %v7222_v1  ;;  %665 = vmatprep.mubr.bf16.mxu1 %v7222_v1 }
  0x6b   :  { %6518 = vmatpush1.bf16.msra.mxu1 %v6517_v38 }
  0x6c   :  { %6519 = vmatprep.subr.bf16.mxu1 %v10395_v49 }
  0x71   :  { %5900 = vmatmul.mubr.msk.bf16.gmra.mrb[40].mxu0 %vm304_vm1, %v6889_v39  ;;  %5915 = vmatmul.mubr.msk.bf16.gmra.mrb[40].mxu1 %vm304_vm1, %v6889_v39  ;;  %v6485_v39 = vpack.c.bf16 %v1164_v37, %v1163_v36 }
  0x72   :  { %502 = vmatprep.mubr.bf16.mxu0 %v7222_v1  ;;  %675 = vmatprep.mubr.bf16.mxu1 %v7222_v1 }
  0x79   :  { %5901 = vmatmul.mubr.msk.bf16.gmra.mrb[44].mxu0 %vm304_vm1, %v6890_v40  ;;  %5916 = vmatmul.mubr.msk.bf16.gmra.mrb[44].mxu1 %vm304_vm1, %v6890_v40  ;;  %v1201_v40 = vld [vmem:[%s10485_s20 + $0x180] sm:$0xff] }
  0x7a   :  { %512 = vmatprep.mubr.bf16.mxu0 %v7222_v1  ;;  %685 = vmatprep.mubr.bf16.mxu1 %v7222_v1 }
  0x81   :  { %5902 = vmatmul.mubr.msk.bf16.gmra.mrb[48].mxu0 %vm304_vm1, %v6891_v41  ;;  %5917 = vmatmul.mubr.msk.bf16.gmra.mrb[48].mxu1 %vm304_vm1, %v6891_v41  ;;  %v1202_v41 = vld [vmem:[%s10485_s20 + $0x188] sm:$0xff] }
  0x82   :  { %522 = vmatprep.mubr.bf16.mxu0 %v7222_v1  ;;  %695 = vmatprep.mubr.bf16.mxu1 %v7222_v1  ;;  %v1173_v1 = vld [vmem:[%s10485_s20 + $0xa0] sm:$0xff] }
  0x83   :  { %v6471_v3 = vpack.c.bf16 %v1174_v2, %v1173_v1 }
  0x85   :  { %6472 = vmatprep.subr.bf16.mxu0 %v6471_v3 }
  0x86   :  { %6474 = vmatpush3.bf16.msra.mxu0 %v6473_v7 }
  0x87   :  { %6476 = vmatprep.subr.bf16.mxu0 %v6475_v13 }
  0x89   :  { %5903 = vmatmul.mubr.msk.bf16.gmra.mrb[52].mxu0 %vm304_vm1, %v6892_v42  ;;  %5918 = vmatmul.mubr.msk.bf16.gmra.mrb[52].mxu1 %vm304_vm1, %v6892_v42  ;;  %v6520_v42 = vpack.c.bf16 %v1202_v41, %v1201_v40 }
  0x8a   :  { %6478 = vmatpush3.bf16.msra.mxu0 %v6477_v18 }
  0x8b   :  { %6480 = vmatprep.subr.bf16.mxu0 %v6479_v25  ;;  %6521 = vmatpush1.bf16.msra.mxu1 %v6520_v42 }
  0x8c   :  { %6522 = vmatprep.subr.bf16.mxu1 %v10395_v49 }
  0x8e   :  { %6482 = vmatpush3.bf16.msra.mxu0 %v6481_v27 }
  0x8f   :  { %6484 = vmatprep.subr.bf16.mxu0 %v6483_v34  ;;  %6524 = vmatpush1.bf16.msra.mxu1 %v6523_v52 }
  0x90   :  { %6525 = vmatprep.subr.bf16.mxu1 %v10395_v49 }
  0x92   :  { %6486 = vmatpush3.bf16.msra.mxu0 %v6485_v39 }
  0x93   :  { %6488 = vmatprep.subr.bf16.mxu0 %v6487_v45  ;;  %6527 = vmatpush1.bf16.msra.mxu1 %v6526_v60 }
  0x94   :  { %6528 = vmatprep.subr.bf16.mxu1 %v10395_v49 }
  0x96   :  { %6490 = vmatpush3.bf16.msra.mxu0 %v6489_v50 }
  0x97   :  { %6492 = vmatprep.subr.bf16.mxu0 %v6491_v56  ;;  %6530 = vmatpush1.bf16.msra.mxu1 %v6529_v0 }
  0x9a   :  { %6494 = vmatpush3.bf16.msra.mxu0 %v6493_v61 }
  0xf4   :  { %v7672_v1 = vpop.f32.mrb[0].mxu0  ;;  %v7674_v2 = vpop.f32.mrb[0].mxu1 }
  0xf5   :  { %10486 = vst [vmem:[#allocation8_spill] sm:$0xff] %v7674_v2  ;;  %v872_v3 = vmul.f32 %v7674_v2, %v7674_v2  ;;  %v7679_v4 = vpop.f32.mrb[1].mxu0  ;;  %v7681_v5 = vpop.f32.mrb[1].mxu1  ;;  %v870_v6 = vmul.f32 %v7672_v1, %v7672_v1 }
  0xf6   :  { %v871_v7 = vmul.f32 %v7679_v4, %v7679_v4  ;;  %v805_v8 = vsel %vm66_vm2, %v7681_v5, 0.0  ;;  %v873_v9 = vmul.f32 %v7681_v5, %v7681_v5  ;;  %v7691_v10 = vpop.f32.mrb[2].mxu0  ;;  %v7693_v11 = vpop.f32.mrb[2].mxu1 }
  0xf7   :  { %10487 = vst [vmem:[#allocation9_spill] sm:$0xff] %v7693_v11  ;;  %v706_v12 = vadd.f32 %v7691_v10, %v7672_v1  ;;  %v874_v13 = vmul.f32 %v7691_v10, %v7691_v10  ;;  %v772_v14 = vadd.f32 %v7693_v11, %v7674_v2  ;;  %v876_v15 = vmul.f32 %v7693_v11, %v7693_v11  ;;  %v7703_v16 = vpop.f32.mrb[3].mxu0  ;;  %v7705_v17 = vpop.f32.mrb[3].mxu1 }
  0xf8   :  { %v1081_v18 = vsel %vm66_vm2, %v873_v9, 0.0  ;;  %v739_v19 = vadd.f32 %v7703_v16, %v7679_v4  ;;  %v875_v20 = vmul.f32 %v7703_v16, %v7703_v16  ;;  %v806_v21 = vsel %vm66_vm2, %v7705_v17, 0.0 }
  0xf9   :  { %v982_v22 = vadd.f32 %v874_v13, %v870_v6  ;;  %v1048_v23 = vadd.f32 %v876_v15, %v872_v3  ;;  %v807_v24 = vadd.f32 %v806_v21, %v805_v8  ;;  %v877_v25 = vmul.f32 %v7705_v17, %v7705_v17 }
  0xfa   :  { %v1015_v26 = vadd.f32 %v875_v20, %v871_v7 }
  0xfb   :  { %v1082_v27 = vsel %vm66_vm2, %v877_v25, 0.0 }
  0xfc   :  { %v1083_v28 = vadd.f32 %v1082_v27, %v1081_v18  ;;  %v7717_v29 = vpop.f32.mrb[4].mxu0  ;;  %v7719_v30 = vpop.f32.mrb[4].mxu1 }
  0xfd   :  { %10488 = vst [vmem:[#allocation10_spill] sm:$0xff] %v7717_v29  ;;  %10489 = vst [vmem:[#allocation11_spill] sm:$0xff] %v7719_v30  ;;  %v707_v31 = vadd.f32 %v706_v12, %v7717_v29  ;;  %v878_v32 = vmul.f32 %v7717_v29, %v7717_v29  ;;  %v773_v33 = vadd.f32 %v772_v14, %v7719_v30  ;;  %v7727_v35 = vpop.f32.mrb[5].mxu0  ;;  %v7729_v36 = vpop.f32.mrb[5].mxu1 }
  0xfe   :  { %v880_v34 = vmul.f32 %v7719_v30, %v7719_v30  ;;  %10490 = vst [vmem:[#allocation12_spill] sm:$0xff] %v7727_v35  ;;  %10491 = vst [vmem:[#allocation13_spill] sm:$0xff] %v7729_v36  ;;  %v740_v37 = vadd.f32 %v739_v19, %v7727_v35  ;;  %v879_v38 = vmul.f32 %v7727_v35, %v7727_v35  ;;  %v808_v39 = vsel %vm66_vm2, %v7729_v36, 0.0  ;;  %v7738_v41 = vpop.f32.mrb[6].mxu0  ;;  %v7740_v42 = vpop.f32.mrb[6].mxu1 }
  0xff   :  { %v881_v40 = vmul.f32 %v7729_v36, %v7729_v36  ;;  %10492 = vst [vmem:[#allocation14_spill] sm:$0xff] %v7738_v41  ;;  %10493 = vst [vmem:[#allocation15_spill] sm:$0xff] %v7740_v42  ;;  %v983_v43 = vadd.f32 %v982_v22, %v878_v32  ;;  %v809_v45 = vadd.f32 %v808_v39, %v807_v24  ;;  %v7743_v47 = vpop.f32.mrb[7].mxu0  ;;  %v7745_v48 = vpop.f32.mrb[7].mxu1 }
 0x100   :  { %v1049_v44 = vadd.f32 %v1048_v23, %v880_v34  ;;  %v708_v46 = vadd.f32 %v707_v31, %v7738_v41  ;;  %10494 = vst [vmem:[#allocation16_spill] sm:$0xff] %v7743_v47  ;;  %10495 = vst [vmem:[#allocation17_spill] sm:$0xff] %v7745_v48  ;;  %v1016_v50 = vadd.f32 %v1015_v26, %v879_v38  ;;  %v810_v59 = vsel %vm66_vm2, %v7745_v48, 0.0 }
 0x101   :  { %v1084_v51 = vsel %vm66_vm2, %v881_v40, 0.0  ;;  %v882_v52 = vmul.f32 %v7738_v41, %v7738_v41  ;;  %v774_v53 = vadd.f32 %v773_v33, %v7740_v42  ;;  %v884_v55 = vmul.f32 %v7740_v42, %v7740_v42 }
 0x102   :  { %v1085_v54 = vadd.f32 %v1084_v51, %v1083_v28  ;;  %v741_v56 = vadd.f32 %v740_v37, %v7743_v47  ;;  %v883_v57 = vmul.f32 %v7743_v47, %v7743_v47  ;;  %v885_v60 = vmul.f32 %v7745_v48, %v7745_v48 }
 0x103   :  { %v984_v58 = vadd.f32 %v983_v43, %v882_v52  ;;  %v1050_v61 = vadd.f32 %v1049_v44, %v884_v55  ;;  %v811_v63 = vadd.f32 %v810_v59, %v809_v45 }
 0x104   :  { %v1017_v62 = vadd.f32 %v1016_v50, %v883_v57  ;;  %v1086_v0 = vsel %vm66_vm2, %v885_v60, 0.0  ;;  %v7761_v3 = vpop.f32.mrb[8].mxu0  ;;  %v7763_v6 = vpop.f32.mrb[8].mxu1 }
 0x105   :  { %10496 = vst [vmem:[#allocation18_spill] sm:$0xff] %v7763_v6  ;;  %v1087_v7 = vadd.f32 %v1086_v0, %v1085_v54  ;;  %v709_v8 = vadd.f32 %v708_v46, %v7761_v3  ;;  %v886_v9 = vmul.f32 %v7761_v3, %v7761_v3  ;;  %v775_v12 = vadd.f32 %v774_v53, %v7763_v6  ;;  %v7769_v13 = vpop.f32.mrb[9].mxu0  ;;  %v7771_v14 = vpop.f32.mrb[9].mxu1 }
 0x106   :  { %10497 = vst [vmem:[#allocation19_spill] sm:$0xff] %v7771_v14  ;;  %v888_v15 = vmul.f32 %v7763_v6, %v7763_v6  ;;  %v742_v18 = vadd.f32 %v741_v56, %v7769_v13  ;;  %v887_v19 = vmul.f32 %v7769_v13, %v7769_v13  ;;  %v812_v20 = vsel %vm66_vm2, %v7771_v14, 0.0  ;;  %v7780_v21 = vpop.f32.mrb[10].mxu0  ;;  %v7782_v22 = vpop.f32.mrb[10].mxu1 }
 0x107   :  { %10498 = vst [vmem:[#allocation20_spill] sm:$0xff] %v7782_v22  ;;  %v985_v23 = vadd.f32 %v984_v58, %v886_v9  ;;  %v813_v24 = vadd.f32 %v812_v20, %v811_v63  ;;  %v889_v25 = vmul.f32 %v7771_v14, %v7771_v14  ;;  %v710_v26 = vadd.f32 %v709_v8, %v7780_v21  ;;  %v7787_v27 = vpop.f32.mrb[11].mxu0  ;;  %v7789_v28 = vpop.f32.mrb[11].mxu1 }
 0x108   :  { %10499 = vst [vmem:[#allocation21_spill] sm:$0xff] %v7789_v28  ;;  %v1051_v31 = vadd.f32 %v1050_v61, %v888_v15  ;;  %v1018_v32 = vadd.f32 %v1017_v62, %v887_v19  ;;  %v890_v33 = vmul.f32 %v7780_v21, %v7780_v21  ;;  %v776_v34 = vadd.f32 %v775_v12, %v7782_v22 }
 0x109   :  { %v1088_v37 = vsel %vm66_vm2, %v889_v25, 0.0  ;;  %v892_v38 = vmul.f32 %v7782_v22, %v7782_v22  ;;  %v743_v39 = vadd.f32 %v742_v18, %v7787_v27  ;;  %v891_v40 = vmul.f32 %v7787_v27, %v7787_v27 }
 0x10a   :  { %v1089_v43 = vadd.f32 %v1088_v37, %v1087_v7  ;;  %v986_v44 = vadd.f32 %v985_v23, %v890_v33  ;;  %v814_v45 = vsel %vm66_vm2, %v7789_v28, 0.0  ;;  %v893_v46 = vmul.f32 %v7789_v28, %v7789_v28 }
 0x10b   :  { %v1052_v50 = vadd.f32 %v1051_v31, %v892_v38  ;;  %v1019_v51 = vadd.f32 %v1018_v32, %v891_v40  ;;  %v815_v52 = vadd.f32 %v814_v45, %v813_v24 }
 0x10c   :  { %v1090_v53 = vsel %vm66_vm2, %v893_v46, 0.0  ;;  %v7805_v54 = vpop.f32.mrb[12].mxu0  ;;  %v7807_v55 = vpop.f32.mrb[12].mxu1 }
 0x10d   :  { %10500 = vst [vmem:[#allocation22_spill] sm:$0xff] %v7805_v54  ;;  %10501 = vst [vmem:[#allocation23_spill] sm:$0xff] %v7807_v55  ;;  %v1091_v56 = vadd.f32 %v1090_v53, %v1089_v43  ;;  %v711_v57 = vadd.f32 %v710_v26, %v7805_v54  ;;  %v894_v58 = vmul.f32 %v7805_v54, %v7805_v54  ;;  %v7813_v60 = vpop.f32.mrb[13].mxu0  ;;  %v7815_v61 = vpop.f32.mrb[13].mxu1 }
 0x10e   :  { %v777_v59 = vadd.f32 %v776_v34, %v7807_v55  ;;  %10502 = vst [vmem:[#allocation24_spill] sm:$0xff] %v7813_v60  ;;  %10503 = vst [vmem:[#allocation25_spill] sm:$0xff] %v7815_v61  ;;  %v896_v62 = vmul.f32 %v7807_v55, %v7807_v55  ;;  %v744_v63 = vadd.f32 %v743_v39, %v7813_v60  ;;  %v816_v7 = vsel %vm66_vm2, %v7815_v61, 0.0  ;;  %v7824_v8 = vpop.f32.mrb[14].mxu0  ;;  %v7826_v9 = vpop.f32.mrb[14].mxu1 }
 0x10f   :  { %v895_v0 = vmul.f32 %v7813_v60, %v7813_v60  ;;  %10504 = vst [vmem:[#allocation26_spill] sm:$0xff] %v7824_v8  ;;  %10505 = vst [vmem:[#allocation27_spill] sm:$0xff] %v7826_v9  ;;  %v987_v12 = vadd.f32 %v986_v44, %v894_v58  ;;  %v817_v15 = vadd.f32 %v816_v7, %v815_v52  ;;  %v7831_v20 = vpop.f32.mrb[15].mxu0  ;;  %v7833_v23 = vpop.f32.mrb[15].mxu1 }
 0x110   :  { %v897_v18 = vmul.f32 %v7815_v61, %v7815_v61  ;;  %v712_v19 = vadd.f32 %v711_v57, %v7824_v8  ;;  %10506 = vst [vmem:[#allocation28_spill] sm:$0xff] %v7831_v20  ;;  %10507 = vst [vmem:[#allocation29_spill] sm:$0xff] %v7833_v23  ;;  %v1053_v24 = vadd.f32 %v1052_v50, %v896_v62  ;;  %v818_v40 = vsel %vm66_vm2, %v7833_v23, 0.0 }
 0x111   :  { %v1020_v25 = vadd.f32 %v1019_v51, %v895_v0  ;;  %v898_v26 = vmul.f32 %v7824_v8, %v7824_v8  ;;  %v778_v31 = vadd.f32 %v777_v59, %v7826_v9  ;;  %v900_v33 = vmul.f32 %v7826_v9, %v7826_v9 }
 0x112   :  { %v1092_v32 = vsel %vm66_vm2, %v897_v18, 0.0  ;;  %v745_v34 = vadd.f32 %v744_v63, %v7831_v20  ;;  %v899_v37 = vmul.f32 %v7831_v20, %v7831_v20  ;;  %v901_v43 = vmul.f32 %v7833_v23, %v7833_v23 }
 0x113   :  { %v1093_v38 = vadd.f32 %v1092_v32, %v1091_v56  ;;  %v988_v39 = vadd.f32 %v987_v12, %v898_v26  ;;  %v1054_v44 = vadd.f32 %v1053_v24, %v900_v33  ;;  %v819_v46 = vadd.f32 %v818_v40, %v817_v15 }
 0x114   :  { %v1021_v45 = vadd.f32 %v1020_v25, %v899_v37  ;;  %v1094_v50 = vsel %vm66_vm2, %v901_v43, 0.0  ;;  %v7849_v51 = vpop.f32.mrb[16].mxu0  ;;  %v7851_v52 = vpop.f32.mrb[16].mxu1 }
 0x115   :  { %10508 = vst [vmem:[#allocation30_spill] sm:$0xff] %v7851_v52  ;;  %v1095_v53 = vadd.f32 %v1094_v50, %v1093_v38  ;;  %v713_v57 = vadd.f32 %v712_v19, %v7849_v51  ;;  %v902_v56 = vmul.f32 %v7849_v51, %v7849_v51  ;;  %v779_v58 = vadd.f32 %v778_v31, %v7851_v52  ;;  %v7857_v59 = vpop.f32.mrb[17].mxu0  ;;  %v7859_v62 = vpop.f32.mrb[17].mxu1 }
 0x116   :  { %10509 = vst [vmem:[#allocation31_spill] sm:$0xff] %v7859_v62  ;;  %v904_v63 = vmul.f32 %v7851_v52, %v7851_v52  ;;  %v746_v0 = vadd.f32 %v745_v34, %v7857_v59  ;;  %v903_v7 = vmul.f32 %v7857_v59, %v7857_v59  ;;  %v820_v12 = vsel %vm66_vm2, %v7859_v62, 0.0  ;;  %v7868_v15 = vpop.f32.mrb[18].mxu0  ;;  %v7870_v18 = vpop.f32.mrb[18].mxu1 }
 0x117   :  { %10510 = vst [vmem:[#allocation32_spill] sm:$0xff] %v7870_v18  ;;  %v989_v19 = vadd.f32 %v988_v39, %v902_v56  ;;  %v821_v24 = vadd.f32 %v820_v12, %v819_v46  ;;  %v905_v25 = vmul.f32 %v7859_v62, %v7859_v62  ;;  %v714_v26 = vadd.f32 %v713_v57, %v7868_v15  ;;  %v7875_v31 = vpop.f32.mrb[19].mxu0  ;;  %v7877_v32 = vpop.f32.mrb[19].mxu1 }
 0x118   :  { %10511 = vst [vmem:[#allocation33_spill] sm:$0xff] %v7877_v32  ;;  %v1055_v33 = vadd.f32 %v1054_v44, %v904_v63  ;;  %v1022_v34 = vadd.f32 %v1021_v45, %v903_v7  ;;  %v906_v37 = vmul.f32 %v7868_v15, %v7868_v15  ;;  %v780_v38 = vadd.f32 %v779_v58, %v7870_v18 }
 0x119   :  { %v1096_v40 = vsel %vm66_vm2, %v905_v25, 0.0  ;;  %v908_v39 = vmul.f32 %v7870_v18, %v7870_v18  ;;  %v747_v43 = vadd.f32 %v746_v0, %v7875_v31  ;;  %v907_v46 = vmul.f32 %v7875_v31, %v7875_v31 }
 0x11a   :  { %v1097_v50 = vadd.f32 %v1096_v40, %v1095_v53  ;;  %v990_v57 = vadd.f32 %v989_v19, %v906_v37  ;;  %v822_v44 = vsel %vm66_vm2, %v7877_v32, 0.0  ;;  %v909_v45 = vmul.f32 %v7877_v32, %v7877_v32 }
 0x11b   :  { %v1056_v56 = vadd.f32 %v1055_v33, %v908_v39  ;;  %v1023_v58 = vadd.f32 %v1022_v34, %v907_v46  ;;  %v823_v63 = vadd.f32 %v822_v44, %v821_v24 }
 0x11c   :  { %v1098_v7 = vsel %vm66_vm2, %v909_v45, 0.0  ;;  %v7893_v12 = vpop.f32.mrb[20].mxu0  ;;  %v7895_v25 = vpop.f32.mrb[20].mxu1 }
 0x11d   :  { %10512 = vst [vmem:[#allocation34_spill] sm:$0xff] %v7893_v12  ;;  %10513 = vst [vmem:[#allocation35_spill] sm:$0xff] %v7895_v25  ;;  %v1099_v0 = vadd.f32 %v1098_v7, %v1097_v50  ;;  %v715_v49 = vadd.f32 %v714_v26, %v7893_v12  ;;  %v910_v53 = vmul.f32 %v7893_v12, %v7893_v12  ;;  %v7901_v37 = vpop.f32.mrb[21].mxu0  ;;  %v7903_v40 = vpop.f32.mrb[21].mxu1 }
 0x11e   :  { %v781_v19 = vadd.f32 %v780_v38, %v7895_v25  ;;  %10514 = vst [vmem:[#allocation36_spill] sm:$0xff] %v7901_v37  ;;  %10515 = vst [vmem:[#allocation37_spill] sm:$0xff] %v7903_v40  ;;  %v912_v24 = vmul.f32 %v7895_v25, %v7895_v25  ;;  %v748_v33 = vadd.f32 %v747_v43, %v7901_v37  ;;  %v824_v26 = vsel %vm66_vm2, %v7903_v40, 0.0  ;;  %v7912_v39 = vpop.f32.mrb[22].mxu0  ;;  %v7914_v46 = vpop.f32.mrb[22].mxu1 }
 0x11f   :  { %v911_v34 = vmul.f32 %v7901_v37, %v7901_v37  ;;  %10516 = vst [vmem:[#allocation38_spill] sm:$0xff] %v7912_v39  ;;  %10517 = vst [vmem:[#allocation39_spill] sm:$0xff] %v7914_v46  ;;  %v991_v38 = vadd.f32 %v990_v57, %v910_v53  ;;  %v825_v50 = vadd.f32 %v824_v26, %v823_v63  ;;  %v7919_v7 = vpop.f32.mrb[23].mxu0  ;;  %v7921_v43 = vpop.f32.mrb[23].mxu1 }
 0x120   :  { %v913_v44 = vmul.f32 %v7903_v40, %v7903_v40  ;;  %v716_v45 = vadd.f32 %v715_v49, %v7912_v39  ;;  %10518 = vst [vmem:[#allocation40_spill] sm:$0xff] %v7919_v7  ;;  %10519 = vst [vmem:[#allocation41_spill] sm:$0xff] %v7921_v43  ;;  %v1057_v25 = vadd.f32 %v1056_v56, %v912_v24  ;;  %v826_v56 = vsel %vm66_vm2, %v7921_v43, 0.0 }
 0x121   :  { %v1024_v9 = vadd.f32 %v1023_v58, %v911_v34  ;;  %v914_v55 = vmul.f32 %v7912_v39, %v7912_v39  ;;  %v782_v23 = vadd.f32 %v781_v19, %v7914_v46  ;;  %v916_v57 = vmul.f32 %v7914_v46, %v7914_v46 }
 0x122   :  { %v1100_v61 = vsel %vm66_vm2, %v913_v44, 0.0  ;;  %v749_v63 = vadd.f32 %v748_v33, %v7919_v7  ;;  %v915_v49 = vmul.f32 %v7919_v7, %v7919_v7  ;;  %v917_v58 = vmul.f32 %v7921_v43, %v7921_v43 }
 0x123   :  { %v1101_v53 = vadd.f32 %v1100_v61, %v1099_v0  ;;  %v992_v26 = vadd.f32 %v991_v38, %v914_v55  ;;  %v1058_v24 = vadd.f32 %v1057_v25, %v916_v57  ;;  %v827_v34 = vadd.f32 %v826_v56, %v825_v50 }
 0x124   :  { %v1025_v19 = vadd.f32 %v1024_v9, %v915_v49  ;;  %v1102_v44 = vsel %vm66_vm2, %v917_v58, 0.0  ;;  %v7937_v40 = vpop.f32.mrb[24].mxu0  ;;  %v7939_v46 = vpop.f32.mrb[24].mxu1 }
 0x125   :  { %10520 = vst [vmem:[#allocation42_spill] sm:$0xff] %v7939_v46  ;;  %v1103_v33 = vadd.f32 %v1102_v44, %v1101_v53  ;;  %v717_v42 = vadd.f32 %v716_v45, %v7937_v40  ;;  %v918_v55 = vmul.f32 %v7937_v40, %v7937_v40  ;;  %v783_v61 = vadd.f32 %v782_v23, %v7939_v46  ;;  %v7945_v0 = vpop.f32.mrb[25].mxu0  ;;  %v7947_v38 = vpop.f32.mrb[25].mxu1 }
 0x126   :  { %10521 = vst [vmem:[#allocation43_spill] sm:$0xff] %v7947_v38  ;;  %v920_v9 = vmul.f32 %v7939_v46, %v7939_v46  ;;  %v750_v25 = vadd.f32 %v749_v63, %v7945_v0  ;;  %v919_v50 = vmul.f32 %v7945_v0, %v7945_v0  ;;  %v828_v45 = vsel %vm66_vm2, %v7947_v38, 0.0  ;;  %v7956_v57 = vpop.f32.mrb[26].mxu0  ;;  %v7958_v49 = vpop.f32.mrb[26].mxu1 }
 0x127   :  { %10522 = vst [vmem:[#allocation44_spill] sm:$0xff] %v7958_v49  ;;  %v993_v23 = vadd.f32 %v992_v26, %v918_v55  ;;  %v829_v53 = vadd.f32 %v828_v45, %v827_v34  ;;  %v921_v56 = vmul.f32 %v7947_v38, %v7947_v38  ;;  %v718_v58 = vadd.f32 %v717_v42, %v7956_v57  ;;  %v7963_v44 = vpop.f32.mrb[27].mxu0  ;;  %v7965_v63 = vpop.f32.mrb[27].mxu1 }
 0x128   :  { %10523 = vst [vmem:[#allocation45_spill] sm:$0xff] %v7965_v63  ;;  %v1059_v43 = vadd.f32 %v1058_v24, %v920_v9  ;;  %v1026_v30 = vadd.f32 %v1025_v19, %v919_v50  ;;  %v922_v48 = vmul.f32 %v7956_v57, %v7956_v57  ;;  %v784_v36 = vadd.f32 %v783_v61, %v7958_v49 }
 0x129   :  { %v1104_v39 = vsel %vm66_vm2, %v921_v56, 0.0  ;;  %v924_v26 = vmul.f32 %v7958_v49, %v7958_v49  ;;  %v751_v34 = vadd.f32 %v750_v25, %v7963_v44  ;;  %v923_v42 = vmul.f32 %v7963_v44, %v7963_v44 }
 0x12a   :  { %v1105_v55 = vadd.f32 %v1104_v39, %v1103_v33  ;;  %v994_v45 = vadd.f32 %v993_v23, %v922_v48  ;;  %v830_v24 = vsel %vm66_vm2, %v7965_v63, 0.0  ;;  %v925_v19 = vmul.f32 %v7965_v63, %v7965_v63 }
 0x12b   :  { %v1060_v9 = vadd.f32 %v1059_v43, %v924_v26  ;;  %v1027_v61 = vadd.f32 %v1026_v30, %v923_v42  ;;  %v831_v50 = vadd.f32 %v830_v24, %v829_v53 }
 0x12c   :  { %v1106_v56 = vsel %vm66_vm2, %v925_v19, 0.0  ;;  %v7981_v12 = vpop.f32.mrb[28].mxu0  ;;  %v7983_v7 = vpop.f32.mrb[28].mxu1 }
 0x12d   :  { %10524 = vst [vmem:[#allocation46_spill] sm:$0xff] %v7981_v12  ;;  %10525 = vst [vmem:[#allocation47_spill] sm:$0xff] %v7983_v7  ;;  %v1107_v25 = vadd.f32 %v1106_v56, %v1105_v55  ;;  %v719_v37 = vadd.f32 %v718_v58, %v7981_v12  ;;  %v926_v48 = vmul.f32 %v7981_v12, %v7981_v12  ;;  %v7989_v33 = vpop.f32.mrb[29].mxu0  ;;  %v7991_v23 = vpop.f32.mrb[29].mxu1 }
 0x12e   :  { %v785_v39 = vadd.f32 %v784_v36, %v7983_v7  ;;  %10526 = vst [vmem:[#allocation48_spill] sm:$0xff] %v7989_v33  ;;  %10527 = vst [vmem:[#allocation49_spill] sm:$0xff] %v7991_v23  ;;  %v928_v30 = vmul.f32 %v7983_v7, %v7983_v7  ;;  %v752_v43 = vadd.f32 %v751_v34, %v7989_v33  ;;  %v832_v58 = vsel %vm66_vm2, %v7991_v23, 0.0  ;;  %v8000_v26 = vpop.f32.mrb[30].mxu0  ;;  %v8002_v42 = vpop.f32.mrb[30].mxu1 }
 0x12f   :  { %v927_v53 = vmul.f32 %v7989_v33, %v7989_v33  ;;  %10528 = vst [vmem:[#allocation50_spill] sm:$0xff] %v8000_v26  ;;  %10529 = vst [vmem:[#allocation51_spill] sm:$0xff] %v8002_v42  ;;  %v995_v36 = vadd.f32 %v994_v45, %v926_v48  ;;  %v833_v55 = vadd.f32 %v832_v58, %v831_v50  ;;  %v8007_v56 = vpop.f32.mrb[31].mxu0  ;;  %v8009_v34 = vpop.f32.mrb[31].mxu1 }
 0x130   :  { %v929_v24 = vmul.f32 %v7991_v23, %v7991_v23  ;;  %v720_v19 = vadd.f32 %v719_v37, %v8000_v26  ;;  %10530 = vst [vmem:[#allocation52_spill] sm:$0xff] %v8007_v56  ;;  %10531 = vst [vmem:[#allocation53_spill] sm:$0xff] %v8009_v34  ;;  %v1061_v7 = vadd.f32 %v1060_v9, %v928_v30  ;;  %v834_v9 = vsel %vm66_vm2, %v8009_v34, 0.0 }
 0x131   :  { %v1028_v12 = vadd.f32 %v1027_v61, %v927_v53  ;;  %v930_v33 = vmul.f32 %v8000_v26, %v8000_v26  ;;  %v786_v8 = vadd.f32 %v785_v39, %v8002_v42  ;;  %v932_v45 = vmul.f32 %v8002_v42, %v8002_v42 }
 0x132   :  { %v1108_v54 = vsel %vm66_vm2, %v929_v24, 0.0  ;;  %v753_v50 = vadd.f32 %v752_v43, %v8007_v56  ;;  %v931_v37 = vmul.f32 %v8007_v56, %v8007_v56  ;;  %v933_v61 = vmul.f32 %v8009_v34, %v8009_v34 }
 0x133   :  { %v1109_v48 = vadd.f32 %v1108_v54, %v1107_v25  ;;  %v996_v58 = vadd.f32 %v995_v36, %v930_v33  ;;  %v1062_v30 = vadd.f32 %v1061_v7, %v932_v45  ;;  %v835_v53 = vadd.f32 %v834_v9, %v833_v55 }
 0x134   :  { %v1029_v39 = vadd.f32 %v1028_v12, %v931_v37  ;;  %v1110_v24 = vsel %vm66_vm2, %v933_v61, 0.0  ;;  %v8025_v23 = vpop.f32.mrb[32].mxu0  ;;  %v8027_v42 = vpop.f32.mrb[32].mxu1 }
 0x135   :  { %10532 = vst [vmem:[#allocation54_spill] sm:$0xff] %v8027_v42  ;;  %v1111_v43 = vadd.f32 %v1110_v24, %v1109_v48  ;;  %v721_v26 = vadd.f32 %v720_v19, %v8025_v23  ;;  %v934_v54 = vmul.f32 %v8025_v23, %v8025_v23  ;;  %v787_v25 = vadd.f32 %v786_v8, %v8027_v42  ;;  %v8033_v33 = vpop.f32.mrb[33].mxu0  ;;  %v8035_v36 = vpop.f32.mrb[33].mxu1 }
 0x136   :  { %10533 = vst [vmem:[#allocation55_spill] sm:$0xff] %v8035_v36  ;;  %v936_v12 = vmul.f32 %v8027_v42, %v8027_v42  ;;  %v754_v7 = vadd.f32 %v753_v50, %v8033_v33  ;;  %v935_v55 = vmul.f32 %v8033_v33, %v8033_v33  ;;  %v836_v19 = vsel %vm66_vm2, %v8035_v36, 0.0  ;;  %v8044_v45 = vpop.f32.mrb[34].mxu0  ;;  %v8046_v37 = vpop.f32.mrb[34].mxu1 }
 0x137   :  { %10534 = vst [vmem:[#allocation56_spill] sm:$0xff] %v8046_v37  ;;  %v997_v8 = vadd.f32 %v996_v58, %v934_v54  ;;  %v837_v48 = vadd.f32 %v836_v19, %v835_v53  ;;  %v937_v9 = vmul.f32 %v8035_v36, %v8035_v36  ;;  %v722_v61 = vadd.f32 %v721_v26, %v8044_v45  ;;  %v8051_v24 = vpop.f32.mrb[35].mxu0  ;;  %v8053_v50 = vpop.f32.mrb[35].mxu1 }
 0x138   :  { %10535 = vst [vmem:[#allocation57_spill] sm:$0xff] %v8053_v50  ;;  %v1063_v34 = vadd.f32 %v1062_v30, %v936_v12  ;;  %v1030_v56 = vadd.f32 %v1029_v39, %v935_v55  ;;  %v938_v20 = vmul.f32 %v8044_v45, %v8044_v45  ;;  %v788_v60 = vadd.f32 %v787_v25, %v8046_v37 }
 0x139   :  { %v1112_v41 = vsel %vm66_vm2, %v937_v9, 0.0  ;;  %v940_v58 = vmul.f32 %v8046_v37, %v8046_v37  ;;  %v755_v53 = vadd.f32 %v754_v7, %v8051_v24  ;;  %v939_v26 = vmul.f32 %v8051_v24, %v8051_v24 }
 0x13a   :  { %v1113_v54 = vadd.f32 %v1112_v41, %v1111_v43  ;;  %v998_v19 = vadd.f32 %v997_v8, %v938_v20  ;;  %v838_v30 = vsel %vm66_vm2, %v8053_v50, 0.0  ;;  %v941_v39 = vmul.f32 %v8053_v50, %v8053_v50 }
 0x13b   :  { %v1064_v12 = vadd.f32 %v1063_v34, %v940_v58  ;;  %v1031_v25 = vadd.f32 %v1030_v56, %v939_v26  ;;  %v839_v55 = vadd.f32 %v838_v30, %v837_v48 }
 0x13c   :  { %v1114_v9 = vsel %vm66_vm2, %v941_v39, 0.0  ;;  %v8069_v29 = vpop.f32.mrb[36].mxu0  ;;  %v8071_v47 = vpop.f32.mrb[36].mxu1 }
 0x13d   :  { %10536 = vst [vmem:[#allocation58_spill] sm:$0xff] %v8069_v29  ;;  %10537 = vst [vmem:[#allocation59_spill] sm:$0xff] %v8071_v47  ;;  %v1115_v7 = vadd.f32 %v1114_v9, %v1113_v54  ;;  %v723_v35 = vadd.f32 %v722_v61, %v8069_v29  ;;  %v942_v41 = vmul.f32 %v8069_v29, %v8069_v29  ;;  %v8077_v43 = vpop.f32.mrb[37].mxu0  ;;  %v8079_v8 = vpop.f32.mrb[37].mxu1 }
 0x13e   :  { %v789_v20 = vadd.f32 %v788_v60, %v8071_v47  ;;  %10538 = vst [vmem:[#allocation60_spill] sm:$0xff] %v8077_v43  ;;  %10539 = vst [vmem:[#allocation61_spill] sm:$0xff] %v8079_v8  ;;  %v944_v56 = vmul.f32 %v8071_v47, %v8071_v47  ;;  %v756_v34 = vadd.f32 %v755_v53, %v8077_v43  ;;  %v840_v61 = vsel %vm66_vm2, %v8079_v8, 0.0  ;;  %v8088_v58 = vpop.f32.mrb[38].mxu0  ;;  %v8090_v26 = vpop.f32.mrb[38].mxu1 }
 0x13f   :  { %v943_v48 = vmul.f32 %v8077_v43, %v8077_v43  ;;  %10540 = vst [vmem:[#allocation62_spill] sm:$0xff] %v8088_v58  ;;  %10541 = vst [vmem:[#allocation63_spill] sm:$0xff] %v8090_v26  ;;  %v999_v60 = vadd.f32 %v998_v19, %v942_v41  ;;  %v841_v54 = vadd.f32 %v840_v61, %v839_v55  ;;  %v8095_v9 = vpop.f32.mrb[39].mxu0  ;;  %v8097_v53 = vpop.f32.mrb[39].mxu1 }
 0x140   :  { %v945_v30 = vmul.f32 %v8079_v8, %v8079_v8  ;;  %v724_v39 = vadd.f32 %v723_v35, %v8088_v58  ;;  %10542 = vst [vmem:[#allocation64_spill] sm:$0xff] %v8095_v9  ;;  %10543 = vst [vmem:[#allocation65_spill] sm:$0xff] %v8097_v53  ;;  %v1065_v47 = vadd.f32 %v1064_v12, %v944_v56  ;;  %v842_v12 = vsel %vm66_vm2, %v8097_v53, 0.0 }
 0x141   :  { %v1032_v29 = vadd.f32 %v1031_v25, %v943_v48  ;;  %v946_v43 = vmul.f32 %v8088_v58, %v8088_v58  ;;  %v790_v37 = vadd.f32 %v789_v20, %v8090_v26  ;;  %v948_v19 = vmul.f32 %v8090_v26, %v8090_v26 }
 0x142   :  { %v1116_v42 = vsel %vm66_vm2, %v945_v30, 0.0  ;;  %v757_v55 = vadd.f32 %v756_v34, %v8095_v9  ;;  %v947_v35 = vmul.f32 %v8095_v9, %v8095_v9  ;;  %v949_v25 = vmul.f32 %v8097_v53, %v8097_v53 }
 0x143   :  { %v1117_v41 = vadd.f32 %v1116_v42, %v1115_v7  ;;  %v1000_v61 = vadd.f32 %v999_v60, %v946_v43  ;;  %v1066_v56 = vadd.f32 %v1065_v47, %v948_v19  ;;  %v843_v48 = vadd.f32 %v842_v12, %v841_v54 }
 0x144   :  { %v1033_v20 = vadd.f32 %v1032_v29, %v947_v35  ;;  %v1118_v30 = vsel %vm66_vm2, %v949_v25, 0.0  ;;  %v8113_v8 = vpop.f32.mrb[40].mxu0  ;;  %v8115_v26 = vpop.f32.mrb[40].mxu1 }
 0x145   :  { %10544 = vst [vmem:[#allocation66_spill] sm:$0xff] %v8115_v26  ;;  %v1119_v34 = vadd.f32 %v1118_v30, %v1117_v41  ;;  %v725_v58 = vadd.f32 %v724_v39, %v8113_v8  ;;  %v950_v42 = vmul.f32 %v8113_v8, %v8113_v8  ;;  %v791_v7 = vadd.f32 %v790_v37, %v8115_v26  ;;  %v8121_v43 = vpop.f32.mrb[41].mxu0  ;;  %v8123_v60 = vpop.f32.mrb[41].mxu1 }
 0x146   :  { %10545 = vst [vmem:[#allocation67_spill] sm:$0xff] %v8123_v60  ;;  %v952_v29 = vmul.f32 %v8115_v26, %v8115_v26  ;;  %v758_v47 = vadd.f32 %v757_v55, %v8121_v43  ;;  %v951_v54 = vmul.f32 %v8121_v43, %v8121_v43  ;;  %v844_v39 = vsel %vm66_vm2, %v8123_v60, 0.0  ;;  %v8132_v19 = vpop.f32.mrb[42].mxu0  ;;  %v8134_v35 = vpop.f32.mrb[42].mxu1 }
 0x147   :  { %10546 = vst [vmem:[#allocation68_spill] sm:$0xff] %v8134_v35  ;;  %v1001_v37 = vadd.f32 %v1000_v61, %v950_v42  ;;  %v845_v41 = vadd.f32 %v844_v39, %v843_v48  ;;  %v953_v12 = vmul.f32 %v8123_v60, %v8123_v60  ;;  %v726_v25 = vadd.f32 %v725_v58, %v8132_v19  ;;  %v8139_v30 = vpop.f32.mrb[43].mxu0  ;;  %v8141_v55 = vpop.f32.mrb[43].mxu1 }
 0x148   :  { %10547 = vst [vmem:[#allocation69_spill] sm:$0xff] %v8141_v55  ;;  %v1067_v53 = vadd.f32 %v1066_v56, %v952_v29  ;;  %v1034_v9 = vadd.f32 %v1033_v20, %v951_v54  ;;  %v954_v26 = vmul.f32 %v8132_v19, %v8132_v19  ;;  %v792_v50 = vadd.f32 %v791_v7, %v8134_v35 }
 0x149   :  { %v1120_v36 = vsel %vm66_vm2, %v953_v12, 0.0  ;;  %v956_v61 = vmul.f32 %v8134_v35, %v8134_v35  ;;  %v759_v48 = vadd.f32 %v758_v47, %v8139_v30  ;;  %v955_v58 = vmul.f32 %v8139_v30, %v8139_v30 }
 0x14a   :  { %v1121_v42 = vadd.f32 %v1120_v36, %v1119_v34  ;;  %v1002_v39 = vadd.f32 %v1001_v37, %v954_v26  ;;  %v846_v56 = vsel %vm66_vm2, %v8141_v55, 0.0  ;;  %v957_v20 = vmul.f32 %v8141_v55, %v8141_v55 }
 0x14b   :  { %v1068_v29 = vadd.f32 %v1067_v53, %v956_v61  ;;  %v1035_v7 = vadd.f32 %v1034_v9, %v955_v58  ;;  %v847_v54 = vadd.f32 %v846_v56, %v845_v41 }
 0x14c   :  { %v1122_v12 = vsel %vm66_vm2, %v957_v20, 0.0  ;;  %v8157_v60 = vpop.f32.mrb[44].mxu0  ;;  %v8159_v35 = vpop.f32.mrb[44].mxu1 }
 0x14d   :  { %10548 = vst [vmem:[#allocation70_spill] sm:$0xff] %v8157_v60  ;;  %10549 = vst [vmem:[#allocation71_spill] sm:$0xff] %v8159_v35  ;;  %v1123_v47 = vadd.f32 %v1122_v12, %v1121_v42  ;;  %v727_v49 = vadd.f32 %v726_v25, %v8157_v60  ;;  %v958_v36 = vmul.f32 %v8157_v60, %v8157_v60  ;;  %v8165_v34 = vpop.f32.mrb[45].mxu0  ;;  %v8167_v37 = vpop.f32.mrb[45].mxu1 }
 0x14e   :  { %v793_v26 = vadd.f32 %v792_v50, %v8159_v35  ;;  %10550 = vst [vmem:[#allocation72_spill] sm:$0xff] %v8165_v34  ;;  %10551 = vst [vmem:[#allocation73_spill] sm:$0xff] %v8167_v37  ;;  %v960_v9 = vmul.f32 %v8159_v35, %v8159_v35  ;;  %v760_v53 = vadd.f32 %v759_v48, %v8165_v34  ;;  %v848_v25 = vsel %vm66_vm2, %v8167_v37, 0.0  ;;  %v8176_v61 = vpop.f32.mrb[46].mxu0  ;;  %v8178_v58 = vpop.f32.mrb[46].mxu1 }
 0x14f   :  { %v959_v41 = vmul.f32 %v8165_v34, %v8165_v34  ;;  %10552 = vst [vmem:[#allocation74_spill] sm:$0xff] %v8176_v61  ;;  %10553 = vst [vmem:[#allocation75_spill] sm:$0xff] %v8178_v58  ;;  %v1003_v50 = vadd.f32 %v1002_v39, %v958_v36  ;;  %v849_v42 = vadd.f32 %v848_v25, %v847_v54  ;;  %v8183_v12 = vpop.f32.mrb[47].mxu0  ;;  %v8185_v48 = vpop.f32.mrb[47].mxu1 }
 0x150   :  { %v961_v56 = vmul.f32 %v8167_v37, %v8167_v37  ;;  %v728_v20 = vadd.f32 %v727_v49, %v8176_v61  ;;  %10554 = vst [vmem:[#allocation76_spill] sm:$0xff] %v8183_v12  ;;  %10555 = vst [vmem:[#allocation77_spill] sm:$0xff] %v8185_v48  ;;  %v1069_v35 = vadd.f32 %v1068_v29, %v960_v9  ;;  %v850_v29 = vsel %vm66_vm2, %v8185_v48, 0.0 }
 0x151   :  { %v1036_v60 = vadd.f32 %v1035_v7, %v959_v41  ;;  %v962_v34 = vmul.f32 %v8176_v61, %v8176_v61  ;;  %v794_v55 = vadd.f32 %v793_v26, %v8178_v58  ;;  %v964_v39 = vmul.f32 %v8178_v58, %v8178_v58 }
 0x152   :  { %v1124_v46 = vsel %vm66_vm2, %v961_v56, 0.0  ;;  %v761_v54 = vadd.f32 %v760_v53, %v8183_v12  ;;  %v963_v49 = vmul.f32 %v8183_v12, %v8183_v12  ;;  %v965_v7 = vmul.f32 %v8185_v48, %v8185_v48 }
 0x153   :  { %v1125_v36 = vadd.f32 %v1124_v46, %v1123_v47  ;;  %v1004_v25 = vadd.f32 %v1003_v50, %v962_v34  ;;  %v1070_v9 = vadd.f32 %v1069_v35, %v964_v39  ;;  %v851_v41 = vadd.f32 %v850_v29, %v849_v42 }
 0x154   :  { %v1037_v26 = vadd.f32 %v1036_v60, %v963_v49  ;;  %v1126_v56 = vsel %vm66_vm2, %v965_v7, 0.0  ;;  %v8201_v37 = vpop.f32.mrb[48].mxu0  ;;  %v8203_v58 = vpop.f32.mrb[48].mxu1 }
 0x155   :  { %10556 = vst [vmem:[#allocation78_spill] sm:$0xff] %v8203_v58  ;;  %v1127_v53 = vadd.f32 %v1126_v56, %v1125_v36  ;;  %v729_v61 = vadd.f32 %v728_v20, %v8201_v37  ;;  %v966_v46 = vmul.f32 %v8201_v37, %v8201_v37  ;;  %v795_v47 = vadd.f32 %v794_v55, %v8203_v58  ;;  %v8209_v34 = vpop.f32.mrb[49].mxu0  ;;  %v8211_v50 = vpop.f32.mrb[49].mxu1 }
 0x156   :  { %10557 = vst [vmem:[#allocation79_spill] sm:$0xff] %v8211_v50  ;;  %v968_v60 = vmul.f32 %v8203_v58, %v8203_v58  ;;  %v762_v35 = vadd.f32 %v761_v54, %v8209_v34  ;;  %v967_v42 = vmul.f32 %v8209_v34, %v8209_v34  ;;  %v852_v20 = vsel %vm66_vm2, %v8211_v50, 0.0  ;;  %v8220_v39 = vpop.f32.mrb[50].mxu0  ;;  %v8222_v49 = vpop.f32.mrb[50].mxu1 }
 0x157   :  { %10558 = vst [vmem:[#allocation80_spill] sm:$0xff] %v8222_v49  ;;  %v1005_v55 = vadd.f32 %v1004_v25, %v966_v46  ;;  %v853_v36 = vadd.f32 %v852_v20, %v851_v41  ;;  %v969_v29 = vmul.f32 %v8211_v50, %v8211_v50  ;;  %v730_v7 = vadd.f32 %v729_v61, %v8220_v39  ;;  %v8227_v56 = vpop.f32.mrb[51].mxu0  ;;  %v8229_v54 = vpop.f32.mrb[51].mxu1 }
 0x158   :  { %10559 = vst [vmem:[#allocation81_spill] sm:$0xff] %v8229_v54  ;;  %v1071_v48 = vadd.f32 %v1070_v9, %v968_v60  ;;  %v1038_v12 = vadd.f32 %v1037_v26, %v967_v42  ;;  %v970_v58 = vmul.f32 %v8220_v39, %v8220_v39  ;;  %v796_v63 = vadd.f32 %v795_v47, %v8222_v49 }
 0x159   :  { %v1128_v38 = vsel %vm66_vm2, %v969_v29, 0.0  ;;  %v972_v25 = vmul.f32 %v8222_v49, %v8222_v49  ;;  %v763_v41 = vadd.f32 %v762_v35, %v8227_v56  ;;  %v971_v61 = vmul.f32 %v8227_v56, %v8227_v56 }
 0x15a   :  { %v1129_v46 = vadd.f32 %v1128_v38, %v1127_v53  ;;  %v1006_v20 = vadd.f32 %v1005_v55, %v970_v58  ;;  %v854_v9 = vsel %vm66_vm2, %v8229_v54, 0.0  ;;  %v973_v26 = vmul.f32 %v8229_v54, %v8229_v54 }
 0x15b   :  { %v1072_v60 = vadd.f32 %v1071_v48, %v972_v25  ;;  %v1039_v47 = vadd.f32 %v1038_v12, %v971_v61  ;;  %v855_v42 = vadd.f32 %v854_v9, %v853_v36  ;;  %v1146_v35 = vlaneseq }
 0x15c   :  { %v1130_v29 = vsel %vm66_vm2, %v973_v26, 0.0  ;;  %v8245_v50 = vpop.f32.mrb[52].mxu0  ;;  %v8247_v49 = vpop.f32.mrb[52].mxu1 }
 0x15d   :  { %10560 = vst [vmem:[#allocation82_spill] sm:$0xff] %v8245_v50  ;;  %10561 = vst [vmem:[#allocation83_spill] sm:$0xff] %v8247_v49  ;;  %v1131_v18 = vadd.f32 %v1130_v29, %v1129_v46  ;;  %v731_v38 = vadd.f32 %v730_v7, %v8245_v50  ;;  %v974_v58 = vmul.f32 %v8245_v50, %v8245_v50  ;;  %v8253_v55 = vpop.f32.mrb[53].mxu0  ;;  %v8255_v48 = vpop.f32.mrb[53].mxu1 }
 0x15e   :  { %v797_v53 = vadd.f32 %v796_v63, %v8247_v49  ;;  %10562 = vst [vmem:[#allocation84_spill] sm:$0xff] %v8253_v55  ;;  %10563 = vst [vmem:[#allocation85_spill] sm:$0xff] %v8255_v48  ;;  %v976_v12 = vmul.f32 %v8247_v49, %v8247_v49  ;;  %v764_v36 = vadd.f32 %v763_v41, %v8253_v55  ;;  %v856_v7 = vsel %vm66_vm2, %v8255_v48, 0.0  ;;  %v8264_v61 = vpop.f32.mrb[54].mxu0  ;;  %v8266_v46 = vpop.f32.mrb[54].mxu1 }
 0x15f   :  { %v975_v25 = vmul.f32 %v8253_v55, %v8253_v55  ;;  %10564 = vst [vmem:[#allocation86_spill] sm:$0xff] %v8264_v61  ;;  %10565 = vst [vmem:[#allocation87_spill] sm:$0xff] %v8266_v46  ;;  %v1007_v63 = vadd.f32 %v1006_v20, %v974_v58  ;;  %v857_v9 = vadd.f32 %v856_v7, %v855_v42  ;;  %v8271_v49 = vpop.f32.mrb[55].mxu0  ;;  %v8273_v41 = vpop.f32.mrb[55].mxu1 }
 0x160   :  { %v977_v26 = vmul.f32 %v8255_v48, %v8255_v48  ;;  %v732_v29 = vadd.f32 %v731_v38, %v8264_v61  ;;  %10566 = vst [vmem:[#allocation88_spill] sm:$0xff] %v8271_v49  ;;  %10567 = vst [vmem:[#allocation89_spill] sm:$0xff] %v8273_v41  ;;  %v1073_v50 = vadd.f32 %v1072_v60, %v976_v12 }
 0x161   :  { %v1040_v55 = vadd.f32 %v1039_v47, %v975_v25  ;;  %v978_v54 = vmul.f32 %v8264_v61, %v8264_v61  ;;  %v798_v52 = vadd.f32 %v797_v53, %v8266_v46  ;;  %v980_v42 = vmul.f32 %v8266_v46, %v8266_v46 }
 0x162   :  { %v1132_v32 = vsel %vm66_vm2, %v977_v26, 0.0  ;;  %v733_v20 = vrot.slane %v732_v29, 4  ;;  %v765_v58 = vadd.f32 %v764_v36, %v8271_v49  ;;  %v979_v60 = vmul.f32 %v8271_v49, %v8271_v49 }
 0x163   :  { %v1133_v38 = vadd.f32 %v1132_v32, %v1131_v18  ;;  %v1008_v7 = vadd.f32 %v1007_v63, %v978_v54  ;;  %v799_v48 = vrot.slane %v798_v52, 4  ;;  %v1074_v12 = vadd.f32 %v1073_v50, %v980_v42 }
 0x164   :  { %v734_v47 = vadd.f32 %v733_v20, %v732_v29  ;;  %v766_v25 = vrot.slane %v765_v58, 4  ;;  %v858_v53 = vsel %vm66_vm2, %v8273_v41, 0.0  ;;  %v1041_v62 = vadd.f32 %v1040_v55, %v979_v60 }
 0x165   :  { %v1009_v61 = vrot.slane %v1008_v7, 4  ;;  %v800_v26 = vadd.f32 %v799_v48, %v798_v52  ;;  %v859_v22 = vadd.f32 %v858_v53, %v857_v9  ;;  %v1075_v46 = vrot.slane %v1074_v12, 4 }
 0x166   :  { %v735_v6 = vrot.slane %v734_v47, 2  ;;  %v767_v28 = vadd.f32 %v766_v25, %v765_v58  ;;  %v981_v18 = vmul.f32 %v8273_v41, %v8273_v41  ;;  %v1042_v36 = vrot.slane %v1041_v62, 4 }
 0x167   :  { %v1010_v32 = vadd.f32 %v1009_v61, %v1008_v7  ;;  %v801_v54 = vrot.slane %v800_v26, 2  ;;  %v860_v63 = vrot.slane %v859_v22, 4  ;;  %v1076_v50 = vadd.f32 %v1075_v46, %v1074_v12 }
 0x168   :  { %v736_v29 = vadd.f32 %v735_v6, %v734_v47  ;;  %v768_v20 = vrot.slane %v767_v28, 2  ;;  %v1134_v42 = vsel %vm66_vm2, %v981_v18, 0.0  ;;  %v1043_v52 = vadd.f32 %v1042_v36, %v1041_v62 }
 0x169   :  { %v1011_v49 = vrot.slane %v1010_v32, 2  ;;  %v802_v14 = vadd.f32 %v801_v54, %v800_v26  ;;  %v861_v55 = vadd.f32 %v860_v63, %v859_v22  ;;  %v1077_v48 = vrot.slane %v1076_v50, 2 }
 0x16a   :  { %v769_v9 = vadd.f32 %v768_v20, %v767_v28  ;;  %v1135_v60 = vadd.f32 %v1134_v42, %v1133_v38  ;;  %v8289_v58 = vshrl.u32 %v1146_v35, 7  ;;  %v737_v25 = vrot.slane %v736_v29, 1 }
 0x16b   :  { %v1012_v53 = vadd.f32 %v1011_v49, %v1010_v32  ;;  %v1044_v61 = vrot.slane %v1043_v52, 2  ;;  %v862_v7 = vrot.slane %v861_v55, 2  ;;  %v803_v41 = vrot.slane %v802_v14, 1 }
 0x16c   :  { %v1078_v11 = vadd.f32 %v1077_v48, %v1076_v50  ;;  %v1136_v6 = vrot.slane %v1135_v60, 4  ;;  %v770_v47 = vrot.slane %v769_v9, 1  ;;  %vm1148_vm3 = vcmp.eq.s32.totalorder %v8289_v58, 0 }
 0x16d   :  { %v1013_v46 = vrot.slane %v1012_v53, 1  ;;  %v1045_v12 = vadd.f32 %v1044_v61, %v1043_v52  ;;  %v863_v2 = vadd.f32 %v862_v7, %v861_v55  ;;  %v738_v22 = vadd.f32 %v737_v25, %v736_v29  ;;  %v1383_v55 = vld [vmem:[%s10568_s15 + $0x28] sm:$0xff]  ;;  %v1380_v61 = vld [vmem:[%s10568_s15 + $0x10] sm:$0xff] }
 0x16e   :  { %v1079_v18 = vrot.slane %v1078_v11, 1  ;;  %v1137_v26 = vadd.f32 %v1136_v6, %v1135_v60  ;;  %v804_v35 = vadd.f32 %v803_v41, %v802_v14  ;;  %v771_v49 = vadd.f32 %v770_v47, %v769_v9  ;;  %v1379_v41 = vld [vmem:[%s10568_s15 + $0x8] sm:$0xff]  ;;  %v1385_v9 = vld [vmem:[%s10568_s15 + $0x38] sm:$0xff]  ;;  %v1378_v60 = vld [vmem:[%s10568_s15] sm:$0xff] }
 0x16f   :  { %v1046_v28 = vrot.slane %v1045_v12, 1  ;;  %v1014_v62 = vadd.f32 %v1013_v46, %v1012_v53  ;;  %v864_v63 = vrot.slane %v863_v2, 1  ;;  %v6531_v48 = vpack.c.bf16 %v1383_v55, %v1379_v41  ;;  %v1382_v53 = vld [vmem:[%s10568_s15 + $0x20] sm:$0xff]  ;;  %v1384_v7 = vld [vmem:[%s10568_s15 + $0x30] sm:$0xff]  ;;  %v1387_v47 = vld [vmem:[%s10568_s15 + $0x48] sm:$0xff] }
 0x170   :  { %v1138_v38 = vrot.slane %v1137_v26, 2  ;;  %v1080_v54 = vadd.f32 %v1079_v18, %v1078_v11  ;;  %v6533_v6 = vpack.c.bf16 %v1382_v53, %v1378_v60  ;;  %v6541_v46 = vpack.c.bf16 %v1384_v7, %v1380_v61  ;;  %v1389_v18 = vld [vmem:[%s10568_s15 + $0x58] sm:$0xff]  ;;  %v1359_v53 = vld [vmem:[%s10376_s11] sm:$0x1] }
 0x171   :  { %v1047_v32 = vadd.f32 %v1046_v28, %v1045_v12  ;;  %v1149_v36 = vsel %vm1148_vm3, %v738_v22, %v1014_v62  ;;  %v865_v52 = vadd.f32 %v864_v63, %v863_v2  ;;  %v1381_v2 = vld [vmem:[%s10568_s15 + $0x18] sm:$0xff]  ;;  %6532 = vmatprep.subr.bf16.mxu0 %v6531_v48  ;;  %v1391_v12 = vld [vmem:[%s10568_s15 + $0x68] sm:$0xff]  ;;  %v1386_v28 = vld [vmem:[%s10568_s15 + $0x40] sm:$0xff]  ;;  %v10569_v63 = vmov 0.0|0.0  }
 0x172   :  { %v1139_v50 = vadd.f32 %v1138_v38, %v1137_v26  ;;  %v1151_v20 = vsel %vm1148_vm3, %v804_v35, %v1080_v54  ;;  %v6539_v25 = vpack.c.bf16 %v1385_v9, %v1381_v2  ;;  %v6535_v26 = vpack.c.bf16 %v1391_v12, %v1387_v47  ;;  %v1393_v22 = vld [vmem:[%s10568_s15 + $0x78] sm:$0xff]  ;;  %v1390_v62 = vld [vmem:[%s10568_s15 + $0x60] sm:$0xff]  ;;  %v1388_v54 = vld [vmem:[%s10568_s15 + $0x50] sm:$0xff] }
 0x173   :  { %v1150_v42 = vsel %vm1148_vm3, %v771_v49, %v1047_v32  ;;  %v6543_v35 = vpack.c.bf16 %v1393_v22, %v1389_v18  ;;  %v6537_v38 = vpack.c.bf16 %v1390_v62, %v1386_v28  ;;  %v1392_v49 = vld [vmem:[%s10568_s15 + $0x70] sm:$0xff]  ;;  %v6893_v22 = vld [vmem:[%s10375_s3] ss:$8 sps:$4 sm:$0xff]  }
 0x174   :  { %1276 = vmatprep.mubr.f32.mxu0 %v1150_v42  ;;  %v1140_v29 = vrot.slane %v1139_v50, 1  ;;  %6540 = vmatprep.subr.bf16.mxu1 %v6539_v25  ;;  %v6545_v32 = vpack.c.bf16 %v1392_v49, %v1388_v54  ;;  %v6898_v28 = vld [vmem:[%s10375_s3 + $0x14] ss:$8 sps:$4 sm:$0xff]   ;;  %v6899_v54 = vld [vmem:[%s10375_s3 + $0x20] ss:$8 sps:$4 sm:$0xff]  }
 0x175   :  { %1277 = vmatmul.mubr.f32.vlgmr.msra.gmra.mrb[56].mxu0 %v1149_v36  ;;  %v7224_v36 = vmov 0.0   ;;  %v6904_v49 = vld [vmem:[%s10375_s3 + $0x34] ss:$8 sps:$4 sm:$0xff]  }
 0x176   :  { %v1141_v14 = vadd.f32 %v1140_v29, %v1139_v50  ;;  %6534 = vmatpush1.bf16.msra.mxu0 %v6533_v6  ;;  %1462 = vmatprep.mubr.f32.mxu0 %v7224_v36  ;;  %v6895_v50 = vld [vmem:[%s10375_s3 + $0x4] ss:$8 sps:$4 sm:$0xff]   ;;  %v1366_v6 = vld [vmem:[%s10376_s11 + $0x1] sm:$0x1] }
 0x177   :  { %6536 = vmatprep.subr.bf16.mxu0 %v6535_v26 }
 0x178   :  { %v1152_v11 = vsel %vm1148_vm3, %v865_v52, %v1141_v14 }
 0x179   :  { %5919 = vmatprep.mubr.msk.f32.mxu1 %vm66_vm2, %v1152_v11 }
 0x17a   :  { %1347 = vmatmul.mubr.f32.vlgmr.msra.gmra.mrb[56].mxu1 %v1151_v20  ;;  %6538 = vmatpush1.bf16.msra.mxu0 %v6537_v38  ;;  %v6901_v38 = vld [vmem:[%s10375_s3 + $0x24] ss:$8 sps:$4 sm:$0xff]  }
 0x17b   :  { %6542 = vmatpush1.bf16.msra.mxu1 %v6541_v46  ;;  %1533 = vmatprep.mubr.f32.mxu1 %v7224_v36  ;;  %v8362_v46 = vsub.s32 0, %v8289_v58 }
 0x17c   :  { %6544 = vmatprep.subr.bf16.mxu1 %v6543_v35  ;;  %2489 = vmatprep.subr.bf16.mxu0 %v6895_v50  ;;  %v6896_v35 = vld [vmem:[%s10375_s3 + $0x10] ss:$8 sps:$4 sm:$0xff]   ;;  %v6907_v50 = vld [vmem:[%s10375_s3 + $0x44] ss:$8 sps:$4 sm:$0xff]  }
 0x17f   :  { %6546 = vmatpush1.bf16.msra.mxu1 %v6545_v32  ;;  %v6902_v32 = vld [vmem:[%s10375_s3 + $0x30] ss:$8 sps:$4 sm:$0xff]  }
 0x180   :  { %6547 = vmatprep.subr.bf16.mxu1 %v10569_v63 }
 0x248   :  { %v6229_v20 = vpop.f32.mrb[56].mxu0 }
 0x249   :  { %v6230_v42 = vpop.f32.mrb[57].mxu0 }
 0x24a   :  { %v6231_v29 = vadd.f32 %v6230_v42, %v6229_v20  ;;  %v6905_v20 = vld [vmem:[%s10375_s3 + $0x40] ss:$8 sps:$4 sm:$0xff]   ;;  %v6910_v42 = vld [vmem:[%s10375_s3 + $0x54] ss:$8 sps:$4 sm:$0xff]  }
 0x24d   :  { %v1348_v52 = vpop.f32.mrb[56].mxu1 }
 0x24e   :  { %v1349_v14 = vadd.f32 %v6231_v29, %v1348_v52  ;;  %v1350_v11 = vpop.f32.mrb[57].mxu1  ;;  %v6908_v29 = vld [vmem:[%s10375_s3 + $0x50] ss:$8 sps:$4 sm:$0xff]   ;;  %v6913_v52 = vld [vmem:[%s10375_s3 + $0x64] ss:$8 sps:$4 sm:$0xff]  }
 0x24f   :  { %v6916_v11 = vld [vmem:[%s10375_s3 + $0x74] ss:$8 sps:$4 sm:$0xff]  }
 0x250   :  { %v1352_v41 = vmul.f32 0.00031887754, %v1349_v14  ;;  %v6911_v14 = vld [vmem:[%s10375_s3 + $0x60] ss:$8 sps:$4 sm:$0xff]  }
 0x252   :  { %v1353_v55 = vmul.f32 %v1352_v41, %v1352_v41 }
 0x254   :  { %v1355_v48 = vrot.slane %v1353_v55, 7  ;;  %v6919_v55 = vld [vmem:[%s10375_s3 + $0x84] ss:$8 sps:$4 sm:$0xff]  }
 0x256   :  { %v1357_v2 = vsub.f32 %v1352_v41, %v1355_v48  ;;  %v6917_v48 = vld [vmem:[%s10375_s3 + $0x80] ss:$8 sps:$4 sm:$0xff]  }
 0x258   :  { %v1358_v9 = vmax.f32 %v1357_v2, 0.0  ;;  %v6922_v2 = vld [vmem:[%s10375_s3 + $0x94] ss:$8 sps:$4 sm:$0xff]  }
 0x25a   :  { %v1360_v60 = vadd.f32 1e-05, %v1358_v9  ;;  %v6920_v9 = vld [vmem:[%s10375_s3 + $0x90] ss:$8 sps:$4 sm:$0xff]  }
 0x25c   :  { %7211 = vrsqrt.f32 %v1360_v60  ;;  %v6925_v60 = vld [vmem:[%s10375_s3 + $0xa4] ss:$8 sps:$4 sm:$0xff]  }
 0x266   :  { %v7212_v25 = vpop.eup %7211 }
 0x267   :  { %v1363_v61 = vrot.slane %v7212_v25, 1  ;;  %v6923_v25 = vld [vmem:[%s10375_s3 + $0xa0] ss:$8 sps:$4 sm:$0xff]  }
 0x269   :  { %v1365_v7 = vmul.f32 %v1363_v61, %v1359_v53  ;;  %v6928_v53 = vld [vmem:[%s10375_s3 + $0xb4] ss:$8 sps:$4 sm:$0xff]   ;;  %v6926_v61 = vld [vmem:[%s10375_s3 + $0xb0] ss:$8 sps:$4 sm:$0xff]  }
 0x26b   :  { %v1367_v47 = vmul.f32 %v1365_v7, %v1352_v41  ;;  %v1372_v18 = vrot.slane %v1365_v7, %v8362_v46  ;;  %v6914_v41 = vld [vmem:[%s10375_s3 + $0x70] ss:$8 sps:$4 sm:$0xff]   ;;  %v6931_v7 = vld [vmem:[%s10375_s3 + $0xc4] ss:$8 sps:$4 sm:$0xff]  }
 0x26d   :  { %v1368_v12 = vsub.f32 %v1366_v6, %v1367_v47  ;;  %v6929_v6 = vld [vmem:[%s10375_s3 + $0xc0] ss:$8 sps:$4 sm:$0xff]   ;;  %v6934_v47 = vld [vmem:[%s10375_s3 + $0xd4] ss:$8 sps:$4 sm:$0xff]  }
 0x26f   :  { %v1376_v26 = vrot.slane %v1368_v12, %v8362_v46  ;;  %v6932_v12 = vld [vmem:[%s10375_s3 + $0xd0] ss:$8 sps:$4 sm:$0xff]  }
 0x271   :  { %v1377_v62 = vsel %vm1148_vm3, %v1372_v18, %v1376_v26  ;;  %v6937_v18 = vld [vmem:[%s10375_s3 + $0xe4] ss:$8 sps:$4 sm:$0xff]   ;;  %v6935_v26 = vld [vmem:[%s10375_s3 + $0xe0] ss:$8 sps:$4 sm:$0xff]  }
 0x272   :  { %5920 = vmatmul.mubr.msk.f32.vlgmr.msra.gmra.mrb[58].mxu0 %vm1394_vm4, %v1377_v62  ;;  %5921 = vmatmul.mubr.msk.f32.vlgmr.msra.gmra.mrb[58].mxu1 %vm1394_vm4, %v1377_v62  ;;  %v6943_v62 = vld [vmem:[%s10375_s3 + $0x104] ss:$8 sps:$4 sm:$0xff]  }
 0x273   :  { %2490 = vmatpush1.bf16.msra.mxu0 %v6893_v22  ;;  %v6940_v22 = vld [vmem:[%s10375_s3 + $0xf4] ss:$8 sps:$4 sm:$0xff]  }
 0x274   :  { %2491 = vmatprep.subr.bf16.mxu0 %v6898_v28  ;;  %v6938_v28 = vld [vmem:[%s10375_s3 + $0xf0] ss:$8 sps:$4 sm:$0xff]  }
 0x277   :  { %2492 = vmatpush1.bf16.msra.mxu0 %v6896_v35  ;;  %v8467_v35 = vsub.s32 1, %v8289_v58  ;;  %v5754_v58 = vld [vmem:[%s10387_s17 + $0x28] sm:$0xff] }
 0x278   :  { %2493 = vmatprep.subr.bf16.mxu0 %v6901_v38 }
 0x27b   :  { %2494 = vmatpush1.bf16.msra.mxu0 %v6899_v54 }
 0x27c   :  { %2495 = vmatprep.subr.bf16.mxu0 %v6904_v49 }
 0x27f   :  { %2496 = vmatpush1.bf16.msra.mxu0 %v6902_v32 }
 0x280   :  { %2497 = vmatprep.subr.bf16.mxu0 %v6907_v50 }
 0x283   :  { %2498 = vmatpush1.bf16.msra.mxu0 %v6905_v20 }
 0x284   :  { %2499 = vmatprep.subr.bf16.mxu0 %v6910_v42 }
 0x287   :  { %2500 = vmatpush1.bf16.msra.mxu0 %v6908_v29 }
 0x288   :  { %2501 = vmatprep.subr.bf16.mxu0 %v6913_v52 }
 0x28b   :  { %2502 = vmatpush1.bf16.msra.mxu0 %v6911_v14 }
 0x28c   :  { %2503 = vmatprep.subr.bf16.mxu0 %v6916_v11 }
 0x28f   :  { %2504 = vmatpush1.bf16.msra.mxu0 %v6914_v41 }
 0x290   :  { %2505 = vmatprep.subr.bf16.mxu0 %v6919_v55 }
 0x293   :  { %2506 = vmatpush1.bf16.msra.mxu0 %v6917_v48 }
 0x294   :  { %2507 = vmatprep.subr.bf16.mxu0 %v6922_v2 }
 0x297   :  { %2508 = vmatpush1.bf16.msra.mxu0 %v6920_v9 }
 0x298   :  { %2509 = vmatprep.subr.bf16.mxu0 %v6925_v60 }
 0x29b   :  { %2510 = vmatpush1.bf16.msra.mxu0 %v6923_v25 }
 0x29c   :  { %2511 = vmatprep.subr.bf16.mxu0 %v6928_v53 }
 0x29f   :  { %2512 = vmatpush1.bf16.msra.mxu0 %v6926_v61 }
 0x2a0   :  { %2513 = vmatprep.subr.bf16.mxu0 %v6931_v7 }
 0x2a3   :  { %2514 = vmatpush1.bf16.msra.mxu0 %v6929_v6 }
 0x2a4   :  { %2515 = vmatprep.subr.bf16.mxu0 %v6934_v47 }
 0x2a7   :  { %2516 = vmatpush1.bf16.msra.mxu0 %v6932_v12 }
 0x2a8   :  { %2517 = vmatprep.subr.bf16.mxu0 %v6937_v18 }
 0x2ab   :  { %2518 = vmatpush1.bf16.msra.mxu0 %v6935_v26 }
 0x2ac   :  { %2519 = vmatprep.subr.bf16.mxu0 %v6940_v22 }
 0x2af   :  { %2520 = vmatpush1.bf16.msra.mxu0 %v6938_v28 }
 0x2b0   :  { %2592 = vmatprep.subr.bf16.mxu0 %v6943_v62 }
 0x345   :  { %v1464_v38 = vpop.f32.mrb[58].mxu0  ;;  %v1535_v54 = vpop.f32.mrb[58].mxu1 }
 0x346   :  { %v8470_v49 = vrot.slane %v1464_v38, %v8362_v46  ;;  %v8473_v32 = vrot.slane %v1464_v38, %v8467_v35  ;;  %v8476_v50 = vrot.slane %v1535_v54, %v8362_v46  ;;  %v8479_v20 = vrot.slane %v1535_v54, %v8467_v35  ;;  %v1466_v42 = vpop.f32.mrb[59].mxu0  ;;  %v1537_v29 = vpop.f32.mrb[59].mxu1 }
 0x347   :  { %v8482_v52 = vrot.slane %v1466_v42, %v8362_v46  ;;  %v8485_v14 = vrot.slane %v1466_v42, %v8467_v35  ;;  %v8488_v11 = vrot.slane %v1537_v29, %v8362_v46  ;;  %v8491_v41 = vrot.slane %v1537_v29, %v8467_v35 }
 0x348   :  { %v1556_v55 = vmul.f32 %v8470_v49, %v7672_v1  ;;  %v1560_v48 = vmul.f32 %v8470_v49, %v7691_v10  ;;  %v1572_v2 = vmul.f32 %v8470_v49, %v7761_v3  ;;  %v1576_v9 = vmul.f32 %v8470_v49, %v7780_v21 }
 0x349   :  { %v1557_v60 = vmul.f32 %v8482_v52, %v7679_v4  ;;  %v1561_v25 = vmul.f32 %v8482_v52, %v7703_v16  ;;  %v1573_v53 = vmul.f32 %v8482_v52, %v7769_v13  ;;  %v1577_v1 = vmul.f32 %v8482_v52, %v7787_v27 }
 0x34a   :  { %v1684_v10 = vadd.f32 %v8473_v32, %v1556_v55  ;;  %v1688_v61 = vadd.f32 %v8473_v32, %v1560_v48  ;;  %v1700_v3 = vadd.f32 %v8473_v32, %v1572_v2  ;;  %v1704_v21 = vadd.f32 %v8473_v32, %v1576_v9  ;;  %v6941_v55 = vld [vmem:[%s10375_s3 + $0x100] ss:$8 sps:$4 sm:$0xff]  }
 0x34b   :  { %v1685_v7 = vadd.f32 %v8485_v14, %v1557_v60  ;;  %v1689_v4 = vadd.f32 %v8485_v14, %v1561_v25  ;;  %v1701_v16 = vadd.f32 %v8485_v14, %v1573_v53  ;;  %v1705_v6 = vadd.f32 %v8485_v14, %v1577_v1  ;;  %v6946_v60 = vld [vmem:[%s10375_s3 + $0x114] ss:$8 sps:$4 sm:$0xff]  }
 0x34c   :  { %v1796_v13 = vmax.f32 %v1684_v10, 0.0  ;;  %v1800_v47 = vmax.f32 %v1688_v61, 0.0  ;;  %v1812_v12 = vmax.f32 %v1700_v3, 0.0  ;;  %v1816_v27 = vmax.f32 %v1704_v21, 0.0 }
 0x34d   :  { %v1797_v18 = vmax.f32 %v1685_v7, 0.0  ;;  %v1801_v26 = vmax.f32 %v1689_v4, 0.0  ;;  %v1813_v22 = vmax.f32 %v1701_v16, 0.0  ;;  %v1817_v28 = vmax.f32 %v1705_v6, 0.0  ;;  %v6949_v6 = vld [vmem:[%s10375_s3 + $0x124] ss:$8 sps:$4 sm:$0xff]  }
 0x34e   :  { %v1908_v62 = vpack.c.bf16 %v1800_v47, %v1796_v13  ;;  %v1916_v38 = vpack.c.bf16 %v1816_v27, %v1812_v12  ;;  %v1589_v54 = vmul.f32 %v8482_v52, %v7857_v59  ;;  %v1593_v42 = vmul.f32 %v8482_v52, %v7875_v31 }
 0x34f   :  { %v1909_v29 = vpack.c.bf16 %v1801_v26, %v1797_v18  ;;  %v1917_v48 = vpack.c.bf16 %v1817_v28, %v1813_v22  ;;  %v1588_v2 = vmul.f32 %v8470_v49, %v7849_v51  ;;  %v1592_v9 = vmul.f32 %v8470_v49, %v7868_v15 }
 0x350   :  { %v1717_v59 = vadd.f32 %v8485_v14, %v1589_v54  ;;  %v1721_v31 = vadd.f32 %v8485_v14, %v1593_v42  ;;  %v1605_v25 = vmul.f32 %v8482_v52, %v7945_v0  ;;  %v1609_v53 = vmul.f32 %v8482_v52, %v7963_v44  ;;  %v6944_v44 = vld [vmem:[%s10375_s3 + $0x110] ss:$8 sps:$4 sm:$0xff]  }
 0x351   :  { %2521 = vmatprep.mubr.bf16.mxu0 %v1909_v29  ;;  %v1716_v51 = vadd.f32 %v8473_v32, %v1588_v2  ;;  %v1720_v1 = vadd.f32 %v8473_v32, %v1592_v9  ;;  %v1604_v15 = vmul.f32 %v8470_v49, %v7937_v40  ;;  %v1608_v10 = vmul.f32 %v8470_v49, %v7956_v57 }
 0x352   :  { %2522 = vmatmul.mubr.bf16.vlgmr.msra.gmra.mrb[60].mxu0 %v1908_v62  ;;  %v1829_v61 = vmax.f32 %v1717_v59, 0.0  ;;  %v1833_v3 = vmax.f32 %v1721_v31, 0.0  ;;  %v1733_v21 = vadd.f32 %v8485_v14, %v1605_v25  ;;  %v1737_v0 = vadd.f32 %v8485_v14, %v1609_v53 }
 0x353   :  { %2531 = vmatprep.mubr.bf16.mxu0 %v1917_v48  ;;  %2593 = vmatpush1.bf16.msra.mxu0 %v6941_v55  ;;  %v1828_v7 = vmax.f32 %v1716_v51, 0.0  ;;  %v1832_v4 = vmax.f32 %v1720_v1, 0.0  ;;  %v1732_v40 = vadd.f32 %v8473_v32, %v1604_v15  ;;  %v1736_v16 = vadd.f32 %v8473_v32, %v1608_v10 }
 0x354   :  { %2594 = vmatprep.subr.bf16.mxu0 %v6946_v60  ;;  %v1925_v57 = vpack.c.bf16 %v1833_v3, %v1829_v61  ;;  %v1845_v13 = vmax.f32 %v1733_v21, 0.0  ;;  %v1849_v47 = vmax.f32 %v1737_v0, 0.0  ;;  %v1621_v12 = vmul.f32 %v8482_v52, %v8033_v33  ;;  %v6947_v33 = vld [vmem:[%s10375_s3 + $0x120] ss:$8 sps:$4 sm:$0xff]  }
 0x355   :  { %v8555_v27 = vpack.c.bf16 %v1832_v4, %v1828_v7  ;;  %v1844_v18 = vmax.f32 %v1732_v40, 0.0  ;;  %v1848_v26 = vmax.f32 %v1736_v16, 0.0  ;;  %v1625_v22 = vmul.f32 %v8482_v52, %v8051_v24 }
 0x356   :  { %v8559_v28 = vpack.c.bf16 %v1849_v47, %v1845_v13  ;;  %v1749_v62 = vadd.f32 %v8485_v14, %v1621_v12  ;;  %v1620_v54 = vmul.f32 %v8470_v49, %v8025_v23  ;;  %v1624_v42 = vmul.f32 %v8470_v49, %v8044_v45  ;;  %v6952_v23 = vld [vmem:[%s10375_s3 + $0x134] ss:$8 sps:$4 sm:$0xff]   ;;  %v6953_v13 = vld [vmem:[%s10375_s3 + $0x140] ss:$8 sps:$4 sm:$0xff]  }
 0x357   :  { %2595 = vmatpush1.bf16.msra.mxu0 %v6944_v44  ;;  %v8569_v29 = vpack.c.bf16 %v1848_v26, %v1844_v18  ;;  %v1753_v55 = vadd.f32 %v8485_v14, %v1625_v22  ;;  %v1637_v24 = vmul.f32 %v8482_v52, %v8121_v43  ;;  %v1641_v48 = vmul.f32 %v8482_v52, %v8139_v30  ;;  %v10570_v12 = vld [vmem:[#allocation8_spill] sm:$0xff] }
 0x358   :  { %2596 = vmatprep.subr.bf16.mxu0 %v6949_v6  ;;  %v1861_v45 = vmax.f32 %v1749_v62, 0.0  ;;  %v1748_v2 = vadd.f32 %v8473_v32, %v1620_v54  ;;  %v1752_v9 = vadd.f32 %v8473_v32, %v1624_v42  ;;  %v1636_v60 = vmul.f32 %v8470_v49, %v8113_v8  ;;  %v6950_v8 = vld [vmem:[%s10375_s3 + $0x130] ss:$8 sps:$4 sm:$0xff]  }
 0x359   :  { %v1865_v59 = vmax.f32 %v1753_v55, 0.0  ;;  %v1765_v31 = vadd.f32 %v8485_v14, %v1637_v24  ;;  %v1769_v43 = vadd.f32 %v8485_v14, %v1641_v48  ;;  %v1640_v30 = vmul.f32 %v8470_v49, %v8132_v19  ;;  %v10571_v62 = vld [vmem:[#allocation9_spill] sm:$0xff]  ;;  %v10572_v24 = vld [vmem:[#allocation19_spill] sm:$0xff] }
 0x35a   :  { %2532 = vmatmul.mubr.bf16.gmra.mrb[64].mxu0 %v1916_v38  ;;  %v1860_v25 = vmax.f32 %v1748_v2, 0.0  ;;  %v1864_v53 = vmax.f32 %v1752_v9, 0.0  ;;  %v1764_v51 = vadd.f32 %v8473_v32, %v1636_v60  ;;  %v1653_v1 = vmul.f32 %v8482_v52, %v8209_v34  ;;  %v6955_v38 = vld [vmem:[%s10375_s3 + $0x144] ss:$8 sps:$4 sm:$0xff]   ;;  %v6956_v60 = vld [vmem:[%s10375_s3 + $0x150] ss:$8 sps:$4 sm:$0xff]  }
 0x35b   :  { %2541 = vmatprep.mubr.bf16.mxu0 %v1925_v57  ;;  %2597 = vmatpush1.bf16.msra.mxu0 %v6947_v33  ;;  %v8593_v15 = vpack.c.bf16 %v1865_v59, %v1861_v45  ;;  %v1877_v10 = vmax.f32 %v1765_v31, 0.0  ;;  %v1881_v61 = vmax.f32 %v1769_v43, 0.0  ;;  %v1768_v19 = vadd.f32 %v8473_v32, %v1640_v30  ;;  %v10573_v43 = vld [vmem:[#allocation21_spill] sm:$0xff] }
 0x35c   :  { %2598 = vmatprep.subr.bf16.mxu0 %v6952_v23  ;;  %v8599_v3 = vpack.c.bf16 %v1864_v53, %v1860_v25  ;;  %v1876_v34 = vmax.f32 %v1764_v51, 0.0  ;;  %v1657_v21 = vmul.f32 %v8482_v52, %v8227_v56  ;;  %v1781_v0 = vadd.f32 %v8485_v14, %v1653_v1  ;;  %v6961_v25 = vld [vmem:[%s10375_s3 + $0x164] ss:$8 sps:$4 sm:$0xff]  }
 0x35d   :  { %v8604_v44 = vpack.c.bf16 %v1881_v61, %v1877_v10  ;;  %v1880_v7 = vmax.f32 %v1768_v19, 0.0  ;;  %v1652_v4 = vmul.f32 %v8470_v49, %v8201_v37  ;;  %v1656_v40 = vmul.f32 %v8470_v49, %v8220_v39  ;;  %v10574_v51 = vld [vmem:[#allocation18_spill] sm:$0xff] }
 0x35e   :  { %v1785_v16 = vadd.f32 %v8485_v14, %v1657_v21  ;;  %v1893_v57 = vmax.f32 %v1781_v0, 0.0  ;;  %v1559_v6 = vmul.f32 %v8488_v11, %v7681_v5  ;;  %v1563_v56 = vmul.f32 %v8488_v11, %v7705_v17  ;;  %v6958_v5 = vld [vmem:[%s10375_s3 + $0x154] ss:$8 sps:$4 sm:$0xff]  }
 0x35f   :  { %2599 = vmatpush1.bf16.msra.mxu0 %v6950_v8  ;;  %v8618_v47 = vpack.c.bf16 %v1880_v7, %v1876_v34  ;;  %v1780_v37 = vadd.f32 %v8473_v32, %v1652_v4  ;;  %v1784_v39 = vadd.f32 %v8473_v32, %v1656_v40  ;;  %v1558_v18 = vmul.f32 %v8476_v50, %v10570_v12  ;;  %v10575_v8 = vld [vmem:[#allocation20_spill] sm:$0xff]  ;;  %v10577_v21 = vld [vmem:[#allocation33_spill] sm:$0xff] }
 0x360   :  { %2600 = vmatprep.subr.bf16.mxu0 %v6955_v38  ;;  %v1897_v17 = vmax.f32 %v1785_v16, 0.0  ;;  %v1687_v26 = vadd.f32 %v8491_v41, %v1559_v6  ;;  %v1691_v22 = vadd.f32 %v8491_v41, %v1563_v56  ;;  %v1562_v54 = vmul.f32 %v8476_v50, %v10571_v62  ;;  %v10576_v38 = vld [vmem:[#allocation31_spill] sm:$0xff]  ;;  %v10578_v16 = vld [vmem:[#allocation30_spill] sm:$0xff] }
 0x361   :  { %v1892_v42 = vmax.f32 %v1780_v37, 0.0  ;;  %v1896_v33 = vmax.f32 %v1784_v39, 0.0  ;;  %v1686_v55 = vadd.f32 %v8479_v20, %v1558_v18  ;;  %v1575_v48 = vmul.f32 %v8488_v11, %v10572_v24  ;;  %v6959_v6 = vld [vmem:[%s10375_s3 + $0x160] ss:$8 sps:$4 sm:$0xff]   ;;  %v10579_v39 = vld [vmem:[#allocation32_spill] sm:$0xff] }
 0x362   :  { %2542 = vmatmul.mubr.bf16.gmra.mrb[68].mxu0 %v8555_v27  ;;  %v8635_v23 = vpack.c.bf16 %v1897_v17, %v1893_v57  ;;  %v1799_v45 = vmax.f32 %v1687_v26, 0.0  ;;  %v1803_v2 = vmax.f32 %v1691_v22, 0.0  ;;  %v1690_v9 = vadd.f32 %v8479_v20, %v1562_v54  ;;  %v6964_v18 = vld [vmem:[%s10375_s3 + $0x174] ss:$8 sps:$4 sm:$0xff]   ;;  %v10580_v22 = vld [vmem:[#allocation43_spill] sm:$0xff] }
 0x363   :  { %2551 = vmatprep.mubr.bf16.mxu0 %v8559_v28  ;;  %2601 = vmatpush1.bf16.msra.mxu0 %v6953_v13  ;;  %v8642_v59 = vpack.c.bf16 %v1896_v33, %v1892_v42  ;;  %v1798_v31 = vmax.f32 %v1686_v55, 0.0  ;;  %v1579_v30 = vmul.f32 %v8488_v11, %v10573_v43  ;;  %v1703_v27 = vadd.f32 %v8491_v41, %v1575_v48 }
 0x364   :  { %2602 = vmatprep.subr.bf16.mxu0 %v6958_v5  ;;  %v1911_v53 = vpack.c.bf16 %v1803_v2, %v1799_v45  ;;  %v1802_v28 = vmax.f32 %v1690_v9, 0.0  ;;  %v1574_v1 = vmul.f32 %v8476_v50, %v10574_v51  ;;  %v1578_v10 = vmul.f32 %v8476_v50, %v10575_v8  ;;  %v10581_v45 = vld [vmem:[#allocation45_spill] sm:$0xff]  ;;  %v10584_v51 = vld [vmem:[#allocation55_spill] sm:$0xff] }
 0x365   :  { %v1707_v61 = vadd.f32 %v8491_v41, %v1579_v30  ;;  %v1815_v19 = vmax.f32 %v1703_v27, 0.0  ;;  %v1591_v34 = vmul.f32 %v8488_v11, %v10576_v38  ;;  %v1595_v0 = vmul.f32 %v8488_v11, %v10577_v21  ;;  %v10583_v27 = vld [vmem:[#allocation44_spill] sm:$0xff]  ;;  %v10585_v8 = vld [vmem:[#allocation57_spill] sm:$0xff] }
 0x366   :  { %1967 = vst.msk [vmem:[#allocation3 + $0x18] sm:$0xff] %vm66_vm2, %v1911_v53  ;;  %v8660_v7 = vpack.c.bf16 %v1802_v28, %v1798_v31  ;;  %v1702_v4 = vadd.f32 %v8479_v20, %v1574_v1  ;;  %v1706_v40 = vadd.f32 %v8479_v20, %v1578_v10  ;;  %v1590_v57 = vmul.f32 %v8476_v50, %v10578_v16  ;;  %v10587_v16 = vld [vmem:[#allocation56_spill] sm:$0xff] }
 0x367   :  { %2603 = vmatpush1.bf16.msra.mxu0 %v6956_v60  ;;  %v1819_v56 = vmax.f32 %v1707_v61, 0.0  ;;  %v1719_v13 = vadd.f32 %v8491_v41, %v1591_v34  ;;  %v1723_v37 = vadd.f32 %v8491_v41, %v1595_v0  ;;  %v1594_v12 = vmul.f32 %v8476_v50, %v10579_v39  ;;  %v6962_v60 = vld [vmem:[%s10375_s3 + $0x170] ss:$8 sps:$4 sm:$0xff]   ;;  %v10586_v34 = vld [vmem:[#allocation54_spill] sm:$0xff]  ;;  %v10588_v39 = vld [vmem:[#allocation67_spill] sm:$0xff] }
 0x368   :  { %2604 = vmatprep.subr.bf16.mxu0 %v6961_v25  ;;  %v1814_v5 = vmax.f32 %v1702_v4, 0.0  ;;  %v1818_v17 = vmax.f32 %v1706_v40, 0.0  ;;  %v1718_v26 = vadd.f32 %v8479_v20, %v1590_v57  ;;  %v1607_v62 = vmul.f32 %v8488_v11, %v10580_v22 }
 0x369   :  { %v1919_v54 = vpack.c.bf16 %v1819_v56, %v1815_v19  ;;  %v1831_v42 = vmax.f32 %v1719_v13, 0.0  ;;  %v1835_v33 = vmax.f32 %v1723_v37, 0.0  ;;  %v1722_v55 = vadd.f32 %v8479_v20, %v1594_v12 }
 0x36a   :  { %2552 = vmatmul.mubr.bf16.gmra.mrb[72].mxu0 %v8569_v29  ;;  %v8681_v24 = vpack.c.bf16 %v1818_v17, %v1814_v5  ;;  %v1830_v48 = vmax.f32 %v1718_v26, 0.0  ;;  %v1611_v2 = vmul.f32 %v8488_v11, %v10581_v45  ;;  %v1735_v9 = vadd.f32 %v8491_v41, %v1607_v62  ;;  %v10582_v29 = vld [vmem:[#allocation42_spill] sm:$0xff] }
 0x36b   :  { %2561 = vmatprep.mubr.bf16.mxu0 %v8593_v15  ;;  %2605 = vmatpush1.bf16.msra.mxu0 %v6959_v6  ;;  %1975 = vst.msk [vmem:[#allocation3 + $0x38] sm:$0xff] %vm66_vm2, %v1919_v54  ;;  %v1927_v31 = vpack.c.bf16 %v1835_v33, %v1831_v42  ;;  %v1834_v43 = vmax.f32 %v1722_v55, 0.0  ;;  %v1606_v30 = vmul.f32 %v8476_v50, %v10582_v29  ;;  %v6967_v15 = vld [vmem:[%s10375_s3 + $0x184] ss:$8 sps:$4 sm:$0xff]   ;;  %v6965_v6 = vld [vmem:[%s10375_s3 + $0x180] ss:$8 sps:$4 sm:$0xff]  }
 0x36c   :  { %v1610_v25 = vmul.f32 %v8476_v50, %v10583_v27  ;;  %2606 = vmatprep.subr.bf16.mxu0 %v6964_v18  ;;  %v1739_v53 = vadd.f32 %v8491_v41, %v1611_v2  ;;  %v1847_v28 = vmax.f32 %v1735_v9, 0.0  ;;  %v1623_v1 = vmul.f32 %v8488_v11, %v10584_v51  ;;  %v6970_v18 = vld [vmem:[%s10375_s3 + $0x194] ss:$8 sps:$4 sm:$0xff]   ;;  %v10590_v2 = vld [vmem:[#allocation66_spill] sm:$0xff] }
 0x36d   :  { %v1627_v10 = vmul.f32 %v8488_v11, %v10585_v8  ;;  %1983 = vst.msk [vmem:[#allocation3 + $0x58] sm:$0xff] %vm66_vm2, %v1927_v31  ;;  %v8704_v61 = vpack.c.bf16 %v1834_v43, %v1830_v48  ;;  %v1734_v19 = vadd.f32 %v8479_v20, %v1606_v30  ;;  %v1622_v21 = vmul.f32 %v8476_v50, %v10586_v34  ;;  %v10589_v42 = vld [vmem:[#allocation69_spill] sm:$0xff]  ;;  %v10592_v30 = vld [vmem:[#allocation79_spill] sm:$0xff]  ;;  %v10595_v34 = vld [vmem:[#allocation80_spill] sm:$0xff] }
 0x36e   :  { %v1738_v38 = vadd.f32 %v8479_v20, %v1610_v25  ;;  %v1851_v0 = vmax.f32 %v1739_v53, 0.0  ;;  %v1751_v4 = vadd.f32 %v8491_v41, %v1623_v1  ;;  %v1626_v57 = vmul.f32 %v8476_v50, %v10587_v16  ;;  %v6968_v43 = vld [vmem:[%s10375_s3 + $0x190] ss:$8 sps:$4 sm:$0xff]   ;;  %v6973_v53 = vld [vmem:[%s10375_s3 + $0x1a4] ss:$8 sps:$4 sm:$0xff]  }
 0x36f   :  { %v1755_v40 = vadd.f32 %v8491_v41, %v1627_v10  ;;  %2607 = vmatpush1.bf16.msra.mxu0 %v6962_v60  ;;  %v1846_v56 = vmax.f32 %v1734_v19, 0.0  ;;  %v1750_v37 = vadd.f32 %v8479_v20, %v1622_v21  ;;  %v1639_v12 = vmul.f32 %v8488_v11, %v10588_v39  ;;  %v10591_v60 = vld [vmem:[#allocation68_spill] sm:$0xff]  ;;  %v10593_v25 = vld [vmem:[#allocation81_spill] sm:$0xff]  ;;  %v10594_v1 = vld [vmem:[#allocation78_spill] sm:$0xff] }
 0x370   :  { %v1850_v13 = vmax.f32 %v1738_v38, 0.0  ;;  %2608 = vmatprep.subr.bf16.mxu0 %v6967_v15  ;;  %v1935_v5 = vpack.c.bf16 %v1851_v0, %v1847_v28  ;;  %v1863_v17 = vmax.f32 %v1751_v4, 0.0  ;;  %v1754_v22 = vadd.f32 %v8479_v20, %v1626_v57  ;;  %v10596_v16 = vld [vmem:[#allocation12_spill] sm:$0xff] }
 0x371   :  { %v1867_v26 = vmax.f32 %v1755_v40, 0.0  ;;  %v1862_v54 = vmax.f32 %v1750_v37, 0.0  ;;  %v1643_v33 = vmul.f32 %v8488_v11, %v10589_v42  ;;  %v1767_v55 = vadd.f32 %v8491_v41, %v1639_v12  ;;  %v6976_v12 = vld [vmem:[%s10375_s3 + $0x1b4] ss:$8 sps:$4 sm:$0xff]  }
 0x372   :  { %v8724_v62 = vpack.c.bf16 %v1850_v13, %v1846_v56  ;;  %2562 = vmatmul.mubr.bf16.gmra.mrb[76].mxu0 %v8599_v3  ;;  %1991 = vst.msk [vmem:[#allocation3 + $0x78] sm:$0xff] %vm66_vm2, %v1935_v5  ;;  %v1866_v45 = vmax.f32 %v1754_v22, 0.0  ;;  %v1638_v9 = vmul.f32 %v8476_v50, %v10590_v2  ;;  %v1642_v31 = vmul.f32 %v8476_v50, %v10591_v60  ;;  %v10600_v60 = vld [vmem:[#allocation24_spill] sm:$0xff] }
 0x373   :  { %v1943_v48 = vpack.c.bf16 %v1867_v26, %v1863_v17  ;;  %2571 = vmatprep.mubr.bf16.mxu0 %v8604_v44  ;;  %2609 = vmatpush1.bf16.msra.mxu0 %v6965_v6  ;;  %v1771_v29 = vadd.f32 %v8491_v41, %v1643_v33  ;;  %v1879_v3 = vmax.f32 %v1767_v55, 0.0  ;;  %v1655_v27 = vmul.f32 %v8488_v11, %v10592_v30  ;;  %v6971_v6 = vld [vmem:[%s10375_s3 + $0x1a0] ss:$8 sps:$4 sm:$0xff]   ;;  %v10597_v17 = vld [vmem:[#allocation16_spill] sm:$0xff] }
 0x374   :  { %v1659_v15 = vmul.f32 %v8488_v11, %v10593_v25  ;;  %2610 = vmatprep.subr.bf16.mxu0 %v6970_v18  ;;  %v8748_v44 = vpack.c.bf16 %v1866_v45, %v1862_v54  ;;  %v1766_v28 = vadd.f32 %v8479_v20, %v1638_v9  ;;  %v1770_v51 = vadd.f32 %v8479_v20, %v1642_v31  ;;  %v10598_v33 = vld [vmem:[#allocation10_spill] sm:$0xff] }
 0x375   :  { %1999 = vst.msk [vmem:[#allocation3 + $0x98] sm:$0xff] %vm66_vm2, %v1943_v48  ;;  %v1654_v8 = vmul.f32 %v8476_v50, %v10594_v1  ;;  %v1883_v10 = vmax.f32 %v1771_v29, 0.0  ;;  %v1783_v19 = vadd.f32 %v8491_v41, %v1655_v27  ;;  %v1658_v21 = vmul.f32 %v8476_v50, %v10595_v34  ;;  %v10599_v48 = vld [vmem:[#allocation14_spill] sm:$0xff] }
 0x376   :  { %v1787_v38 = vadd.f32 %v8491_v41, %v1659_v15  ;;  %v1878_v0 = vmax.f32 %v1766_v28, 0.0  ;;  %v1882_v4 = vmax.f32 %v1770_v51, 0.0  ;;  %v1565_v57 = vmul.f32 %v8482_v52, %v10596_v16  ;;  %v6979_v25 = vld [vmem:[%s10377_s2 + $0x4] ss:$8 sps:$4 sm:$0xff]  }
 0x377   :  { %v1782_v40 = vadd.f32 %v8479_v20, %v1654_v8  ;;  %2611 = vmatpush1.bf16.msra.mxu0 %v6968_v43  ;;  %v1951_v56 = vpack.c.bf16 %v1883_v10, %v1879_v3  ;;  %v1895_v13 = vmax.f32 %v1783_v19, 0.0  ;;  %v1786_v39 = vadd.f32 %v8479_v20, %v1658_v21  ;;  %v10601_v43 = vld [vmem:[#allocation28_spill] sm:$0xff]  ;;  %v10602_v28 = vld [vmem:[#allocation22_spill] sm:$0xff] }
 0x378   :  { %v1899_v37 = vmax.f32 %v1787_v38, 0.0  ;;  %2612 = vmatprep.subr.bf16.mxu0 %v6973_v53  ;;  %v8768_v18 = vpack.c.bf16 %v1882_v4, %v1878_v0  ;;  %v1569_v26 = vmul.f32 %v8482_v52, %v10597_v17  ;;  %v1693_v22 = vadd.f32 %v8485_v14, %v1565_v57  ;;  %v6974_v3 = vld [vmem:[%s10375_s3 + $0x1b0] ss:$8 sps:$4 sm:$0xff]   ;;  %v10603_v10 = vld [vmem:[#allocation26_spill] sm:$0xff] }
 0x379   :  { %v1894_v5 = vmax.f32 %v1782_v40, 0.0  ;;  %2007 = vst.msk [vmem:[#allocation3 + $0xb8] sm:$0xff] %vm66_vm2, %v1951_v56  ;;  %v1898_v42 = vmax.f32 %v1786_v39, 0.0  ;;  %v1564_v55 = vmul.f32 %v8470_v49, %v10598_v33  ;;  %v1568_v45 = vmul.f32 %v8470_v49, %v10599_v48  ;;  %v10604_v38 = vld [vmem:[#allocation36_spill] sm:$0xff]  ;;  %v10607_v17 = vld [vmem:[#allocation38_spill] sm:$0xff]  ;;  %v2107_v48 = vld [vmem:[#allocation3 + $0x18] sm:$0xff] }
 0x37a   :  { %v1959_v54 = vpack.c.bf16 %v1899_v37, %v1895_v13  ;;  %2572 = vmatmul.mubr.bf16.gmra.mrb[80].mxu0 %v8618_v47  ;;  %v1697_v2 = vadd.f32 %v8485_v14, %v1569_v26  ;;  %v1805_v9 = vmax.f32 %v1693_v22, 0.0  ;;  %v1581_v31 = vmul.f32 %v8482_v52, %v10600_v60  ;;  %v10608_v33 = vld [vmem:[#allocation48_spill] sm:$0xff] }
 0x37b   :  { %v1585_v29 = vmul.f32 %v8482_v52, %v10601_v43  ;;  %2581 = vmatprep.mubr.bf16.mxu0 %v8635_v23  ;;  %2613 = vmatpush1.bf16.msra.mxu0 %v6971_v6  ;;  %v8789_v30 = vpack.c.bf16 %v1898_v42, %v1894_v5  ;;  %v1692_v47 = vadd.f32 %v8473_v32, %v1564_v55  ;;  %v10605_v6 = vld [vmem:[#allocation40_spill] sm:$0xff] }
 0x37c   :  { %2015 = vst.msk [vmem:[#allocation3 + $0xd8] sm:$0xff] %vm66_vm2, %v1959_v54  ;;  %v1696_v27 = vadd.f32 %v8473_v32, %v1568_v45  ;;  %2614 = vmatprep.subr.bf16.mxu0 %v6976_v12  ;;  %v1809_v15 = vmax.f32 %v1697_v2, 0.0  ;;  %v1709_v23 = vadd.f32 %v8485_v14, %v1581_v31  ;;  %v1580_v51 = vmul.f32 %v8470_v49, %v10602_v28  ;;  %v10606_v12 = vld [vmem:[#allocation34_spill] sm:$0xff] }
 0x37d   :  { %v1713_v53 = vadd.f32 %v8485_v14, %v1585_v29  ;;  %v1804_v1 = vmax.f32 %v1692_v47, 0.0  ;;  %v1584_v19 = vmul.f32 %v8470_v49, %v10603_v10  ;;  %v1597_v34 = vmul.f32 %v8482_v52, %v10604_v38  ;;  %v10610_v31 = vld [vmem:[#allocation46_spill] sm:$0xff] }
 0x37e   :  { %v1808_v8 = vmax.f32 %v1696_v27, 0.0  ;;  %v8804_v21 = vpack.c.bf16 %v1809_v15, %v1805_v9  ;;  %v1821_v0 = vmax.f32 %v1709_v23, 0.0  ;;  %v1708_v40 = vadd.f32 %v8473_v32, %v1580_v51  ;;  %v10609_v9 = vld [vmem:[#allocation52_spill] sm:$0xff]  ;;  %v10611_v27 = vld [vmem:[#allocation50_spill] sm:$0xff] }
 0x37f   :  { %v1825_v4 = vmax.f32 %v1713_v53, 0.0  ;;  %2615 = vmatpush1.bf16.msra.mxu0 %v6974_v3  ;;  %v1712_v57 = vadd.f32 %v8473_v32, %v1584_v19  ;;  %v1601_v56 = vmul.f32 %v8482_v52, %v10605_v6  ;;  %v1725_v13 = vadd.f32 %v8485_v14, %v1597_v34 }
 0x380   :  { %v8807_v16 = vpack.c.bf16 %v1808_v8, %v1804_v1  ;;  %2996 = vmatprep.subr.bf16.mxu0 %v6979_v25  ;;  %v1820_v39 = vmax.f32 %v1708_v40, 0.0  ;;  %v1596_v5 = vmul.f32 %v8470_v49, %v10606_v12  ;;  %v1600_v26 = vmul.f32 %v8470_v49, %v10607_v17  ;;  %v10612_v8 = vld [vmem:[#allocation60_spill] sm:$0xff]  ;;  %v6977_v40 = vld [vmem:[%s10377_s2] ss:$8 sps:$4 sm:$0xff]   ;;  %v2111_v17 = vld [vmem:[#allocation3 + $0x38] sm:$0xff] }
 0x381   :  { %v8813_v37 = vpack.c.bf16 %v1825_v4, %v1821_v0  ;;  %v1824_v22 = vmax.f32 %v1712_v57, 0.0  ;;  %v1729_v54 = vadd.f32 %v8485_v14, %v1601_v56  ;;  %v1837_v42 = vmax.f32 %v1725_v13, 0.0  ;;  %v10613_v0 = vld [vmem:[#allocation64_spill] sm:$0xff]  ;;  %v10614_v13 = vld [vmem:[#allocation58_spill] sm:$0xff] }
 0x382   :  { %v1613_v55 = vmul.f32 %v8482_v52, %v10608_v33  ;;  %2582 = vmatmul.mubr.bf16.gmra.mrb[84].mxu0 %v8642_v59  ;;  %v1724_v45 = vadd.f32 %v8473_v32, %v1596_v5  ;;  %v1728_v2 = vadd.f32 %v8473_v32, %v1600_v26  ;;  %v1617_v60 = vmul.f32 %v8482_v52, %v10609_v9  ;;  %v6982_v57 = vld [vmem:[%s10377_s2 + $0x14] ss:$8 sps:$4 sm:$0xff]   ;;  %v10615_v12 = vld [vmem:[#allocation62_spill] sm:$0xff] }
 0x383   :  { %v1612_v43 = vmul.f32 %v8470_v49, %v10610_v31  ;;  %5978 = vmatprep.mubr.msk.bf16.mxu0 %vm66_vm2, %v2107_v48  ;;  %v8830_v29 = vpack.c.bf16 %v1824_v22, %v1820_v39  ;;  %v1841_v3 = vmax.f32 %v1729_v54, 0.0  ;;  %v1616_v59 = vmul.f32 %v8470_v49, %v10611_v27  ;;  %v10616_v54 = vld [vmem:[#allocation72_spill] sm:$0xff] }
 0x384   :  { %v1741_v47 = vadd.f32 %v8485_v14, %v1613_v55  ;;  %v1836_v25 = vmax.f32 %v1724_v45, 0.0  ;;  %v1840_v15 = vmax.f32 %v1728_v2, 0.0  ;;  %v1745_v23 = vadd.f32 %v8485_v14, %v1617_v60  ;;  %v10617_v33 = vld [vmem:[#allocation76_spill] sm:$0xff] }
 0x385   :  { %v1740_v53 = vadd.f32 %v8473_v32, %v1612_v43  ;;  %v8837_v28 = vpack.c.bf16 %v1841_v3, %v1837_v42  ;;  %v1744_v1 = vadd.f32 %v8473_v32, %v1616_v59  ;;  %v1629_v10 = vmul.f32 %v8482_v52, %v10612_v8  ;;  %v10618_v3 = vld [vmem:[#allocation70_spill] sm:$0xff]  ;;  %v6980_v27 = vld [vmem:[%s10377_s2 + $0x10] ss:$8 sps:$4 sm:$0xff]  }
 0x386   :  { %v1853_v51 = vmax.f32 %v1741_v47, 0.0  ;;  %v8842_v19 = vpack.c.bf16 %v1840_v15, %v1836_v25  ;;  %v1857_v38 = vmax.f32 %v1745_v23, 0.0  ;;  %v1633_v4 = vmul.f32 %v8482_v52, %v10613_v0  ;;  %v6985_v59 = vld [vmem:[%s10377_s2 + $0x24] ss:$8 sps:$4 sm:$0xff]  }
 0x387   :  { %v1852_v34 = vmax.f32 %v1740_v53, 0.0  ;;  %v1856_v6 = vmax.f32 %v1744_v1, 0.0  ;;  %v1757_v56 = vadd.f32 %v8485_v14, %v1629_v10  ;;  %v1628_v39 = vmul.f32 %v8470_v49, %v10614_v13  ;;  %v10619_v15 = vld [vmem:[#allocation74_spill] sm:$0xff]  ;;  %v10620_v53 = vld [vmem:[#allocation13_spill] sm:$0xff] }
 0x388   :  { %v1632_v5 = vmul.f32 %v8470_v49, %v10615_v12  ;;  %v8857_v26 = vpack.c.bf16 %v1857_v38, %v1853_v51  ;;  %v1761_v22 = vadd.f32 %v8485_v14, %v1633_v4  ;;  %v1645_v42 = vmul.f32 %v8482_v52, %v10616_v54  ;;  %v10621_v4 = vld [vmem:[#allocation17_spill] sm:$0xff]  ;;  %v10623_v12 = vld [vmem:[#allocation15_spill] sm:$0xff] }
 0x389   :  { %v1649_v55 = vmul.f32 %v8482_v52, %v10617_v33  ;;  %v8864_v48 = vpack.c.bf16 %v1856_v6, %v1852_v34  ;;  %v1869_v45 = vmax.f32 %v1757_v56, 0.0  ;;  %v1756_v2 = vadd.f32 %v8473_v32, %v1628_v39  ;;  %v10622_v39 = vld [vmem:[#allocation11_spill] sm:$0xff] }
 0x38a   :  { %v1760_v9 = vadd.f32 %v8473_v32, %v1632_v5  ;;  %2625 = vmatmul.mubr.bf16.vlgmr.msra.gmra.mrb[60].mxu0 %v8660_v7  ;;  %v1873_v60 = vmax.f32 %v1761_v22, 0.0  ;;  %v1773_v31 = vadd.f32 %v8485_v14, %v1645_v42  ;;  %v1644_v47 = vmul.f32 %v8470_v49, %v10618_v3  ;;  %v6988_v22 = vld [vmem:[%s10377_s2 + $0x34] ss:$8 sps:$4 sm:$0xff]   ;;  %v10626_v3 = vld [vmem:[#allocation23_spill] sm:$0xff] }
 0x38b   :  { %v1777_v43 = vadd.f32 %v8485_v14, %v1649_v55  ;;  %2997 = vmatpush1.bf16.msra.mxu0 %v6977_v40  ;;  %5979 = vmatprep.mubr.msk.bf16.mxu0 %vm66_vm2, %v2111_v17  ;;  %v1868_v7 = vmax.f32 %v1756_v2, 0.0  ;;  %v1648_v23 = vmul.f32 %v8470_v49, %v10619_v15  ;;  %v1567_v51 = vmul.f32 %v8488_v11, %v10620_v53  ;;  %v6983_v17 = vld [vmem:[%s10377_s2 + $0x20] ss:$8 sps:$4 sm:$0xff]   ;;  %v10624_v55 = vld [vmem:[#allocation25_spill] sm:$0xff] }
 0x38c   :  { %v1872_v25 = vmax.f32 %v1760_v9, 0.0  ;;  %2998 = vmatprep.subr.bf16.mxu0 %v6982_v57  ;;  %v8884_v1 = vpack.c.bf16 %v1873_v60, %v1869_v45  ;;  %v1885_v8 = vmax.f32 %v1773_v31, 0.0  ;;  %v1772_v38 = vadd.f32 %v8473_v32, %v1644_v47  ;;  %v2115_v2 = vld [vmem:[#allocation3 + $0x58] sm:$0xff]  ;;  %v10627_v15 = vld [vmem:[#allocation27_spill] sm:$0xff] }
 0x38d   :  { %v1889_v10 = vmax.f32 %v1777_v43, 0.0  ;;  %v1776_v0 = vadd.f32 %v8473_v32, %v1648_v23  ;;  %v1571_v40 = vmul.f32 %v8488_v11, %v10621_v4  ;;  %v1695_v6 = vadd.f32 %v8491_v41, %v1567_v51  ;;  %v10625_v31 = vld [vmem:[#allocation29_spill] sm:$0xff] }
 0x38e   :  { %v8887_v34 = vpack.c.bf16 %v1872_v25, %v1868_v7  ;;  %v1884_v13 = vmax.f32 %v1772_v38, 0.0  ;;  %v1566_v57 = vmul.f32 %v8476_v50, %v10622_v39  ;;  %v1570_v5 = vmul.f32 %v8476_v50, %v10623_v12  ;;  %v10629_v12 = vld [vmem:[#allocation41_spill] sm:$0xff] }
 0x38f   :  { %v8893_v56 = vpack.c.bf16 %v1889_v10, %v1885_v8  ;;  %2999 = vmatpush1.bf16.msra.mxu0 %v6980_v27  ;;  %v1888_v54 = vmax.f32 %v1776_v0, 0.0  ;;  %v1699_v42 = vadd.f32 %v8491_v41, %v1571_v40  ;;  %v1807_v33 = vmax.f32 %v1695_v6, 0.0  ;;  %v6986_v10 = vld [vmem:[%s10377_s2 + $0x30] ss:$8 sps:$4 sm:$0xff]   ;;  %v6991_v6 = vld [vmem:[%s10377_s2 + $0x44] ss:$8 sps:$4 sm:$0xff]  }
 0x390   :  { %v1583_v45 = vmul.f32 %v8488_v11, %v10624_v55  ;;  %3000 = vmatprep.subr.bf16.mxu0 %v6985_v59  ;;  %v1694_v9 = vadd.f32 %v8479_v20, %v1566_v57  ;;  %v1698_v60 = vadd.f32 %v8479_v20, %v1570_v5  ;;  %v1587_v43 = vmul.f32 %v8488_v11, %v10625_v31  ;;  %v10628_v40 = vld [vmem:[#allocation37_spill] sm:$0xff] }
 0x391   :  { %v1582_v47 = vmul.f32 %v8476_v50, %v10626_v3  ;;  %v8914_v27 = vpack.c.bf16 %v1888_v54, %v1884_v13  ;;  %v1811_v7 = vmax.f32 %v1699_v42, 0.0  ;;  %v1586_v23 = vmul.f32 %v8476_v50, %v10627_v15  ;;  %v10630_v42 = vld [vmem:[#allocation35_spill] sm:$0xff]  ;;  %v10633_v31 = vld [vmem:[#allocation53_spill] sm:$0xff] }
 0x392   :  { %v1711_v25 = vadd.f32 %v8491_v41, %v1583_v45  ;;  %2635 = vmatmul.mubr.bf16.gmra.mrb[64].mxu0 %v8681_v24  ;;  %v1806_v59 = vmax.f32 %v1694_v9, 0.0  ;;  %v1810_v53 = vmax.f32 %v1698_v60, 0.0  ;;  %v1715_v51 = vadd.f32 %v8491_v41, %v1587_v43  ;;  %v10632_v9 = vld [vmem:[#allocation49_spill] sm:$0xff]  ;;  %v6989_v3 = vld [vmem:[%s10377_s2 + $0x40] ss:$8 sps:$4 sm:$0xff]  }
 0x393   :  { %v1710_v8 = vadd.f32 %v8479_v20, %v1582_v47  ;;  %3001 = vmatpush1.bf16.msra.mxu0 %v6983_v17  ;;  %5980 = vmatprep.mubr.msk.bf16.mxu0 %vm66_vm2, %v2115_v2  ;;  %v1915_v38 = vpack.c.bf16 %v1811_v7, %v1807_v33  ;;  %v1714_v4 = vadd.f32 %v8479_v20, %v1586_v23  ;;  %v6994_v23 = vld [vmem:[%s10377_s2 + $0x54] ss:$8 sps:$4 sm:$0xff]  }
 0x394   :  { %v1823_v0 = vmax.f32 %v1711_v25, 0.0  ;;  %v1599_v24 = vmul.f32 %v8488_v11, %v10628_v40  ;;  %3002 = vmatprep.subr.bf16.mxu0 %v6988_v22  ;;  %v8932_v13 = vpack.c.bf16 %v1810_v53, %v1806_v59  ;;  %v1827_v39 = vmax.f32 %v1715_v51, 0.0  ;;  %v10631_v22 = vld [vmem:[#allocation39_spill] sm:$0xff] }
 0x395   :  { %v1822_v57 = vmax.f32 %v1710_v8, 0.0  ;;  %v1603_v5 = vmul.f32 %v8488_v11, %v10629_v12  ;;  %1971 = vst.msk [vmem:[#allocation2 + $0x38] sm:$0xff] %vm66_vm2, %v1915_v38  ;;  %v1826_v17 = vmax.f32 %v1714_v4, 0.0  ;;  %v1598_v33 = vmul.f32 %v8476_v50, %v10630_v42  ;;  %v10634_v8 = vld [vmem:[#allocation47_spill] sm:$0xff] }
 0x396   :  { %v1727_v54 = vadd.f32 %v8491_v41, %v1599_v24  ;;  %v1602_v55 = vmul.f32 %v8476_v50, %v10631_v22  ;;  %v1923_v45 = vpack.c.bf16 %v1827_v39, %v1823_v0  ;;  %v1615_v60 = vmul.f32 %v8488_v11, %v10632_v9  ;;  %v10635_v4 = vld [vmem:[#allocation51_spill] sm:$0xff]  ;;  %v10636_v24 = vld [vmem:[#allocation61_spill] sm:$0xff] }
 0x397   :  { %v1731_v2 = vadd.f32 %v8491_v41, %v1603_v5  ;;  %v1619_v43 = vmul.f32 %v8488_v11, %v10633_v31  ;;  %3003 = vmatpush1.bf16.msra.mxu0 %v6986_v10  ;;  %v8950_v47 = vpack.c.bf16 %v1826_v17, %v1822_v57  ;;  %v1726_v25 = vadd.f32 %v8479_v20, %v1598_v33  ;;  %v2119_v39 = vld [vmem:[#allocation3 + $0x78] sm:$0xff] }
 0x398   :  { %v1839_v7 = vmax.f32 %v1727_v54, 0.0  ;;  %v1730_v15 = vadd.f32 %v8479_v20, %v1602_v55  ;;  %3004 = vmatprep.subr.bf16.mxu0 %v6991_v6  ;;  %1979 = vst.msk [vmem:[#allocation2 + $0x58] sm:$0xff] %vm66_vm2, %v1923_v45  ;;  %v1743_v53 = vadd.f32 %v8491_v41, %v1615_v60  ;;  %v1614_v10 = vmul.f32 %v8476_v50, %v10634_v8  ;;  %v6992_v54 = vld [vmem:[%s10377_s2 + $0x50] ss:$8 sps:$4 sm:$0xff]   ;;  %v6997_v55 = vld [vmem:[%s10377_s2 + $0x64] ss:$8 sps:$4 sm:$0xff]  }
 0x399   :  { %v1843_v59 = vmax.f32 %v1731_v2, 0.0  ;;  %v1747_v51 = vadd.f32 %v8491_v41, %v1619_v43  ;;  %v1838_v38 = vmax.f32 %v1726_v25, 0.0  ;;  %v1618_v40 = vmul.f32 %v8476_v50, %v10635_v4  ;;  %v10637_v22 = vld [vmem:[#allocation65_spill] sm:$0xff]  ;;  %v10638_v60 = vld [vmem:[#allocation59_spill] sm:$0xff] }
 0x39a   :  { %v1842_v0 = vmax.f32 %v1730_v15, 0.0  ;;  %v1631_v6 = vmul.f32 %v8488_v11, %v10636_v24  ;;  %2645 = vmatmul.mubr.bf16.gmra.mrb[68].mxu0 %v8704_v61  ;;  %v1855_v12 = vmax.f32 %v1743_v53, 0.0  ;;  %v1742_v17 = vadd.f32 %v8479_v20, %v1614_v10  ;;  %v10640_v15 = vld [vmem:[#allocation73_spill] sm:$0xff]  ;;  %v10642_v10 = vld [vmem:[#allocation71_spill] sm:$0xff] }
 0x39b   :  { %v1931_v57 = vpack.c.bf16 %v1843_v59, %v1839_v7  ;;  %v1859_v5 = vmax.f32 %v1747_v51, 0.0  ;;  %3005 = vmatpush1.bf16.msra.mxu0 %v6989_v3  ;;  %5981 = vmatprep.mubr.msk.bf16.mxu0 %vm66_vm2, %v2119_v39  ;;  %v1746_v33 = vadd.f32 %v8479_v20, %v1618_v40  ;;  %v1635_v61 = vmul.f32 %v8488_v11, %v10637_v22  ;;  %v10639_v7 = vld [vmem:[#allocation63_spill] sm:$0xff]  ;;  %v10641_v51 = vld [vmem:[#allocation77_spill] sm:$0xff] }
 0x39c   :  { %v8972_v42 = vpack.c.bf16 %v1842_v0, %v1838_v38  ;;  %3006 = vmatprep.subr.bf16.mxu0 %v6994_v23  ;;  %v1854_v2 = vmax.f32 %v1742_v17, 0.0  ;;  %v1759_v9 = vadd.f32 %v8491_v41, %v1631_v6  ;;  %v1630_v31 = vmul.f32 %v8476_v50, %v10638_v60  ;;  %v6995_v0 = vld [vmem:[%s10377_s2 + $0x60] ss:$8 sps:$4 sm:$0xff]   ;;  %v7000_v39 = vld [vmem:[%s10377_s2 + $0x74] ss:$8 sps:$4 sm:$0xff]  }
 0x39d   :  { %1987 = vst.msk [vmem:[#allocation2 + $0x78] sm:$0xff] %vm66_vm2, %v1931_v57  ;;  %v1939_v45 = vpack.c.bf16 %v1859_v5, %v1855_v12  ;;  %v1858_v43 = vmax.f32 %v1746_v33, 0.0  ;;  %v1763_v3 = vadd.f32 %v8491_v41, %v1635_v61  ;;  %v1634_v25 = vmul.f32 %v8476_v50, %v10639_v7  ;;  %v10643_v5 = vld [vmem:[#allocation75_spill] sm:$0xff]  ;;  %v6998_v7 = vld [vmem:[%s10377_s2 + $0x70] ss:$8 sps:$4 sm:$0xff]  }
 0x39e   :  { %v1647_v23 = vmul.f32 %v8488_v11, %v10640_v15  ;;  %v1871_v59 = vmax.f32 %v1759_v9, 0.0  ;;  %v1758_v53 = vadd.f32 %v8479_v20, %v1630_v31  ;;  %v1651_v8 = vmul.f32 %v8488_v11, %v10641_v51  ;;  %v10646_v15 = vld [vmem:[#allocation82_spill] sm:$0xff] }
 0x39f   :  { %1995 = vst.msk [vmem:[#allocation2 + $0x98] sm:$0xff] %vm66_vm2, %v1939_v45  ;;  %v1646_v38 = vmul.f32 %v8476_v50, %v10642_v10  ;;  %3007 = vmatpush1.bf16.msra.mxu0 %v6992_v54  ;;  %v8998_v4 = vpack.c.bf16 %v1858_v43, %v1854_v2  ;;  %v1875_v40 = vmax.f32 %v1763_v3, 0.0  ;;  %v1762_v24 = vadd.f32 %v8479_v20, %v1634_v25  ;;  %v10644_v45 = vld [vmem:[#allocation84_spill] sm:$0xff] }
 0x3a0   :  { %v1775_v6 = vadd.f32 %v8491_v41, %v1647_v23  ;;  %3008 = vmatprep.subr.bf16.mxu0 %v6997_v55  ;;  %v1870_v57 = vmax.f32 %v1758_v53, 0.0  ;;  %v1779_v12 = vadd.f32 %v8491_v41, %v1651_v8  ;;  %v1650_v17 = vmul.f32 %v8476_v50, %v10643_v5  ;;  %v2123_v55 = vld [vmem:[#allocation3 + $0x98] sm:$0xff]  ;;  %v10645_v43 = vld [vmem:[#allocation88_spill] sm:$0xff]  ;;  %v10647_v8 = vld [vmem:[#allocation86_spill] sm:$0xff] }
 0x3a1   :  { %v1774_v54 = vadd.f32 %v8479_v20, %v1646_v38  ;;  %v1947_v33 = vpack.c.bf16 %v1875_v40, %v1871_v59  ;;  %v1874_v22 = vmax.f32 %v1762_v24, 0.0  ;;  %v1661_v2 = vmul.f32 %v8482_v52, %v10644_v45  ;;  %v10648_v40 = vld [vmem:[#allocation85_spill] sm:$0xff] }
 0x3a2   :  { %v1887_v61 = vmax.f32 %v1775_v6, 0.0  ;;  %2655 = vmatmul.mubr.bf16.gmra.mrb[72].mxu0 %v8724_v62  ;;  %v1891_v9 = vmax.f32 %v1779_v12, 0.0  ;;  %v1778_v60 = vadd.f32 %v8479_v20, %v1650_v17  ;;  %v1665_v3 = vmul.f32 %v8482_v52, %v10645_v43  ;;  %v7003_v52 = vld [vmem:[%s10377_s2 + $0x84] ss:$8 sps:$4 sm:$0xff]   ;;  %v10649_v6 = vld [vmem:[#allocation89_spill] sm:$0xff] }
 0x3a3   :  { %v1886_v31 = vmax.f32 %v1774_v54, 0.0  ;;  %3009 = vmatpush1.bf16.msra.mxu0 %v6995_v0  ;;  %5982 = vmatprep.mubr.msk.bf16.mxu0 %vm66_vm2, %v2123_v55  ;;  %2003 = vst.msk [vmem:[#allocation2 + $0xb8] sm:$0xff] %vm66_vm2, %v1947_v33  ;;  %v9020_v25 = vpack.c.bf16 %v1874_v22, %v1870_v57  ;;  %v1789_v62 = vadd.f32 %v8485_v14, %v1661_v2  ;;  %v10651_v22 = vld [vmem:[#allocation87_spill] sm:$0xff] }
 0x3a4   :  { %v1660_v23 = vmul.f32 %v8470_v49, %v10646_v15  ;;  %3010 = vmatprep.subr.bf16.mxu0 %v7000_v39  ;;  %v1955_v59 = vpack.c.bf16 %v1891_v9, %v1887_v61  ;;  %v1890_v53 = vmax.f32 %v1778_v60, 0.0  ;;  %v1793_v51 = vadd.f32 %v8485_v14, %v1665_v3  ;;  %v10650_v14 = vld [vmem:[#allocation83_spill] sm:$0xff]  ;;  %v7004_v3 = vld [vmem:[%s10377_s2 + $0x90] ss:$8 sps:$4 sm:$0xff]  }
 0x3a5   :  { %v1664_v10 = vmul.f32 %v8470_v49, %v10647_v8  ;;  %v1901_v38 = vmax.f32 %v1789_v62, 0.0  ;;  %v1663_v24 = vmul.f32 %v8488_v11, %v10648_v40  ;;  %v1667_v39 = vmul.f32 %v8488_v11, %v10649_v6  ;;  %v7001_v49 = vld [vmem:[%s10377_s2 + $0x80] ss:$8 sps:$4 sm:$0xff]   ;;  %v7016_v8 = vld [vmem:[%s10377_s2 + $0xd0] ss:$8 sps:$4 sm:$0xff]  }
 0x3a6   :  { %v1788_v0 = vadd.f32 %v8473_v32, %v1660_v23  ;;  %2011 = vst.msk [vmem:[#allocation2 + $0xd8] sm:$0xff] %vm66_vm2, %v1955_v59  ;;  %v9037_v57 = vpack.c.bf16 %v1890_v53, %v1886_v31  ;;  %v1905_v12 = vmax.f32 %v1793_v51, 0.0  ;;  %v1662_v17 = vmul.f32 %v8476_v50, %v10650_v14  ;;  %v7007_v15 = vld [vmem:[%s10377_s2 + $0xa0] ss:$8 sps:$4 sm:$0xff]   ;;  %v7012_v23 = vld [vmem:[%s10377_s2 + $0xb4] ss:$8 sps:$4 sm:$0xff]  }
 0x3a7   :  { %v1792_v5 = vadd.f32 %v8473_v32, %v1664_v10  ;;  %3011 = vmatpush1.bf16.msra.mxu0 %v6998_v7  ;;  %v1791_v33 = vadd.f32 %v8491_v41, %v1663_v24  ;;  %v1795_v11 = vadd.f32 %v8491_v41, %v1667_v39  ;;  %v1666_v61 = vmul.f32 %v8476_v50, %v10651_v22  ;;  %v7006_v32 = vld [vmem:[%s10377_s2 + $0x94] ss:$8 sps:$4 sm:$0xff]   ;;  %v7010_v59 = vld [vmem:[%s10377_s2 + $0xb0] ss:$8 sps:$4 sm:$0xff]   ;;  %v7015_v53 = vld [vmem:[%s10377_s2 + $0xc4] ss:$8 sps:$4 sm:$0xff]  }
 0x3a8   :  { %v1900_v54 = vmax.f32 %v1788_v0, 0.0  ;;  %3012 = vmatprep.subr.bf16.mxu0 %v7003_v52  ;;  %v9052_v45 = vpack.c.bf16 %v1905_v12, %v1901_v38  ;;  %v1790_v55 = vadd.f32 %v8479_v20, %v1662_v17  ;;  %v2127_v41 = vld [vmem:[#allocation3 + $0xb8] sm:$0xff]  ;;  %v7013_v51 = vld [vmem:[%s10377_s2 + $0xc0] ss:$8 sps:$4 sm:$0xff]   ;;  %v7021_v38 = vld [vmem:[%s10377_s2 + $0xe4] ss:$8 sps:$4 sm:$0xff]  }
 0x3a9   :  { %v1904_v2 = vmax.f32 %v1792_v5, 0.0  ;;  %v1903_v9 = vmax.f32 %v1791_v33, 0.0  ;;  %v1907_v60 = vmax.f32 %v1795_v11, 0.0  ;;  %v1794_v31 = vadd.f32 %v8479_v20, %v1666_v61  ;;  %v7009_v20 = vld [vmem:[%s10377_s2 + $0xa4] ss:$8 sps:$4 sm:$0xff]   ;;  %v2131_v52 = vld [vmem:[#allocation3 + $0xd8] sm:$0xff] }
 0x3aa   :  { %2665 = vmatmul.mubr.bf16.gmra.mrb[76].mxu0 %v8748_v44  ;;  %v1902_v50 = vmax.f32 %v1790_v55, 0.0  ;;  %v9093_v10 = vld [vmem:[#allocation2] sm:$0xff]  ;;  %v7022_v40 = vld [vmem:[%s10377_s2 + $0xf0] ss:$8 sps:$4 sm:$0xff]   ;;  %v7030_v39 = vld [vmem:[%s10377_s2 + $0x114] ss:$8 sps:$4 sm:$0xff]  }
 0x3ab   :  { %v9057_v43 = vpack.c.bf16 %v1904_v2, %v1900_v54  ;;  %3013 = vmatpush1.bf16.msra.mxu0 %v7001_v49  ;;  %5983 = vmatprep.mubr.msk.bf16.mxu0 %vm66_vm2, %v2127_v41  ;;  %v1963_v7 = vpack.c.bf16 %v1907_v60, %v1903_v9  ;;  %v1906_v62 = vmax.f32 %v1794_v31, 0.0  ;;  %v7019_v0 = vld [vmem:[%s10377_s2 + $0xe0] ss:$8 sps:$4 sm:$0xff]   ;;  %v7027_v24 = vld [vmem:[%s10377_s2 + $0x104] ss:$8 sps:$4 sm:$0xff]   ;;  %70 = vst.msk [vmem:[#allocation4 + $0x8] sm:$0xff] %vm69_vm5, %v9093_v10 }
 0x3ac   :  { %3014 = vmatprep.subr.bf16.mxu0 %v7006_v32  ;;  %v7025_v6 = vld [vmem:[%s10377_s2 + $0x100] ss:$8 sps:$4 sm:$0xff]   ;;  %v7028_v12 = vld [vmem:[%s10377_s2 + $0x110] ss:$8 sps:$4 sm:$0xff]   ;;  %v7033_v5 = vld [vmem:[%s10377_s2 + $0x124] ss:$8 sps:$4 sm:$0xff]  }
 0x3ad   :  { %2019 = vst.msk [vmem:[#allocation2 + $0xf8] sm:$0xff] %vm66_vm2, %v1963_v7  ;;  %v9067_v44 = vpack.c.bf16 %v1906_v62, %v1902_v50  ;;  %v7031_v14 = vld [vmem:[%s10377_s2 + $0x120] ss:$8 sps:$4 sm:$0xff]   ;;  %v7036_v17 = vld [vmem:[%s10377_s2 + $0x134] ss:$8 sps:$4 sm:$0xff]  }
 0x3ae   :  { %v7034_v49 = vld [vmem:[%s10377_s2 + $0x130] ss:$8 sps:$4 sm:$0xff]   ;;  %v7039_v54 = vld [vmem:[%s10377_s2 + $0x144] ss:$8 sps:$4 sm:$0xff]   ;;  %v7037_v33 = vld [vmem:[%s10377_s2 + $0x140] ss:$8 sps:$4 sm:$0xff]  }
 0x3af   :  { %3015 = vmatpush1.bf16.msra.mxu0 %v7004_v3  ;;  %v7042_v11 = vld [vmem:[%s10377_s2 + $0x154] ss:$8 sps:$4 sm:$0xff]   ;;  %v7040_v22 = vld [vmem:[%s10377_s2 + $0x150] ss:$8 sps:$4 sm:$0xff]   ;;  %v7045_v61 = vld [vmem:[%s10377_s2 + $0x164] ss:$8 sps:$4 sm:$0xff]  }
 0x3b0   :  { %3016 = vmatprep.subr.bf16.mxu0 %v7009_v20  ;;  %v7043_v32 = vld [vmem:[%s10377_s2 + $0x160] ss:$8 sps:$4 sm:$0xff]   ;;  %v7048_v2 = vld [vmem:[%s10377_s2 + $0x174] ss:$8 sps:$4 sm:$0xff]   ;;  %v7046_v55 = vld [vmem:[%s10377_s2 + $0x170] ss:$8 sps:$4 sm:$0xff]  }
 0x3b1   :  { %v7051_v9 = vld [vmem:[%s10377_s2 + $0x184] ss:$8 sps:$4 sm:$0xff]   ;;  %v7049_v60 = vld [vmem:[%s10377_s2 + $0x180] ss:$8 sps:$4 sm:$0xff]   ;;  %v7054_v31 = vld [vmem:[%s10377_s2 + $0x194] ss:$8 sps:$4 sm:$0xff]  }
 0x3b2   :  { %2675 = vmatmul.mubr.bf16.gmra.mrb[80].mxu0 %v8768_v18  ;;  %v7018_v18 = vld [vmem:[%s10377_s2 + $0xd4] ss:$8 sps:$4 sm:$0xff]   ;;  %v7052_v41 = vld [vmem:[%s10377_s2 + $0x190] ss:$8 sps:$4 sm:$0xff]   ;;  %v7057_v50 = vld [vmem:[%s10377_s2 + $0x1a4] ss:$8 sps:$4 sm:$0xff]  }
 0x3b3   :  { %3017 = vmatpush1.bf16.msra.mxu0 %v7007_v15  ;;  %5984 = vmatprep.mubr.msk.bf16.mxu0 %vm66_vm2, %v2131_v52  ;;  %v7055_v3 = vld [vmem:[%s10377_s2 + $0x1a0] ss:$8 sps:$4 sm:$0xff]   ;;  %v7060_v7 = vld [vmem:[%s10377_s2 + $0x1b4] ss:$8 sps:$4 sm:$0xff]   ;;  %v7058_v62 = vld [vmem:[%s10377_s2 + $0x1b0] ss:$8 sps:$4 sm:$0xff]  }
 0x3b4   :  { %3018 = vmatprep.subr.bf16.mxu0 %v7012_v23  ;;  %v7063_v20 = vld [vmem:[%s10378_s4 + $0x4] ss:$8 sps:$4 sm:$0xff]   ;;  %v2023_v15 = vld [vmem:[#allocation2 + $0x18] sm:$0xff]  ;;  %v7061_v23 = vld [vmem:[%s10378_s4] ss:$8 sps:$4 sm:$0xff]   ;;  %72 = vst.msk [vmem:[#allocation4 + $0x48] sm:$0xff] %vm69_vm5, %v9093_v10 }
 0x3b5   :  { %v7066_v52 = vld [vmem:[%s10378_s4 + $0x14] ss:$8 sps:$4 sm:$0xff]  }
 0x3b7   :  { %3019 = vmatpush1.bf16.msra.mxu0 %v7010_v59  ;;  %v9204_v59 = vld [vmem:[#allocation2 + $0x38] sm:$0xff] }
 0x3b8   :  { %3020 = vmatprep.subr.bf16.mxu0 %v7015_v53  ;;  %v7064_v53 = vld [vmem:[%s10378_s4 + $0x10] ss:$8 sps:$4 sm:$0xff]  }
 0x3ba   :  { %2685 = vmatmul.mubr.bf16.gmra.mrb[84].mxu0 %v8789_v30  ;;  %v7024_v30 = vld [vmem:[%s10377_s2 + $0xf4] ss:$8 sps:$4 sm:$0xff]  }
 0x3bb   :  { %3021 = vmatpush1.bf16.msra.mxu0 %v7013_v51  ;;  %3028 = vmatprep.mubr.bf16.mxu0 %v9093_v10  ;;  %v7069_v51 = vld [vmem:[%s10378_s4 + $0x24] ss:$8 sps:$4 sm:$0xff]  }
 0x3bc   :  { %3022 = vmatprep.subr.bf16.mxu0 %v7018_v18  ;;  %v7067_v18 = vld [vmem:[%s10378_s4 + $0x20] ss:$8 sps:$4 sm:$0xff]  }
 0x3bf   :  { %3023 = vmatpush1.bf16.msra.mxu0 %v7016_v8  ;;  %v7072_v8 = vld [vmem:[%s10378_s4 + $0x34] ss:$8 sps:$4 sm:$0xff]  }
 0x3c0   :  { %3024 = vmatprep.subr.bf16.mxu0 %v7021_v38  ;;  %v9221_v38 = vld [vmem:[#allocation2 + $0x58] sm:$0xff] }
 0x3c3   :  { %3025 = vmatpush1.bf16.msra.mxu0 %v7019_v0  ;;  %v7070_v0 = vld [vmem:[%s10378_s4 + $0x30] ss:$8 sps:$4 sm:$0xff]  }
 0x3c4   :  { %3026 = vmatprep.subr.bf16.mxu0 %v7024_v30  ;;  %v7075_v30 = vld [vmem:[%s10378_s4 + $0x44] ss:$8 sps:$4 sm:$0xff]  }
 0x3c7   :  { %3027 = vmatpush1.bf16.msra.mxu0 %v7022_v40  ;;  %v7073_v40 = vld [vmem:[%s10378_s4 + $0x40] ss:$8 sps:$4 sm:$0xff]  }
 0x3c8   :  { %3099 = vmatprep.subr.bf16.mxu0 %v7027_v24  ;;  %v7078_v24 = vld [vmem:[%s10378_s4 + $0x54] ss:$8 sps:$4 sm:$0xff]  }
 0x3ca   :  { %3029 = vmatmul.mubr.bf16.vlgmr.msra.gmra.mrb[60].mxu0 %v9093_v10 }
 0x3cb   :  { %3038 = vmatprep.mubr.bf16.mxu0 %v8804_v21  ;;  %3100 = vmatpush1.bf16.msra.mxu0 %v7025_v6  ;;  %v9238_v6 = vld [vmem:[#allocation2 + $0x78] sm:$0xff] }
 0x3cc   :  { %3101 = vmatprep.subr.bf16.mxu0 %v7030_v39  ;;  %v7076_v39 = vld [vmem:[%s10378_s4 + $0x50] ss:$8 sps:$4 sm:$0xff]  }
 0x3cf   :  { %3102 = vmatpush1.bf16.msra.mxu0 %v7028_v12  ;;  %v7081_v12 = vld [vmem:[%s10378_s4 + $0x64] ss:$8 sps:$4 sm:$0xff]  }
 0x3d0   :  { %3103 = vmatprep.subr.bf16.mxu0 %v7033_v5  ;;  %v7079_v5 = vld [vmem:[%s10378_s4 + $0x60] ss:$8 sps:$4 sm:$0xff]  }
 0x3d2   :  { %3039 = vmatmul.mubr.bf16.gmra.mrb[64].mxu0 %v8807_v16 }
 0x3d3   :  { %3048 = vmatprep.mubr.bf16.mxu0 %v8813_v37  ;;  %3104 = vmatpush1.bf16.msra.mxu0 %v7031_v14  ;;  %v7084_v14 = vld [vmem:[%s10378_s4 + $0x74] ss:$8 sps:$4 sm:$0xff]  }
 0x3d4   :  { %3105 = vmatprep.subr.bf16.mxu0 %v7036_v17  ;;  %v9255_v17 = vld [vmem:[#allocation2 + $0x98] sm:$0xff] }
 0x3d7   :  { %3106 = vmatpush1.bf16.msra.mxu0 %v7034_v49  ;;  %v7082_v49 = vld [vmem:[%s10378_s4 + $0x70] ss:$8 sps:$4 sm:$0xff]  }
 0x3d8   :  { %3107 = vmatprep.subr.bf16.mxu0 %v7039_v54  ;;  %v7087_v54 = vld [vmem:[%s10378_s4 + $0x84] ss:$8 sps:$4 sm:$0xff]  }
 0x3da   :  { %3049 = vmatmul.mubr.bf16.gmra.mrb[68].mxu0 %v8830_v29 }
 0x3db   :  { %3058 = vmatprep.mubr.bf16.mxu0 %v8837_v28  ;;  %3108 = vmatpush1.bf16.msra.mxu0 %v7037_v33  ;;  %v7085_v33 = vld [vmem:[%s10378_s4 + $0x80] ss:$8 sps:$4 sm:$0xff]  }
 0x3dc   :  { %3109 = vmatprep.subr.bf16.mxu0 %v7042_v11  ;;  %v7090_v11 = vld [vmem:[%s10378_s4 + $0x94] ss:$8 sps:$4 sm:$0xff]  }
 0x3df   :  { %3110 = vmatpush1.bf16.msra.mxu0 %v7040_v22  ;;  %v9272_v22 = vld [vmem:[#allocation2 + $0xb8] sm:$0xff] }
 0x3e0   :  { %3111 = vmatprep.subr.bf16.mxu0 %v7045_v61  ;;  %v7088_v61 = vld [vmem:[%s10378_s4 + $0x90] ss:$8 sps:$4 sm:$0xff]  }
 0x3e2   :  { %3059 = vmatmul.mubr.bf16.gmra.mrb[72].mxu0 %v8842_v19 }
 0x3e3   :  { %3068 = vmatprep.mubr.bf16.mxu0 %v8857_v26  ;;  %3112 = vmatpush1.bf16.msra.mxu0 %v7043_v32  ;;  %v7093_v32 = vld [vmem:[%s10378_s4 + $0xa4] ss:$8 sps:$4 sm:$0xff]  }
 0x3e4   :  { %3113 = vmatprep.subr.bf16.mxu0 %v7048_v2  ;;  %v7091_v2 = vld [vmem:[%s10378_s4 + $0xa0] ss:$8 sps:$4 sm:$0xff]  }
 0x3e7   :  { %3114 = vmatpush1.bf16.msra.mxu0 %v7046_v55  ;;  %v7096_v55 = vld [vmem:[%s10378_s4 + $0xb4] ss:$8 sps:$4 sm:$0xff]  }
 0x3e8   :  { %3115 = vmatprep.subr.bf16.mxu0 %v7051_v9  ;;  %v9289_v9 = vld [vmem:[#allocation2 + $0xd8] sm:$0xff] }
 0x3ea   :  { %3069 = vmatmul.mubr.bf16.gmra.mrb[76].mxu0 %v8864_v48 }
 0x3eb   :  { %3078 = vmatprep.mubr.bf16.mxu0 %v8884_v1  ;;  %3116 = vmatpush1.bf16.msra.mxu0 %v7049_v60  ;;  %v7094_v60 = vld [vmem:[%s10378_s4 + $0xb0] ss:$8 sps:$4 sm:$0xff]  }
 0x3ec   :  { %3117 = vmatprep.subr.bf16.mxu0 %v7054_v31  ;;  %v7099_v31 = vld [vmem:[%s10378_s4 + $0xc4] ss:$8 sps:$4 sm:$0xff]  }
 0x3ef   :  { %3118 = vmatpush1.bf16.msra.mxu0 %v7052_v41  ;;  %v7097_v41 = vld [vmem:[%s10378_s4 + $0xc0] ss:$8 sps:$4 sm:$0xff]  }
 0x3f0   :  { %3119 = vmatprep.subr.bf16.mxu0 %v7057_v50  ;;  %v7102_v50 = vld [vmem:[%s10378_s4 + $0xd4] ss:$8 sps:$4 sm:$0xff]  }
 0x3f2   :  { %3079 = vmatmul.mubr.bf16.gmra.mrb[80].mxu0 %v8887_v34 }
 0x3f3   :  { %3088 = vmatprep.mubr.bf16.mxu0 %v8893_v56  ;;  %3120 = vmatpush1.bf16.msra.mxu0 %v7055_v3  ;;  %v7100_v3 = vld [vmem:[%s10378_s4 + $0xd0] ss:$8 sps:$4 sm:$0xff]  }
 0x3f4   :  { %3121 = vmatprep.subr.bf16.mxu0 %v7060_v7  ;;  %v7105_v7 = vld [vmem:[%s10378_s4 + $0xe4] ss:$8 sps:$4 sm:$0xff]  }
 0x3f7   :  { %3122 = vmatpush1.bf16.msra.mxu0 %v7058_v62  ;;  %v7103_v62 = vld [vmem:[%s10378_s4 + $0xe0] ss:$8 sps:$4 sm:$0xff]  }
 0x3f8   :  { %3587 = vmatprep.subr.bf16.mxu0 %v7063_v20  ;;  %v7108_v20 = vld [vmem:[%s10378_s4 + $0xf4] ss:$8 sps:$4 sm:$0xff]  }
 0x3fa   :  { %3089 = vmatmul.mubr.bf16.gmra.mrb[84].mxu0 %v8914_v27 }
 0x3fb   :  { %6041 = vmatprep.mubr.msk.bf16.mxu0 %vm66_vm2, %v2023_v15  ;;  %v7111_v15 = vld [vmem:[%s10378_s4 + $0x104] ss:$8 sps:$4 sm:$0xff]  }
 0x402   :  { %3132 = vmatmul.mubr.bf16.vlgmr.msra.gmra.mrb[60].mxu0 %v9093_v10 }
 0x403   :  { %3588 = vmatpush1.bf16.msra.mxu0 %v7061_v23  ;;  %6042 = vmatprep.mubr.msk.bf16.mxu0 %vm66_vm2, %v9204_v59  ;;  %v7109_v23 = vld [vmem:[%s10378_s4 + $0x100] ss:$8 sps:$4 sm:$0xff]  }
 0x404   :  { %3589 = vmatprep.subr.bf16.mxu0 %v7066_v52  ;;  %v7114_v52 = vld [vmem:[%s10378_s4 + $0x114] ss:$8 sps:$4 sm:$0xff]  }
 0x407   :  { %3590 = vmatpush1.bf16.msra.mxu0 %v7064_v53  ;;  %v7112_v53 = vld [vmem:[%s10378_s4 + $0x110] ss:$8 sps:$4 sm:$0xff]  }
 0x408   :  { %3591 = vmatprep.subr.bf16.mxu0 %v7069_v51  ;;  %v7117_v51 = vld [vmem:[%s10378_s4 + $0x124] ss:$8 sps:$4 sm:$0xff]  }
 0x40a   :  { %3142 = vmatmul.mubr.bf16.gmra.mrb[64].mxu0 %v8932_v13 }
 0x40b   :  { %3592 = vmatpush1.bf16.msra.mxu0 %v7067_v18  ;;  %6043 = vmatprep.mubr.msk.bf16.mxu0 %vm66_vm2, %v9221_v38  ;;  %v7115_v18 = vld [vmem:[%s10378_s4 + $0x120] ss:$8 sps:$4 sm:$0xff]  }
 0x40c   :  { %3593 = vmatprep.subr.bf16.mxu0 %v7072_v8  ;;  %v7123_v8 = vld [vmem:[%s10378_s4 + $0x144] ss:$8 sps:$4 sm:$0xff]  }
 0x40f   :  { %3594 = vmatpush1.bf16.msra.mxu0 %v7070_v0  ;;  %v7121_v0 = vld [vmem:[%s10378_s4 + $0x140] ss:$8 sps:$4 sm:$0xff]  }
 0x410   :  { %3595 = vmatprep.subr.bf16.mxu0 %v7075_v30  ;;  %v7129_v30 = vld [vmem:[%s10378_s4 + $0x164] ss:$8 sps:$4 sm:$0xff]  }
 0x412   :  { %3152 = vmatmul.mubr.bf16.gmra.mrb[68].mxu0 %v8950_v47 }
 0x413   :  { %3596 = vmatpush1.bf16.msra.mxu0 %v7073_v40  ;;  %6044 = vmatprep.mubr.msk.bf16.mxu0 %vm66_vm2, %v9238_v6  ;;  %v7127_v40 = vld [vmem:[%s10378_s4 + $0x160] ss:$8 sps:$4 sm:$0xff]  }
 0x414   :  { %3597 = vmatprep.subr.bf16.mxu0 %v7078_v24  ;;  %v7135_v24 = vld [vmem:[%s10378_s4 + $0x184] ss:$8 sps:$4 sm:$0xff]  }
 0x417   :  { %3598 = vmatpush1.bf16.msra.mxu0 %v7076_v39  ;;  %v7133_v39 = vld [vmem:[%s10378_s4 + $0x180] ss:$8 sps:$4 sm:$0xff]  }
 0x418   :  { %3599 = vmatprep.subr.bf16.mxu0 %v7081_v12  ;;  %v7141_v12 = vld [vmem:[%s10378_s4 + $0x1a4] ss:$8 sps:$4 sm:$0xff]  }
 0x41a   :  { %3162 = vmatmul.mubr.bf16.gmra.mrb[72].mxu0 %v8972_v42 }
 0x41b   :  { %3600 = vmatpush1.bf16.msra.mxu0 %v7079_v5  ;;  %6045 = vmatprep.mubr.msk.bf16.mxu0 %vm66_vm2, %v9255_v17  ;;  %v7139_v5 = vld [vmem:[%s10378_s4 + $0x1a0] ss:$8 sps:$4 sm:$0xff]  }
 0x41c   :  { %3601 = vmatprep.subr.bf16.mxu0 %v7084_v14  ;;  %v3967_v14 = vld [vmem:[%s10485_s20 + $0x40] sm:$0xff] }
 0x41f   :  { %3602 = vmatpush1.bf16.msra.mxu0 %v7082_v49 }
 0x420   :  { %3603 = vmatprep.subr.bf16.mxu0 %v7087_v54  ;;  %v3969_v54 = vld [vmem:[%s10485_s20 + $0x50] sm:$0xff] }
 0x422   :  { %3172 = vmatmul.mubr.bf16.gmra.mrb[76].mxu0 %v8998_v4 }
 0x423   :  { %3604 = vmatpush1.bf16.msra.mxu0 %v7085_v33  ;;  %6046 = vmatprep.mubr.msk.bf16.mxu0 %vm66_vm2, %v9272_v22  ;;  %v3970_v33 = vld [vmem:[%s10485_s20 + $0x58] sm:$0xff] }
 0x424   :  { %3605 = vmatprep.subr.bf16.mxu0 %v7090_v11  ;;  %v6563_v11 = vpack.c.bf16 %v3970_v33, %v3969_v54 }
 0x427   :  { %3606 = vmatpush1.bf16.msra.mxu0 %v7088_v61  ;;  %v3972_v61 = vld [vmem:[%s10485_s20 + $0x68] sm:$0xff] }
 0x428   :  { %3607 = vmatprep.subr.bf16.mxu0 %v7093_v32 }
 0x42a   :  { %3182 = vmatmul.mubr.bf16.gmra.mrb[80].mxu0 %v9020_v25 }
 0x42b   :  { %3608 = vmatpush1.bf16.msra.mxu0 %v7091_v2  ;;  %6047 = vmatprep.mubr.msk.bf16.mxu0 %vm66_vm2, %v9289_v9  ;;  %v3973_v2 = vld [vmem:[%s10485_s20 + $0x70] sm:$0xff] }
 0x42c   :  { %3609 = vmatprep.subr.bf16.mxu0 %v7096_v55  ;;  %v3974_v55 = vld [vmem:[%s10485_s20 + $0x78] sm:$0xff] }
 0x42f   :  { %3610 = vmatpush1.bf16.msra.mxu0 %v7094_v60  ;;  %v3975_v60 = vld [vmem:[%s10485_s20 + $0x80] sm:$0xff] }
 0x430   :  { %3611 = vmatprep.subr.bf16.mxu0 %v7099_v31  ;;  %v3976_v31 = vld [vmem:[%s10485_s20 + $0x88] sm:$0xff] }
 0x432   :  { %3192 = vmatmul.mubr.bf16.gmra.mrb[84].mxu0 %v9037_v57 }
 0x433   :  { %3612 = vmatpush1.bf16.msra.mxu0 %v7097_v41  ;;  %3619 = vmatprep.mubr.bf16.mxu0 %v8804_v21  ;;  %v7106_v21 = vld [vmem:[%s10378_s4 + $0xf0] ss:$8 sps:$4 sm:$0xff]   ;;  %v6572_v41 = vpack.c.bf16 %v3976_v31, %v3975_v60 }
 0x434   :  { %3613 = vmatprep.subr.bf16.mxu0 %v7102_v50  ;;  %v3977_v50 = vld [vmem:[%s10485_s20 + $0x90] sm:$0xff] }
 0x437   :  { %3614 = vmatpush1.bf16.msra.mxu0 %v7100_v3  ;;  %v3978_v3 = vld [vmem:[%s10485_s20 + $0x98] sm:$0xff] }
 0x438   :  { %3615 = vmatprep.subr.bf16.mxu0 %v7105_v7  ;;  %v3979_v7 = vld [vmem:[%s10485_s20 + $0xa0] sm:$0xff] }
 0x43b   :  { %3616 = vmatpush1.bf16.msra.mxu0 %v7103_v62  ;;  %v6575_v62 = vpack.c.bf16 %v3978_v3, %v3977_v50 }
 0x43c   :  { %3617 = vmatprep.subr.bf16.mxu0 %v7108_v20  ;;  %v3980_v20 = vld [vmem:[%s10485_s20 + $0xa8] sm:$0xff] }
 0x43f   :  { %3618 = vmatpush1.bf16.msra.mxu0 %v7106_v21  ;;  %v6578_v21 = vpack.c.bf16 %v3980_v20, %v3979_v7 }
 0x440   :  { %3690 = vmatprep.subr.bf16.mxu0 %v7111_v15  ;;  %v3981_v15 = vld [vmem:[%s10485_s20 + $0xb0] sm:$0xff] }
 0x442   :  { %3620 = vmatmul.mubr.bf16.vlgmr.msra.gmra.mrb[60].mxu0 %v8807_v16  ;;  %v7120_v16 = vld [vmem:[%s10378_s4 + $0x134] ss:$8 sps:$4 sm:$0xff]  }
 0x443   :  { %3629 = vmatprep.mubr.bf16.mxu0 %v8813_v37  ;;  %3691 = vmatpush1.bf16.msra.mxu0 %v7109_v23  ;;  %v7118_v37 = vld [vmem:[%s10378_s4 + $0x130] ss:$8 sps:$4 sm:$0xff]  }
 0x444   :  { %3692 = vmatprep.subr.bf16.mxu0 %v7114_v52  ;;  %v3982_v23 = vld [vmem:[%s10485_s20 + $0xb8] sm:$0xff] }
 0x445   :  { %v6581_v52 = vpack.c.bf16 %v3982_v23, %v3981_v15 }
 0x447   :  { %3693 = vmatpush1.bf16.msra.mxu0 %v7112_v53  ;;  %v3983_v53 = vld [vmem:[%s10485_s20 + $0xc0] sm:$0xff] }
 0x448   :  { %3694 = vmatprep.subr.bf16.mxu0 %v7117_v51  ;;  %v3984_v51 = vld [vmem:[%s10485_s20 + $0xc8] sm:$0xff] }
 0x44a   :  { %3630 = vmatmul.mubr.bf16.gmra.mrb[64].mxu0 %v8830_v29  ;;  %v7126_v29 = vld [vmem:[%s10378_s4 + $0x154] ss:$8 sps:$4 sm:$0xff]  }
 0x44b   :  { %3639 = vmatprep.mubr.bf16.mxu0 %v8837_v28  ;;  %3695 = vmatpush1.bf16.msra.mxu0 %v7115_v18  ;;  %v7124_v28 = vld [vmem:[%s10378_s4 + $0x150] ss:$8 sps:$4 sm:$0xff]   ;;  %v6584_v18 = vpack.c.bf16 %v3984_v51, %v3983_v53 }
 0x44c   :  { %3696 = vmatprep.subr.bf16.mxu0 %v7120_v16  ;;  %v3985_v16 = vld [vmem:[%s10485_s20 + $0xd0] sm:$0xff] }
 0x44f   :  { %3697 = vmatpush1.bf16.msra.mxu0 %v7118_v37  ;;  %v3986_v37 = vld [vmem:[%s10485_s20 + $0xd8] sm:$0xff] }
 0x450   :  { %3698 = vmatprep.subr.bf16.mxu0 %v7123_v8  ;;  %v6587_v8 = vpack.c.bf16 %v3986_v37, %v3985_v16 }
 0x452   :  { %3640 = vmatmul.mubr.bf16.gmra.mrb[68].mxu0 %v8842_v19  ;;  %v7132_v19 = vld [vmem:[%s10378_s4 + $0x174] ss:$8 sps:$4 sm:$0xff]  }
 0x453   :  { %3649 = vmatprep.mubr.bf16.mxu0 %v8857_v26  ;;  %3699 = vmatpush1.bf16.msra.mxu0 %v7121_v0  ;;  %v7130_v26 = vld [vmem:[%s10378_s4 + $0x170] ss:$8 sps:$4 sm:$0xff]  }
 0x454   :  { %3700 = vmatprep.subr.bf16.mxu0 %v7126_v29 }
 0x457   :  { %3701 = vmatpush1.bf16.msra.mxu0 %v7124_v28 }
 0x458   :  { %3702 = vmatprep.subr.bf16.mxu0 %v7129_v30 }
 0x45a   :  { %3650 = vmatmul.mubr.bf16.gmra.mrb[72].mxu0 %v8864_v48  ;;  %v7138_v48 = vld [vmem:[%s10378_s4 + $0x194] ss:$8 sps:$4 sm:$0xff]  }
 0x45b   :  { %3659 = vmatprep.mubr.bf16.mxu0 %v8884_v1  ;;  %3703 = vmatpush1.bf16.msra.mxu0 %v7127_v40  ;;  %v7136_v1 = vld [vmem:[%s10378_s4 + $0x190] ss:$8 sps:$4 sm:$0xff]  }
 0x45c   :  { %3704 = vmatprep.subr.bf16.mxu0 %v7132_v19 }
 0x45f   :  { %3705 = vmatpush1.bf16.msra.mxu0 %v7130_v26 }
 0x460   :  { %3706 = vmatprep.subr.bf16.mxu0 %v7135_v24 }
 0x462   :  { %3660 = vmatmul.mubr.bf16.gmra.mrb[76].mxu0 %v8887_v34  ;;  %v7144_v34 = vld [vmem:[%s10378_s4 + $0x1b4] ss:$8 sps:$4 sm:$0xff]  }
 0x463   :  { %3669 = vmatprep.mubr.bf16.mxu0 %v8893_v56  ;;  %3707 = vmatpush1.bf16.msra.mxu0 %v7133_v39  ;;  %v7142_v56 = vld [vmem:[%s10378_s4 + $0x1b0] ss:$8 sps:$4 sm:$0xff]  }
 0x464   :  { %3708 = vmatprep.subr.bf16.mxu0 %v7138_v48 }
 0x467   :  { %3709 = vmatpush1.bf16.msra.mxu0 %v7136_v1 }
 0x468   :  { %3710 = vmatprep.subr.bf16.mxu0 %v7141_v12 }
 0x46a   :  { %3670 = vmatmul.mubr.bf16.gmra.mrb[80].mxu0 %v8914_v27  ;;  %v3229_v27 = vld [vmem:[#allocation2 + $0xf8] sm:$0xff] }
 0x46b   :  { %3679 = vmatprep.mubr.bf16.mxu0 %v9052_v45  ;;  %3711 = vmatpush1.bf16.msra.mxu0 %v7139_v5  ;;  %v3963_v45 = vld [vmem:[%s10485_s20 + $0x20] sm:$0xff] }
 0x46c   :  { %3712 = vmatprep.subr.bf16.mxu0 %v7144_v34 }
 0x46f   :  { %3713 = vmatpush1.bf16.msra.mxu0 %v7142_v56 }
 0x472   :  { %3680 = vmatmul.mubr.bf16.gmra.mrb[84].mxu0 %v9057_v43  ;;  %v3964_v43 = vld [vmem:[%s10485_s20 + $0x28] sm:$0xff] }
 0x473   :  { %6104 = vmatprep.mubr.msk.bf16.mxu0 %vm66_vm2, %v9204_v59  ;;  %v3965_v59 = vld [vmem:[%s10485_s20 + $0x30] sm:$0xff] }
 0x47a   :  { %3723 = vmatmul.mubr.bf16.vlgmr.msra.gmra.mrb[60].mxu0 %v8932_v13  ;;  %v3959_v13 = vld [vmem:[%s10485_s20] sm:$0xff] }
 0x47b   :  { %6105 = vmatprep.mubr.msk.bf16.mxu0 %vm66_vm2, %v9221_v38  ;;  %v3966_v38 = vld [vmem:[%s10485_s20 + $0x38] sm:$0xff] }
 0x482   :  { %3733 = vmatmul.mubr.bf16.gmra.mrb[64].mxu0 %v8950_v47  ;;  %v3960_v47 = vld [vmem:[%s10485_s20 + $0x8] sm:$0xff] }
 0x483   :  { %6106 = vmatprep.mubr.msk.bf16.mxu0 %vm66_vm2, %v9238_v6  ;;  %v6557_v6 = vpack.c.bf16 %v3966_v38, %v3965_v59 }
 0x48a   :  { %3743 = vmatmul.mubr.bf16.gmra.mrb[68].mxu0 %v8972_v42  ;;  %v6548_v42 = vpack.c.bf16 %v3960_v47, %v3959_v13 }
 0x48b   :  { %6107 = vmatprep.mubr.msk.bf16.mxu0 %vm66_vm2, %v9255_v17  ;;  %v3968_v17 = vld [vmem:[%s10485_s20 + $0x48] sm:$0xff] }
 0x48c   :  { %6549 = vmatpush1.bf16.msra.mxu1 %v6548_v42  ;;  %v6560_v49 = vpack.c.bf16 %v3968_v17, %v3967_v14 }
 0x48d   :  { %6550 = vmatprep.subr.bf16.mxu1 %v10569_v63 }
 0x492   :  { %3753 = vmatmul.mubr.bf16.gmra.mrb[72].mxu0 %v8998_v4  ;;  %v3961_v4 = vld [vmem:[%s10485_s20 + $0x10] sm:$0xff] }
 0x493   :  { %6108 = vmatprep.mubr.msk.bf16.mxu0 %vm66_vm2, %v9272_v22  ;;  %v3971_v22 = vld [vmem:[%s10485_s20 + $0x60] sm:$0xff] }
 0x494   :  { %v6566_v32 = vpack.c.bf16 %v3972_v61, %v3971_v22 }
 0x49a   :  { %3763 = vmatmul.mubr.bf16.gmra.mrb[76].mxu0 %v9020_v25  ;;  %v3962_v25 = vld [vmem:[%s10485_s20 + $0x18] sm:$0xff] }
 0x49b   :  { %6109 = vmatprep.mubr.msk.bf16.mxu0 %vm66_vm2, %v9289_v9  ;;  %v6569_v9 = vpack.c.bf16 %v3974_v55, %v3973_v2 }
 0x4a2   :  { %3773 = vmatmul.mubr.bf16.gmra.mrb[80].mxu0 %v9037_v57  ;;  %v6551_v57 = vpack.c.bf16 %v3962_v25, %v3961_v4 }
 0x4a3   :  { %6110 = vmatprep.mubr.msk.bf16.mxu0 %vm66_vm2, %v3229_v27 }
 0x4a4   :  { %6552 = vmatpush1.bf16.msra.mxu1 %v6551_v57 }
 0x4a5   :  { %6553 = vmatprep.subr.bf16.mxu1 %v10569_v63 }
 0x4aa   :  { %3783 = vmatmul.mubr.bf16.gmra.mrb[84].mxu0 %v9067_v44  ;;  %v6554_v44 = vpack.c.bf16 %v3964_v43, %v3963_v45 }
 0x4ac   :  { %6555 = vmatpush1.bf16.msra.mxu1 %v6554_v44 }
 0x4ad   :  { %6556 = vmatprep.subr.bf16.mxu1 %v10569_v63 }
 0x4b0   :  { %6558 = vmatpush1.bf16.msra.mxu1 %v6557_v6 }
 0x4b1   :  { %6559 = vmatprep.subr.bf16.mxu1 %v10569_v63 }
 0x4b4   :  { %6561 = vmatpush1.bf16.msra.mxu1 %v6560_v49 }
 0x4b5   :  { %6562 = vmatprep.subr.bf16.mxu1 %v10569_v63 }
 0x4b8   :  { %6564 = vmatpush1.bf16.msra.mxu1 %v6563_v11 }
 0x4b9   :  { %6565 = vmatprep.subr.bf16.mxu1 %v10569_v63 }
 0x4bc   :  { %6567 = vmatpush1.bf16.msra.mxu1 %v6566_v32 }
 0x4bd   :  { %6568 = vmatprep.subr.bf16.mxu1 %v10569_v63 }
 0x4c0   :  { %6570 = vmatpush1.bf16.msra.mxu1 %v6569_v9 }
 0x4c1   :  { %6571 = vmatprep.subr.bf16.mxu1 %v10569_v63 }
 0x4c4   :  { %6573 = vmatpush1.bf16.msra.mxu1 %v6572_v41 }
 0x4c5   :  { %6574 = vmatprep.subr.bf16.mxu1 %v10569_v63 }
 0x4c8   :  { %6576 = vmatpush1.bf16.msra.mxu1 %v6575_v62 }
 0x4c9   :  { %6577 = vmatprep.subr.bf16.mxu1 %v10569_v63 }
 0x4cc   :  { %6579 = vmatpush1.bf16.msra.mxu1 %v6578_v21 }
 0x4cd   :  { %6580 = vmatprep.subr.bf16.mxu1 %v10569_v63 }
 0x4d0   :  { %6582 = vmatpush1.bf16.msra.mxu1 %v6581_v52 }
 0x4d1   :  { %6583 = vmatprep.subr.bf16.mxu1 %v10569_v63 }
 0x4d4   :  { %6585 = vmatpush1.bf16.msra.mxu1 %v6584_v18 }
 0x4d5   :  { %6586 = vmatprep.subr.bf16.mxu1 %v10569_v63 }
 0x4d8   :  { %6588 = vmatpush1.bf16.msra.mxu1 %v6587_v8 }
 0x54d   :  { %v9528_v0 = vpop.f32.mrb[60].mxu0 }
 0x54e   :  { %v9530_v29 = vpop.f32.mrb[61].mxu0  ;;  %v3875_v40 = vmul.f32 %v9528_v0, %v9528_v0 }
 0x54f   :  { %v3876_v28 = vmul.f32 %v9530_v29, %v9530_v29  ;;  %v9534_v30 = vpop.f32.mrb[62].mxu0  ;;  %v3840_v39 = vsel %vm69_vm5, %v9530_v29, 0.0 }
 0x550   :  { %v3821_v19 = vadd.f32 %v9534_v30, %v9528_v0  ;;  %v3877_v26 = vmul.f32 %v9534_v30, %v9534_v30  ;;  %v9542_v24 = vpop.f32.mrb[63].mxu0 }
 0x551   :  { %v3841_v48 = vsel %vm69_vm5, %v9542_v24, 0.0  ;;  %v3878_v1 = vmul.f32 %v9542_v24, %v9542_v24  ;;  %v3922_v34 = vsel %vm69_vm5, %v3876_v28, 0.0 }
 0x552   :  { %v3903_v12 = vadd.f32 %v3877_v26, %v3875_v40  ;;  %v3842_v5 = vadd.f32 %v3841_v48, %v3840_v39 }
 0x553   :  { %v3923_v56 = vsel %vm69_vm5, %v3878_v1, 0.0 }
 0x554   :  { %v3924_v27 = vadd.f32 %v3923_v56, %v3922_v34 }
 0x555   :  { %v9552_v13 = vpop.f32.mrb[64].mxu0 }
 0x556   :  { %v3822_v47 = vadd.f32 %v3821_v19, %v9552_v13  ;;  %v3879_v42 = vmul.f32 %v9552_v13, %v9552_v13  ;;  %v9557_v4 = vpop.f32.mrb[65].mxu0 }
 0x557   :  { %v3843_v25 = vsel %vm69_vm5, %v9557_v4, 0.0  ;;  %v3880_v57 = vmul.f32 %v9557_v4, %v9557_v4  ;;  %v9563_v45 = vpop.f32.mrb[66].mxu0 }
 0x558   :  { %v3904_v43 = vadd.f32 %v3903_v12, %v3879_v42  ;;  %v3844_v44 = vadd.f32 %v3843_v25, %v3842_v5  ;;  %v3823_v59 = vadd.f32 %v3822_v47, %v9563_v45  ;;  %v3881_v38 = vmul.f32 %v9563_v45, %v9563_v45  ;;  %v9568_v6 = vpop.f32.mrb[67].mxu0 }
 0x559   :  { %v3925_v14 = vsel %vm69_vm5, %v3880_v57, 0.0  ;;  %v3845_v17 = vsel %vm69_vm5, %v9568_v6, 0.0  ;;  %v3882_v49 = vmul.f32 %v9568_v6, %v9568_v6 }
 0x55a   :  { %v3926_v54 = vadd.f32 %v3925_v14, %v3924_v27  ;;  %v3905_v33 = vadd.f32 %v3904_v43, %v3881_v38  ;;  %v3846_v11 = vadd.f32 %v3845_v17, %v3844_v44 }
 0x55b   :  { %v3927_v22 = vsel %vm69_vm5, %v3882_v49, 0.0 }
 0x55c   :  { %v3928_v61 = vadd.f32 %v3927_v22, %v3926_v54 }
 0x55d   :  { %v9576_v32 = vpop.f32.mrb[68].mxu0 }
 0x55e   :  { %v3824_v2 = vadd.f32 %v3823_v59, %v9576_v32  ;;  %v3883_v55 = vmul.f32 %v9576_v32, %v9576_v32  ;;  %v9581_v9 = vpop.f32.mrb[69].mxu0 }
 0x55f   :  { %v3847_v60 = vsel %vm69_vm5, %v9581_v9, 0.0  ;;  %v3884_v31 = vmul.f32 %v9581_v9, %v9581_v9  ;;  %v9587_v41 = vpop.f32.mrb[70].mxu0 }
 0x560   :  { %v3906_v50 = vadd.f32 %v3905_v33, %v3883_v55  ;;  %v3848_v3 = vadd.f32 %v3847_v60, %v3846_v11  ;;  %v3825_v7 = vadd.f32 %v3824_v2, %v9587_v41  ;;  %v3885_v62 = vmul.f32 %v9587_v41, %v9587_v41  ;;  %v9592_v20 = vpop.f32.mrb[71].mxu0 }
 0x561   :  { %v3929_v21 = vsel %vm69_vm5, %v3884_v31, 0.0  ;;  %v3849_v15 = vsel %vm69_vm5, %v9592_v20, 0.0  ;;  %v3886_v23 = vmul.f32 %v9592_v20, %v9592_v20 }
 0x562   :  { %v3930_v52 = vadd.f32 %v3929_v21, %v3928_v61  ;;  %v3907_v53 = vadd.f32 %v3906_v50, %v3885_v62  ;;  %v3850_v51 = vadd.f32 %v3849_v15, %v3848_v3 }
 0x563   :  { %v3931_v18 = vsel %vm69_vm5, %v3886_v23, 0.0 }
 0x564   :  { %v3932_v16 = vadd.f32 %v3931_v18, %v3930_v52 }
 0x565   :  { %v9600_v37 = vpop.f32.mrb[72].mxu0 }
 0x566   :  { %v3826_v8 = vadd.f32 %v3825_v7, %v9600_v37  ;;  %v3887_v28 = vmul.f32 %v9600_v37, %v9600_v37  ;;  %v9605_v40 = vpop.f32.mrb[73].mxu0 }
 0x567   :  { %v3851_v19 = vsel %vm69_vm5, %v9605_v40, 0.0  ;;  %v3888_v26 = vmul.f32 %v9605_v40, %v9605_v40  ;;  %v9611_v39 = vpop.f32.mrb[74].mxu0 }
 0x568   :  { %v3908_v48 = vadd.f32 %v3907_v53, %v3887_v28  ;;  %v3852_v1 = vadd.f32 %v3851_v19, %v3850_v51  ;;  %v3827_v12 = vadd.f32 %v3826_v8, %v9611_v39  ;;  %v3889_v5 = vmul.f32 %v9611_v39, %v9611_v39  ;;  %v9616_v34 = vpop.f32.mrb[75].mxu0 }
 0x569   :  { %v3933_v56 = vsel %vm69_vm5, %v3888_v26, 0.0  ;;  %v3853_v27 = vsel %vm69_vm5, %v9616_v34, 0.0  ;;  %v3890_v47 = vmul.f32 %v9616_v34, %v9616_v34 }
 0x56a   :  { %v3934_v42 = vadd.f32 %v3933_v56, %v3932_v16  ;;  %v3909_v25 = vadd.f32 %v3908_v48, %v3889_v5  ;;  %v3854_v57 = vadd.f32 %v3853_v27, %v3852_v1 }
 0x56b   :  { %v3935_v43 = vsel %vm69_vm5, %v3890_v47, 0.0 }
 0x56c   :  { %v3936_v44 = vadd.f32 %v3935_v43, %v3934_v42 }
 0x56d   :  { %v9624_v59 = vpop.f32.mrb[76].mxu0 }
 0x56e   :  { %v3828_v38 = vadd.f32 %v3827_v12, %v9624_v59  ;;  %v3891_v14 = vmul.f32 %v9624_v59, %v9624_v59  ;;  %v9629_v17 = vpop.f32.mrb[77].mxu0 }
 0x56f   :  { %v3855_v49 = vsel %vm69_vm5, %v9629_v17, 0.0  ;;  %v3892_v54 = vmul.f32 %v9629_v17, %v9629_v17  ;;  %v9635_v33 = vpop.f32.mrb[78].mxu0 }
 0x570   :  { %v3910_v11 = vadd.f32 %v3909_v25, %v3891_v14  ;;  %v3856_v22 = vadd.f32 %v3855_v49, %v3854_v57  ;;  %v3829_v61 = vadd.f32 %v3828_v38, %v9635_v33  ;;  %v3893_v2 = vmul.f32 %v9635_v33, %v9635_v33  ;;  %v9640_v55 = vpop.f32.mrb[79].mxu0 }
 0x571   :  { %v3937_v60 = vsel %vm69_vm5, %v3892_v54, 0.0  ;;  %v3857_v31 = vsel %vm69_vm5, %v9640_v55, 0.0  ;;  %v3894_v50 = vmul.f32 %v9640_v55, %v9640_v55 }
 0x572   :  { %v3938_v3 = vadd.f32 %v3937_v60, %v3936_v44  ;;  %v3911_v7 = vadd.f32 %v3910_v11, %v3893_v2  ;;  %v3858_v62 = vadd.f32 %v3857_v31, %v3856_v22 }
 0x573   :  { %v3939_v21 = vsel %vm69_vm5, %v3894_v50, 0.0 }
 0x574   :  { %v3940_v15 = vadd.f32 %v3939_v21, %v3938_v3 }
 0x575   :  { %v9648_v23 = vpop.f32.mrb[80].mxu0 }
 0x576   :  { %v3830_v52 = vadd.f32 %v3829_v61, %v9648_v23  ;;  %v3895_v53 = vmul.f32 %v9648_v23, %v9648_v23  ;;  %v9653_v51 = vpop.f32.mrb[81].mxu0 }
 0x577   :  { %v3859_v18 = vsel %vm69_vm5, %v9653_v51, 0.0  ;;  %v3896_v16 = vmul.f32 %v9653_v51, %v9653_v51  ;;  %v9659_v8 = vpop.f32.mrb[82].mxu0 }
 0x578   :  { %v3912_v28 = vadd.f32 %v3911_v7, %v3895_v53  ;;  %v3860_v19 = vadd.f32 %v3859_v18, %v3858_v62  ;;  %v3831_v26 = vadd.f32 %v3830_v52, %v9659_v8  ;;  %v3897_v48 = vmul.f32 %v9659_v8, %v9659_v8  ;;  %v9664_v1 = vpop.f32.mrb[83].mxu0 }
 0x579   :  { %v3941_v12 = vsel %vm69_vm5, %v3896_v16, 0.0  ;;  %v3861_v5 = vsel %vm69_vm5, %v9664_v1, 0.0  ;;  %v3898_v56 = vmul.f32 %v9664_v1, %v9664_v1 }
 0x57a   :  { %v3942_v27 = vadd.f32 %v3941_v12, %v3940_v15  ;;  %v3913_v47 = vadd.f32 %v3912_v28, %v3897_v48  ;;  %v3862_v42 = vadd.f32 %v3861_v5, %v3860_v19 }
 0x57b   :  { %v3943_v25 = vsel %vm69_vm5, %v3898_v56, 0.0 }
 0x57c   :  { %v3944_v57 = vadd.f32 %v3943_v25, %v3942_v27 }
 0x57d   :  { %v9672_v43 = vpop.f32.mrb[84].mxu0 }
 0x57e   :  { %v3832_v44 = vadd.f32 %v3831_v26, %v9672_v43  ;;  %v3899_v38 = vmul.f32 %v9672_v43, %v9672_v43  ;;  %v9677_v14 = vpop.f32.mrb[85].mxu0 }
 0x57f   :  { %v3863_v49 = vsel %vm69_vm5, %v9677_v14, 0.0  ;;  %v3900_v54 = vmul.f32 %v9677_v14, %v9677_v14  ;;  %v9683_v11 = vpop.f32.mrb[86].mxu0 }
 0x580   :  { %v3914_v22 = vadd.f32 %v3913_v47, %v3899_v38  ;;  %v3864_v61 = vadd.f32 %v3863_v49, %v3862_v42  ;;  %v3833_v2 = vadd.f32 %v3832_v44, %v9683_v11  ;;  %v3901_v60 = vmul.f32 %v9683_v11, %v9683_v11  ;;  %v9688_v31 = vpop.f32.mrb[87].mxu0 }
 0x581   :  { %v3945_v50 = vsel %vm69_vm5, %v3900_v54, 0.0  ;;  %v3865_v3 = vsel %vm69_vm5, %v9688_v31, 0.0  ;;  %v3902_v7 = vmul.f32 %v9688_v31, %v9688_v31 }
 0x582   :  { %v3946_v62 = vadd.f32 %v3945_v50, %v3944_v57  ;;  %v3834_v21 = vrot.slane %v3833_v2, 4  ;;  %v3915_v15 = vadd.f32 %v3914_v22, %v3901_v60  ;;  %v3866_v52 = vadd.f32 %v3865_v3, %v3864_v61 }
 0x583   :  { %v3947_v53 = vsel %vm69_vm5, %v3902_v7, 0.0 }
 0x584   :  { %v3835_v18 = vadd.f32 %v3834_v21, %v3833_v2  ;;  %v3916_v16 = vrot.slane %v3915_v15, 4  ;;  %v3867_v28 = vrot.slane %v3866_v52, 4  ;;  %v3948_v19 = vadd.f32 %v3947_v53, %v3946_v62  ;;  %v4087_v21 = vld [vmem:[%s10568_s15 + $0x8] sm:$0xff] }
 0x586   :  { %v3836_v26 = vrot.slane %v3835_v18, 2  ;;  %v3917_v48 = vadd.f32 %v3916_v16, %v3915_v15  ;;  %v3868_v12 = vadd.f32 %v3867_v28, %v3866_v52  ;;  %v3949_v5 = vrot.slane %v3948_v19, 4  ;;  %v4089_v15 = vld [vmem:[%s10568_s15 + $0x28] sm:$0xff]  ;;  %v4086_v52 = vld [vmem:[%s10568_s15] sm:$0xff] }
 0x587   :  { %v6589_v53 = vpack.c.bf16 %v4089_v15, %v4087_v21  ;;  %v4091_v16 = vld [vmem:[%s10568_s15 + $0x48] sm:$0xff]  ;;  %v9750_v15 = vld [vmem:[#allocation2] sm:$0xff] }
 0x588   :  { %v3837_v56 = vadd.f32 %v3836_v26, %v3835_v18  ;;  %v3918_v27 = vrot.slane %v3917_v48, 2  ;;  %v3869_v47 = vrot.slane %v3868_v12, 2  ;;  %v3950_v42 = vadd.f32 %v3949_v5, %v3948_v19  ;;  %v4088_v18 = vld [vmem:[%s10568_s15 + $0x20] sm:$0xff]  ;;  %v4093_v28 = vld [vmem:[%s10568_s15 + $0x68] sm:$0xff] }
 0x589   :  { %v9720_v19 = vpack.c.bf16 %v4088_v18, %v4086_v52  ;;  %v6593_v26 = vpack.c.bf16 %v4093_v28, %v4091_v16  ;;  %6590 = vmatprep.subr.bf16.mxu1 %v6589_v53  ;;  %v7146_v21 = vld [vmem:[%s10379_s6 + $0x8] sm:$0xff]   ;;  %v7147_v52 = vld [vmem:[%s10379_s6 + $0x10] sm:$0xff]   ;;  %v7148_v53 = vld [vmem:[%s10379_s6 + $0x18] sm:$0xff]  }
 0x58a   :  { %v3838_v25 = vrot.slane %v3837_v56, 1  ;;  %v3919_v44 = vadd.f32 %v3918_v27, %v3917_v48  ;;  %v3870_v57 = vadd.f32 %v3869_v47, %v3868_v12  ;;  %v3951_v38 = vrot.slane %v3950_v42, 2  ;;  %v4090_v48 = vld [vmem:[%s10568_s15 + $0x40] sm:$0xff]  ;;  %v7150_v16 = vld [vmem:[%s10379_s6 + $0x28] sm:$0xff]   ;;  %v7151_v28 = vld [vmem:[%s10379_s6 + $0x30] sm:$0xff]  }
 0x58b   :  { %v4092_v12 = vld [vmem:[%s10568_s15 + $0x60] sm:$0xff] }
 0x58c   :  { %v3871_v49 = vrot.slane %v3870_v57, 1  ;;  %v3952_v54 = vadd.f32 %v3951_v38, %v3950_v42  ;;  %v3920_v22 = vrot.slane %v3919_v44, 1  ;;  %v3839_v2 = vadd.f32 %v3838_v25, %v3837_v56  ;;  %v7149_v18 = vld [vmem:[%s10379_s6 + $0x20] sm:$0xff]  }
 0x58d   :  { %v9729_v5 = vpack.c.bf16 %v4092_v12, %v4090_v48  ;;  %v7153_v48 = vld [vmem:[%s10379_s6 + $0x40] sm:$0xff]   ;;  %v7154_v12 = vld [vmem:[%s10379_s6 + $0x48] sm:$0xff]  }
 0x58e   :  { %v3953_v61 = vrot.slane %v3952_v54, 1  ;;  %v3921_v60 = vadd.f32 %v3920_v22, %v3919_v44  ;;  %v3872_v50 = vadd.f32 %v3871_v49, %v3870_v57 }
 0x590   :  { %v3954_v3 = vadd.f32 %v3953_v61, %v3952_v54  ;;  %v3957_v7 = vsel %vm1148_vm3, %v3839_v2, %v3921_v60  ;;  %v4067_v54 = vld [vmem:[%s10380_s12] sm:$0x1] }
 0x592   :  { %v3958_v62 = vsel %vm1148_vm3, %v3872_v50, %v3954_v3 }
 0x593   :  { %6111 = vmatprep.mubr.msk.f32.mxu1 %vm69_vm5, %v3958_v62 }
 0x594   :  { %4055 = vmatmul.mubr.f32.vlgmr.msra.gmra.mrb[60].mxu1 %v3957_v7  ;;  %v7145_v7 = vld [vmem:[%s10379_s6] sm:$0xff]  }
 0x595   :  { %4161 = vmatprep.mubr.f32.mxu1 %v7224_v36  ;;  %6592 = vmatpush1.bf16.msra.mxu1 %v9720_v19 }
 0x596   :  { %6594 = vmatprep.subr.bf16.mxu1 %v6593_v26  ;;  %v7152_v26 = vld [vmem:[%s10379_s6 + $0x38] sm:$0xff]  }
 0x599   :  { %6596 = vmatpush1.bf16.msra.mxu1 %v9729_v5 }
 0x59a   :  { %4464 = vmatprep.subr.bf16.mxu1 %v9093_v10  ;;  %v4074_v10 = vld [vmem:[%s10380_s12 + $0x1] sm:$0x1] }
 0x667   :  { %v4056_v56 = vpop.f32.mrb[60].mxu1 }
 0x668   :  { %v4060_v27 = vmul.f32 0.0012755102, %v4056_v56  ;;  %v4058_v47 = vpop.f32.mrb[61].mxu1  ;;  %v7155_v56 = vld [vmem:[%s10379_s6 + $0x50] sm:$0xff]  }
 0x669   :  { %v7157_v47 = vld [vmem:[%s10379_s6 + $0x60] sm:$0xff]  }
 0x66a   :  { %v4061_v42 = vmul.f32 %v4060_v27, %v4060_v27 }
 0x66c   :  { %v4063_v25 = vrot.slane %v4061_v42, 7  ;;  %v7158_v42 = vld [vmem:[%s10379_s6 + $0x68] sm:$0xff]  }
 0x66e   :  { %v4065_v44 = vsub.f32 %v4060_v27, %v4063_v25 }
 0x670   :  { %v4066_v57 = vmax.f32 %v4065_v44, 0.0 }
 0x672   :  { %v4068_v38 = vadd.f32 1e-05, %v4066_v57 }
 0x674   :  { %7213 = vrsqrt.f32 %v4068_v38 }
 0x67e   :  { %v7214_v49 = vpop.eup %7213 }
 0x67f   :  { %v4071_v22 = vrot.slane %v7214_v49, 1 }
 0x681   :  { %v4073_v61 = vmul.f32 %v4071_v22, %v4067_v54 }
 0x683   :  { %v4075_v2 = vmul.f32 %v4073_v61, %v4060_v27  ;;  %v4080_v50 = vrot.slane %v4073_v61, %v8362_v46  ;;  %v7156_v27 = vld [vmem:[%s10379_s6 + $0x58] sm:$0xff]  }
 0x685   :  { %v4076_v60 = vsub.f32 %v4074_v10, %v4075_v2 }
 0x687   :  { %v4084_v3 = vrot.slane %v4076_v60, %v8362_v46 }
 0x689   :  { %v4085_v62 = vsel %vm1148_vm3, %v4080_v50, %v4084_v3 }
 0x68a   :  { %6112 = vmatmul.mubr.msk.f32.vlgmr.msra.gmra.mrb[62].mxu1 %vm1394_vm4, %v4085_v62 }
 0x68b   :  { %4465 = vmatpush1.bf16.msra.mxu1 %v7145_v7 }
 0x68c   :  { %4466 = vmatprep.subr.bf16.mxu1 %v9750_v15 }
 0x68f   :  { %4467 = vmatpush1.bf16.msra.mxu1 %v7146_v21 }
 0x690   :  { %4468 = vmatprep.subr.bf16.mxu1 %v9750_v15 }
 0x693   :  { %4469 = vmatpush1.bf16.msra.mxu1 %v7147_v52 }
 0x694   :  { %4470 = vmatprep.subr.bf16.mxu1 %v9750_v15 }
 0x697   :  { %4471 = vmatpush1.bf16.msra.mxu1 %v7148_v53 }
 0x698   :  { %4472 = vmatprep.subr.bf16.mxu1 %v9750_v15 }
 0x69b   :  { %4473 = vmatpush1.bf16.msra.mxu1 %v7149_v18 }
 0x69c   :  { %4474 = vmatprep.subr.bf16.mxu1 %v9750_v15 }
 0x69f   :  { %4475 = vmatpush1.bf16.msra.mxu1 %v7150_v16 }
 0x6a0   :  { %4476 = vmatprep.subr.bf16.mxu1 %v9750_v15 }
 0x6a3   :  { %4477 = vmatpush1.bf16.msra.mxu1 %v7151_v28 }
 0x6a4   :  { %4478 = vmatprep.subr.bf16.mxu1 %v9750_v15 }
 0x6a7   :  { %4479 = vmatpush1.bf16.msra.mxu1 %v7152_v26 }
 0x6a8   :  { %4480 = vmatprep.subr.bf16.mxu1 %v9750_v15 }
 0x6ab   :  { %4481 = vmatpush1.bf16.msra.mxu1 %v7153_v48 }
 0x6ac   :  { %4482 = vmatprep.subr.bf16.mxu1 %v9750_v15 }
 0x6af   :  { %4483 = vmatpush1.bf16.msra.mxu1 %v7154_v12 }
 0x6b0   :  { %4484 = vmatprep.subr.bf16.mxu1 %v9750_v15 }
 0x6b3   :  { %4485 = vmatpush1.bf16.msra.mxu1 %v7155_v56 }
 0x6b4   :  { %4486 = vmatprep.subr.bf16.mxu1 %v9750_v15 }
 0x6b7   :  { %4487 = vmatpush1.bf16.msra.mxu1 %v7156_v27 }
 0x6b8   :  { %4488 = vmatprep.subr.bf16.mxu1 %v9750_v15 }
 0x6bb   :  { %4489 = vmatpush1.bf16.msra.mxu1 %v7157_v47 }
 0x6bc   :  { %4490 = vmatprep.subr.bf16.mxu1 %v9750_v15 }
 0x6bf   :  { %4491 = vmatpush1.bf16.msra.mxu1 %v7158_v42 }
 0x6c0   :  { %4625 = vmatprep.subr.bf16.mxu1 %v9750_v15 }
 0x75d   :  { %v4163_v25 = vpop.f32.mrb[62].mxu1 }
 0x75e   :  { %v9803_v44 = vrot.slane %v4163_v25, %v8362_v46  ;;  %v4165_v57 = vpop.f32.mrb[63].mxu1  ;;  %v9806_v38 = vrot.slane %v4163_v25, %v8467_v35 }
 0x75f   :  { %v9809_v49 = vrot.slane %v4165_v57, %v8362_v46  ;;  %v9812_v54 = vrot.slane %v4165_v57, %v8467_v35 }
 0x760   :  { %v4176_v22 = vmul.f32 %v9803_v44, %v9528_v0  ;;  %v4178_v61 = vmul.f32 %v9803_v44, %v9534_v30  ;;  %v4184_v10 = vmul.f32 %v9803_v44, %v9576_v32  ;;  %v4186_v2 = vmul.f32 %v9803_v44, %v9587_v41 }
 0x761   :  { %v4177_v60 = vmul.f32 %v9809_v49, %v9530_v29  ;;  %v4179_v50 = vmul.f32 %v9809_v49, %v9542_v24  ;;  %v4185_v3 = vmul.f32 %v9809_v49, %v9581_v9  ;;  %v4187_v0 = vmul.f32 %v9809_v49, %v9592_v20 }
 0x762   :  { %v4212_v30 = vadd.f32 %v9806_v38, %v4176_v22  ;;  %v4214_v7 = vadd.f32 %v9806_v38, %v4178_v61  ;;  %v4220_v32 = vadd.f32 %v9806_v38, %v4184_v10  ;;  %v4222_v41 = vadd.f32 %v9806_v38, %v4186_v2 }
 0x763   :  { %v4213_v62 = vadd.f32 %v9812_v54, %v4177_v60  ;;  %v4215_v29 = vadd.f32 %v9812_v54, %v4179_v50  ;;  %v4221_v24 = vadd.f32 %v9812_v54, %v4185_v3  ;;  %v4223_v21 = vadd.f32 %v9812_v54, %v4187_v0 }
 0x764   :  { %v4240_v9 = vmax.f32 %v4212_v30, 0.0  ;;  %v4242_v52 = vmax.f32 %v4214_v7, 0.0  ;;  %v4248_v53 = vmax.f32 %v4220_v32, 0.0  ;;  %v4250_v20 = vmax.f32 %v4222_v41, 0.0 }
 0x765   :  { %v4241_v18 = vmax.f32 %v4213_v62, 0.0  ;;  %v4243_v16 = vmax.f32 %v4215_v29, 0.0  ;;  %v4249_v28 = vmax.f32 %v4221_v24, 0.0  ;;  %v4251_v26 = vmax.f32 %v4223_v21, 0.0 }
 0x766   :  { %v4268_v48 = vpack.c.bf16 %v4242_v52, %v4240_v9  ;;  %v9838_v12 = vpack.c.bf16 %v4250_v20, %v4248_v53  ;;  %v4193_v56 = vmul.f32 %v9809_v49, %v9629_v17  ;;  %v4195_v27 = vmul.f32 %v9809_v49, %v9640_v55 }
 0x767   :  { %v4269_v47 = vpack.c.bf16 %v4243_v16, %v4241_v18  ;;  %v4273_v42 = vpack.c.bf16 %v4251_v26, %v4249_v28  ;;  %v4192_v25 = vmul.f32 %v9803_v44, %v9624_v59  ;;  %v4194_v57 = vmul.f32 %v9803_v44, %v9635_v33 }
 0x768   :  { %v4229_v22 = vadd.f32 %v9812_v54, %v4193_v56  ;;  %v4231_v61 = vadd.f32 %v9812_v54, %v4195_v27  ;;  %v4201_v10 = vmul.f32 %v9809_v49, %v9677_v14  ;;  %v4203_v17 = vmul.f32 %v9809_v49, %v9688_v31 }
 0x769   :  { %4283 = vst.msk [vmem:[#allocation5 + $0x8] sm:$0xff] %vm69_vm5, %v4269_v47  ;;  %4287 = vst.msk [vmem:[#allocation5 + $0x18] sm:$0xff] %vm69_vm5, %v4273_v42  ;;  %v4228_v55 = vadd.f32 %v9806_v38, %v4192_v25  ;;  %v4230_v59 = vadd.f32 %v9806_v38, %v4194_v57  ;;  %v4200_v33 = vmul.f32 %v9803_v44, %v9672_v43 }
 0x76a   :  { %v4202_v2 = vmul.f32 %v9803_v44, %v9683_v11  ;;  %v4257_v60 = vmax.f32 %v4229_v22, 0.0  ;;  %v4259_v50 = vmax.f32 %v4231_v61, 0.0  ;;  %v4237_v14 = vadd.f32 %v9812_v54, %v4201_v10 }
 0x76b   :  { %v4239_v31 = vadd.f32 %v9812_v54, %v4203_v17  ;;  %v4256_v3 = vmax.f32 %v4228_v55, 0.0  ;;  %v4258_v0 = vmax.f32 %v4230_v59, 0.0  ;;  %v4236_v30 = vadd.f32 %v9806_v38, %v4200_v33 }
 0x76c   :  { %v4238_v7 = vadd.f32 %v9806_v38, %v4202_v2  ;;  %v4277_v32 = vpack.c.bf16 %v4259_v50, %v4257_v60  ;;  %v4265_v41 = vmax.f32 %v4237_v14, 0.0  ;;  %v4181_v43 = vmul.f32 %v9809_v49, %v9557_v4  ;;  %v7159_v4 = vld [vmem:[%s10381_s5] sm:$0xff]  }
 0x76d   :  { %v4267_v62 = vmax.f32 %v4239_v31, 0.0  ;;  %v9868_v29 = vpack.c.bf16 %v4258_v0, %v4256_v3  ;;  %v4264_v11 = vmax.f32 %v4236_v30, 0.0  ;;  %v4183_v21 = vmul.f32 %v9809_v49, %v9568_v6 }
 0x76e   :  { %v4266_v24 = vmax.f32 %v4238_v7, 0.0  ;;  %4291 = vst.msk [vmem:[#allocation5 + $0x28] sm:$0xff] %vm69_vm5, %v4277_v32  ;;  %v4217_v52 = vadd.f32 %v9812_v54, %v4181_v43  ;;  %v4180_v53 = vmul.f32 %v9803_v44, %v9552_v13  ;;  %v4182_v20 = vmul.f32 %v9803_v44, %v9563_v45  ;;  %v7164_v43 = vld [vmem:[%s10381_s5 + $0x28] sm:$0xff]  }
 0x76f   :  { %v4281_v9 = vpack.c.bf16 %v4267_v62, %v4265_v41  ;;  %v4219_v16 = vadd.f32 %v9812_v54, %v4183_v21  ;;  %v4189_v6 = vmul.f32 %v9809_v49, %v9605_v40  ;;  %v4191_v28 = vmul.f32 %v9809_v49, %v9616_v34  ;;  %v7162_v41 = vld [vmem:[%s10381_s5 + $0x18] sm:$0xff]   ;;  %v7167_v21 = vld [vmem:[%s10381_s5 + $0x40] sm:$0xff]  }
 0x770   :  { %v9881_v18 = vpack.c.bf16 %v4266_v24, %v4264_v11  ;;  %v4333_v26 = vld [vmem:[#allocation5 + $0x8] sm:$0xff]  ;;  %v4245_v13 = vmax.f32 %v4217_v52, 0.0  ;;  %v4216_v45 = vadd.f32 %v9806_v38, %v4180_v53  ;;  %v4218_v56 = vadd.f32 %v9806_v38, %v4182_v20  ;;  %v4335_v25 = vld [vmem:[#allocation5 + $0x18] sm:$0xff]  ;;  %v7165_v11 = vld [vmem:[%s10381_s5 + $0x30] sm:$0xff]  }
 0x771   :  { %4295 = vst.msk [vmem:[#allocation5 + $0x38] sm:$0xff] %vm69_vm5, %v4281_v9  ;;  %v4188_v27 = vmul.f32 %v9803_v44, %v9600_v37  ;;  %6127 = vmatprep.mubr.msk.bf16.mxu1 %vm69_vm5, %v4333_v26  ;;  %v4247_v47 = vmax.f32 %v4219_v16, 0.0  ;;  %v4225_v42 = vadd.f32 %v9812_v54, %v4189_v6  ;;  %v4227_v40 = vadd.f32 %v9812_v54, %v4191_v28  ;;  %v7160_v37 = vld [vmem:[%s10381_s5 + $0x8] sm:$0xff]   ;;  %v7169_v52 = vld [vmem:[%s10381_s5 + $0x50] sm:$0xff]   ;;  %v7170_v53 = vld [vmem:[%s10381_s5 + $0x58] sm:$0xff]  }
 0x772   :  { %v4190_v34 = vmul.f32 %v9803_v44, %v9611_v39  ;;  %4497 = vmatmul.mubr.bf16.vlgmr.msra.gmra.mrb[64].mxu1 %v4268_v48  ;;  %v4244_v57 = vmax.f32 %v4216_v45, 0.0  ;;  %v4246_v22 = vmax.f32 %v4218_v56, 0.0  ;;  %v4197_v10 = vmul.f32 %v9809_v49, %v9653_v51  ;;  %v4297_v24 = vld [vmem:[#allocation4 + $0x8] sm:$0xff]  ;;  %v7171_v20 = vld [vmem:[%s10381_s5 + $0x60] sm:$0xff]   ;;  %v7175_v28 = vld [vmem:[%s10382_s7 + $0x10] sm:$0xff]  }
 0x773   :  { %v4224_v61 = vadd.f32 %v9806_v38, %v4188_v27  ;;  %4626 = vmatpush1.bf16.msra.mxu1 %v7159_v4  ;;  %6128 = vmatprep.mubr.msk.bf16.mxu1 %vm69_vm5, %v4335_v25  ;;  %v4271_v17 = vpack.c.bf16 %v4247_v47, %v4245_v13  ;;  %v4253_v55 = vmax.f32 %v4225_v42, 0.0  ;;  %v4255_v59 = vmax.f32 %v4227_v40, 0.0  ;;  %v7168_v9 = vld [vmem:[%s10381_s5 + $0x48] sm:$0xff]   ;;  %v7176_v13 = vld [vmem:[%s10382_s7 + $0x18] sm:$0xff]   ;;  %v7177_v45 = vld [vmem:[%s10382_s7 + $0x20] sm:$0xff]  }
 0x774   :  { %v4226_v39 = vadd.f32 %v9806_v38, %v4190_v34  ;;  %4627 = vmatprep.subr.bf16.mxu1 %v9750_v15  ;;  %v9907_v48 = vpack.c.bf16 %v4246_v22, %v4244_v57  ;;  %v4199_v51 = vmul.f32 %v9809_v49, %v9664_v1  ;;  %v4233_v2 = vadd.f32 %v9812_v54, %v4197_v10  ;;  %v7161_v1 = vld [vmem:[%s10381_s5 + $0x10] sm:$0xff]   ;;  %v7172_v4 = vld [vmem:[%s10381_s5 + $0x68] sm:$0xff]   ;;  %v7180_v42 = vld [vmem:[%s10382_s7 + $0x38] sm:$0xff]  }
 0x775   :  { %v4252_v33 = vmax.f32 %v4224_v61, 0.0  ;;  %4285 = vst.msk [vmem:[#allocation4 + $0x18] sm:$0xff] %vm69_vm5, %v4271_v17  ;;  %v4275_v60 = vpack.c.bf16 %v4255_v59, %v4253_v55  ;;  %v4196_v14 = vmul.f32 %v9803_v44, %v9648_v23  ;;  %v4198_v31 = vmul.f32 %v9803_v44, %v9659_v8  ;;  %v7174_v6 = vld [vmem:[%s10382_s7 + $0x8] sm:$0xff]   ;;  %v7179_v47 = vld [vmem:[%s10382_s7 + $0x30] sm:$0xff]   ;;  %v7181_v40 = vld [vmem:[%s10382_s7 + $0x40] sm:$0xff]  }
 0x776   :  { %v4254_v50 = vmax.f32 %v4226_v39, 0.0  ;;  %v4235_v3 = vadd.f32 %v9812_v54, %v4199_v51  ;;  %v4261_v0 = vmax.f32 %v4233_v2, 0.0  ;;  %v4337_v54 = vld [vmem:[#allocation5 + $0x28] sm:$0xff]  ;;  %v7178_v27 = vld [vmem:[%s10382_s7 + $0x28] sm:$0xff]   ;;  %v7183_v25 = vld [vmem:[%s10382_s7 + $0x50] sm:$0xff]  }
 0x777   :  { %4628 = vmatpush1.bf16.msra.mxu1 %v7160_v37  ;;  %4289 = vst.msk [vmem:[#allocation4 + $0x28] sm:$0xff] %vm69_vm5, %v4275_v60  ;;  %v4232_v30 = vadd.f32 %v9806_v38, %v4196_v14  ;;  %v4234_v7 = vadd.f32 %v9806_v38, %v4198_v31  ;;  %v7163_v38 = vld [vmem:[%s10381_s5 + $0x20] sm:$0xff]   ;;  %v7182_v34 = vld [vmem:[%s10382_s7 + $0x48] sm:$0xff]   ;;  %v7184_v57 = vld [vmem:[%s10382_s7 + $0x58] sm:$0xff]  }
 0x778   :  { %v9922_v49 = vpack.c.bf16 %v4254_v50, %v4252_v33  ;;  %4629 = vmatprep.subr.bf16.mxu1 %v9750_v15  ;;  %v4263_v23 = vmax.f32 %v4235_v3, 0.0  ;;  %v7185_v22 = vld [vmem:[%s10382_s7 + $0x60] sm:$0xff]   ;;  %v7186_v61 = vld [vmem:[%s10382_s7 + $0x68] sm:$0xff]   ;;  %v4934_v59 = vld [vmem:[%s10485_s20 + $0x10] sm:$0xff] }
 0x779   :  { %v4260_v8 = vmax.f32 %v4232_v30, 0.0  ;;  %v4262_v44 = vmax.f32 %v4234_v7, 0.0  ;;  %v4697_v10 = vld [vmem:[#allocation4 + $0x48] sm:$0xff]  ;;  %v4932_v37 = vld [vmem:[%s10485_s20] sm:$0xff]  ;;  %v4938_v2 = vld [vmem:[%s10485_s20 + $0x30] sm:$0xff] }
 0x77a   :  { %4505 = vmatmul.mubr.bf16.gmra.mrb[68].mxu1 %v9838_v12  ;;  %v4279_v32 = vpack.c.bf16 %v4263_v23, %v4261_v0  ;;  %v4339_v12 = vld [vmem:[#allocation5 + $0x38] sm:$0xff]  ;;  %v4939_v60 = vld [vmem:[%s10485_s20 + $0x38] sm:$0xff]  ;;  %v4940_v14 = vld [vmem:[%s10485_s20 + $0x40] sm:$0xff] }
 0x77b   :  { %4630 = vmatpush1.bf16.msra.mxu1 %v7161_v1  ;;  %6129 = vmatprep.mubr.msk.bf16.mxu1 %vm69_vm5, %v4337_v54  ;;  %v9932_v62 = vpack.c.bf16 %v4262_v44, %v4260_v8  ;;  %v4933_v17 = vld [vmem:[%s10485_s20 + $0x8] sm:$0xff]  ;;  %v10088_v50 = vpack.c.bf16 %v4939_v60, %v4938_v2  ;;  %v4942_v3 = vld [vmem:[%s10485_s20 + $0x50] sm:$0xff]  ;;  %v4943_v1 = vld [vmem:[%s10485_s20 + $0x58] sm:$0xff] }
 0x77c   :  { %4631 = vmatprep.subr.bf16.mxu1 %v9750_v15  ;;  %4293 = vst.msk [vmem:[#allocation4 + $0x38] sm:$0xff] %vm69_vm5, %v4279_v32  ;;  %v4299_v16 = vld [vmem:[#allocation4 + $0x18] sm:$0xff]  ;;  %v10058_v55 = vpack.c.bf16 %v4933_v17, %v4932_v37  ;;  %v4937_v33 = vld [vmem:[%s10485_s20 + $0x28] sm:$0xff]  ;;  %v4944_v30 = vld [vmem:[%s10485_s20 + $0x60] sm:$0xff] }
 0x77d   :  { %v4941_v31 = vld [vmem:[%s10485_s20 + $0x48] sm:$0xff]  ;;  %v4946_v8 = vld [vmem:[%s10485_s20 + $0x70] sm:$0xff]  ;;  %v4947_v44 = vld [vmem:[%s10485_s20 + $0x78] sm:$0xff] }
 0x77e   :  { %v4301_v26 = vld [vmem:[#allocation4 + $0x28] sm:$0xff]  ;;  %v6610_v0 = vpack.c.bf16 %v4941_v31, %v4940_v14  ;;  %v6619_v54 = vpack.c.bf16 %v4947_v44, %v4946_v8  ;;  %v7187_v44 = vld [vmem:[%s10383_s9] sm:$0xff]  }
 0x77f   :  { %4632 = vmatpush1.bf16.msra.mxu1 %v7162_v41  ;;  %v4945_v7 = vld [vmem:[%s10485_s20 + $0x68] sm:$0xff] }
 0x780   :  { %4633 = vmatprep.subr.bf16.mxu1 %v9750_v15  ;;  %v6616_v23 = vpack.c.bf16 %v4945_v7, %v4944_v30 }
 0x782   :  { %4513 = vmatmul.mubr.bf16.gmra.mrb[72].mxu1 %v9868_v29  ;;  %v7166_v29 = vld [vmem:[%s10381_s5 + $0x38] sm:$0xff]  }
 0x783   :  { %4634 = vmatpush1.bf16.msra.mxu1 %v7163_v38  ;;  %6130 = vmatprep.mubr.msk.bf16.mxu1 %vm69_vm5, %v4339_v12  ;;  %v4303_v56 = vld [vmem:[#allocation4 + $0x38] sm:$0xff] }
 0x784   :  { %4635 = vmatprep.subr.bf16.mxu1 %v9750_v15 }
 0x787   :  { %4636 = vmatpush1.bf16.msra.mxu1 %v7164_v43 }
 0x788   :  { %4637 = vmatprep.subr.bf16.mxu1 %v9750_v15 }
 0x78a   :  { %4521 = vmatmul.mubr.bf16.gmra.mrb[76].mxu1 %v9881_v18  ;;  %v7173_v18 = vld [vmem:[%s10382_s7] sm:$0xff]  }
 0x78b   :  { %4638 = vmatpush1.bf16.msra.mxu1 %v7165_v11  ;;  %6145 = vmatprep.mubr.msk.bf16.mxu1 %vm69_vm5, %v4297_v24 }
 0x78c   :  { %4639 = vmatprep.subr.bf16.mxu1 %v9750_v15 }
 0x78f   :  { %4640 = vmatpush1.bf16.msra.mxu1 %v7166_v29 }
 0x790   :  { %4641 = vmatprep.subr.bf16.mxu1 %v9750_v15 }
 0x793   :  { %4642 = vmatpush1.bf16.msra.mxu1 %v7167_v21 }
 0x794   :  { %4643 = vmatprep.subr.bf16.mxu1 %v9750_v15 }
 0x797   :  { %4644 = vmatpush1.bf16.msra.mxu1 %v7168_v9 }
 0x798   :  { %4645 = vmatprep.subr.bf16.mxu1 %v9750_v15 }
 0x79b   :  { %4646 = vmatpush1.bf16.msra.mxu1 %v7169_v52 }
 0x79c   :  { %4647 = vmatprep.subr.bf16.mxu1 %v9750_v15 }
 0x79f   :  { %4648 = vmatpush1.bf16.msra.mxu1 %v7170_v53 }
 0x7a0   :  { %4649 = vmatprep.subr.bf16.mxu1 %v9750_v15 }
 0x7a3   :  { %4650 = vmatpush1.bf16.msra.mxu1 %v7171_v20 }
 0x7a4   :  { %4651 = vmatprep.subr.bf16.mxu1 %v9750_v15 }
 0x7a7   :  { %4652 = vmatpush1.bf16.msra.mxu1 %v7172_v4 }
 0x7a8   :  { %4822 = vmatprep.subr.bf16.mxu1 %v9750_v15 }
 0x7aa   :  { %4658 = vmatmul.mubr.bf16.vlgmr.msra.gmra.mrb[64].mxu1 %v9750_v15 }
 0x7ab   :  { %6146 = vmatprep.mubr.msk.bf16.mxu1 %vm69_vm5, %v4299_v16  ;;  %4823 = vmatpush1.bf16.msra.mxu1 %v7173_v18 }
 0x7ac   :  { %4824 = vmatprep.subr.bf16.mxu1 %v9750_v15 }
 0x7af   :  { %4825 = vmatpush1.bf16.msra.mxu1 %v7174_v6 }
 0x7b0   :  { %4826 = vmatprep.subr.bf16.mxu1 %v9750_v15 }
 0x7b2   :  { %4666 = vmatmul.mubr.bf16.gmra.mrb[68].mxu1 %v9907_v48 }
 0x7b3   :  { %6147 = vmatprep.mubr.msk.bf16.mxu1 %vm69_vm5, %v4301_v26  ;;  %4827 = vmatpush1.bf16.msra.mxu1 %v7175_v28 }
 0x7b4   :  { %4828 = vmatprep.subr.bf16.mxu1 %v9750_v15 }
 0x7b7   :  { %4829 = vmatpush1.bf16.msra.mxu1 %v7176_v13 }
 0x7b8   :  { %4830 = vmatprep.subr.bf16.mxu1 %v9750_v15 }
 0x7ba   :  { %4674 = vmatmul.mubr.bf16.gmra.mrb[72].mxu1 %v9922_v49 }
 0x7bb   :  { %6148 = vmatprep.mubr.msk.bf16.mxu1 %vm69_vm5, %v4303_v56  ;;  %4831 = vmatpush1.bf16.msra.mxu1 %v7177_v45 }
 0x7bc   :  { %4832 = vmatprep.subr.bf16.mxu1 %v9750_v15 }
 0x7bf   :  { %4833 = vmatpush1.bf16.msra.mxu1 %v7178_v27 }
 0x7c0   :  { %4834 = vmatprep.subr.bf16.mxu1 %v9750_v15 }
 0x7c2   :  { %4682 = vmatmul.mubr.bf16.gmra.mrb[76].mxu1 %v9932_v62 }
 0x7c3   :  { %4835 = vmatpush1.bf16.msra.mxu1 %v7179_v47  ;;  %6163 = vmatprep.mubr.msk.bf16.mxu1 %vm69_vm5, %v4299_v16 }
 0x7c4   :  { %4836 = vmatprep.subr.bf16.mxu1 %v9750_v15 }
 0x7c7   :  { %4837 = vmatpush1.bf16.msra.mxu1 %v7180_v42 }
 0x7c8   :  { %4838 = vmatprep.subr.bf16.mxu1 %v9750_v15 }
 0x7cb   :  { %4839 = vmatpush1.bf16.msra.mxu1 %v7181_v40 }
 0x7cc   :  { %4840 = vmatprep.subr.bf16.mxu1 %v9750_v15 }
 0x7cf   :  { %4841 = vmatpush1.bf16.msra.mxu1 %v7182_v34 }
 0x7d0   :  { %4842 = vmatprep.subr.bf16.mxu1 %v9750_v15 }
 0x7d3   :  { %4843 = vmatpush1.bf16.msra.mxu1 %v7183_v25 }
 0x7d4   :  { %4844 = vmatprep.subr.bf16.mxu1 %v9750_v15 }
 0x7d7   :  { %4845 = vmatpush1.bf16.msra.mxu1 %v7184_v57 }
 0x7d8   :  { %4846 = vmatprep.subr.bf16.mxu1 %v9750_v15 }
 0x7db   :  { %4847 = vmatpush1.bf16.msra.mxu1 %v7185_v22 }
 0x7dc   :  { %4848 = vmatprep.subr.bf16.mxu1 %v9750_v15 }
 0x7df   :  { %4849 = vmatpush1.bf16.msra.mxu1 %v7186_v61 }
 0x7e0   :  { %6597 = vmatprep.subr.bf16.mxu1 %v10569_v63 }
 0x7e2   :  { %4855 = vmatmul.mubr.bf16.vlgmr.msra.gmra.mrb[64].mxu1 %v9907_v48  ;;  %v4936_v48 = vld [vmem:[%s10485_s20 + $0x20] sm:$0xff] }
 0x7e3   :  { %6164 = vmatprep.mubr.msk.bf16.mxu1 %vm69_vm5, %v4301_v26  ;;  %6599 = vmatpush3.bf16.msra.mxu1 %v10058_v55  ;;  %v10077_v51 = vpack.c.bf16 %v4937_v33, %v4936_v48 }
 0x7e4   :  { %6600 = vmatprep.subr.bf16.mxu1 %v10569_v63 }
 0x7ea   :  { %4863 = vmatmul.mubr.bf16.gmra.mrb[68].mxu1 %v9922_v49  ;;  %v6613_v49 = vpack.c.bf16 %v4943_v1, %v4942_v3 }
 0x7eb   :  { %6165 = vmatprep.mubr.msk.bf16.mxu1 %vm69_vm5, %v4303_v56 }
 0x7f2   :  { %4871 = vmatmul.mubr.bf16.gmra.mrb[72].mxu1 %v9932_v62 }
 0x7f3   :  { %6166 = vmatprep.mubr.msk.bf16.mxu1 %vm69_vm5, %v4697_v10 }
 0x7fa   :  { %4879 = vmatmul.mubr.bf16.gmra.mrb[76].mxu1 %v9750_v15  ;;  %v4935_v15 = vld [vmem:[%s10485_s20 + $0x18] sm:$0xff] }
 0x7fb   :  { %v10068_v39 = vpack.c.bf16 %v4935_v15, %v4934_v59  ;;  %6340 = vmatprep.mubr.msk.f32.mxu1 %vm7225_vm6, %v7224_v36 }
 0x7fd   :  { %6602 = vmatpush3.bf16.msra.mxu1 %v10068_v39 }
 0x7fe   :  { %6603 = vmatprep.subr.bf16.mxu1 %v10569_v63 }
 0x801   :  { %6605 = vmatpush3.bf16.msra.mxu1 %v10077_v51 }
 0x802   :  { %6606 = vmatprep.subr.bf16.mxu1 %v10569_v63 }
 0x805   :  { %6608 = vmatpush3.bf16.msra.mxu1 %v10088_v50 }
 0x806   :  { %6609 = vmatprep.subr.bf16.mxu1 %v10569_v63 }
 0x809   :  { %6611 = vmatpush3.bf16.msra.mxu1 %v6610_v0 }
 0x80a   :  { %6612 = vmatprep.subr.bf16.mxu1 %v10569_v63 }
 0x80d   :  { %6614 = vmatpush3.bf16.msra.mxu1 %v6613_v49 }
 0x80e   :  { %6615 = vmatprep.subr.bf16.mxu1 %v10569_v63 }
 0x811   :  { %6617 = vmatpush3.bf16.msra.mxu1 %v6616_v23 }
 0x812   :  { %6618 = vmatprep.subr.bf16.mxu1 %v10569_v63 }
 0x815   :  { %6620 = vmatpush3.bf16.msra.mxu1 %v6619_v54 }
 0x816   :  { %6621 = vmatprep.subr.bf16.mxu1 %v10569_v63 }
 0x8b5   :  { %v10122_v32 = vpop.f32.mrb[64].mxu1 }
 0x8b6   :  { %v4858_v41 = vpop.f32.mrb[65].mxu1  ;;  %v4909_v38 = vmul.f32 %v10122_v32, %v10122_v32 }
 0x8b7   :  { %v10124_v62 = vpop.f32.mrb[66].mxu1 }
 0x8b8   :  { %v4895_v12 = vadd.f32 %v10124_v62, %v10122_v32  ;;  %v4910_v43 = vmul.f32 %v10124_v62, %v10124_v62  ;;  %v4861_v11 = vpop.f32.mrb[67].mxu1 }
 0x8ba   :  { %v4917_v24 = vadd.f32 %v4910_v43, %v4909_v38 }
 0x8bd   :  { %v10132_v29 = vpop.f32.mrb[68].mxu1 }
 0x8be   :  { %v4896_v21 = vadd.f32 %v4895_v12, %v10132_v29  ;;  %v4911_v9 = vmul.f32 %v10132_v29, %v10132_v29  ;;  %v4866_v52 = vpop.f32.mrb[69].mxu1 }
 0x8bf   :  { %v10137_v53 = vpop.f32.mrb[70].mxu1 }
 0x8c0   :  { %v4918_v20 = vadd.f32 %v4917_v24, %v4911_v9  ;;  %v4897_v4 = vadd.f32 %v4896_v21, %v10137_v53  ;;  %v4912_v18 = vmul.f32 %v10137_v53, %v10137_v53  ;;  %v4869_v16 = vpop.f32.mrb[71].mxu1  ;;  %v5025_v9 = vld [vmem:[%s10384_s13] sm:$0x1] }
 0x8c2   :  { %v4919_v6 = vadd.f32 %v4918_v20, %v4912_v18  ;;  %v5032_v20 = vld [vmem:[%s10384_s13 + $0x1] sm:$0x1] }
 0x8c5   :  { %v10142_v28 = vpop.f32.mrb[72].mxu1 }
 0x8c6   :  { %v4898_v26 = vadd.f32 %v4897_v4, %v10142_v28  ;;  %v4913_v13 = vmul.f32 %v10142_v28, %v10142_v28  ;;  %v4874_v45 = vpop.f32.mrb[73].mxu1 }
 0x8c7   :  { %v10147_v56 = vpop.f32.mrb[74].mxu1  ;;  %v7189_v45 = vld [vmem:[%s10383_s9 + $0x10] sm:$0xff]  }
 0x8c8   :  { %v4920_v27 = vadd.f32 %v4919_v6, %v4913_v13  ;;  %v4899_v47 = vadd.f32 %v4898_v26, %v10147_v56  ;;  %v4914_v42 = vmul.f32 %v10147_v56, %v10147_v56  ;;  %v4877_v40 = vpop.f32.mrb[75].mxu1  ;;  %v7188_v26 = vld [vmem:[%s10383_s9 + $0x8] sm:$0xff]  }
 0x8c9   :  { %v7193_v40 = vld [vmem:[%s10383_s9 + $0x30] sm:$0xff]  }
 0x8ca   :  { %v4921_v34 = vadd.f32 %v4920_v27, %v4914_v42  ;;  %v7190_v27 = vld [vmem:[%s10383_s9 + $0x18] sm:$0xff]   ;;  %v7192_v42 = vld [vmem:[%s10383_s9 + $0x28] sm:$0xff]  }
 0x8cd   :  { %v10152_v25 = vpop.f32.mrb[76].mxu1 }
 0x8ce   :  { %v4900_v57 = vadd.f32 %v4899_v47, %v10152_v25  ;;  %v4915_v22 = vmul.f32 %v10152_v25, %v10152_v25  ;;  %v4882_v61 = vpop.f32.mrb[77].mxu1  ;;  %v7191_v47 = vld [vmem:[%s10383_s9 + $0x20] sm:$0xff]  }
 0x8cf   :  { %v10157_v10 = vpop.f32.mrb[78].mxu1 }
 0x8d0   :  { %v4922_v37 = vadd.f32 %v4921_v34, %v4915_v22  ;;  %v4901_v17 = vadd.f32 %v4900_v57, %v10157_v10  ;;  %v4916_v59 = vmul.f32 %v10157_v10, %v10157_v10  ;;  %v4885_v15 = vpop.f32.mrb[79].mxu1  ;;  %v7194_v34 = vld [vmem:[%s10383_s9 + $0x38] sm:$0xff]   ;;  %v7195_v57 = vld [vmem:[%s10385_s8] sm:$0xff]  }
 0x8d2   :  { %v4902_v48 = vrot.slane %v4901_v17, 4  ;;  %v4923_v33 = vadd.f32 %v4922_v37, %v4916_v59 }
 0x8d4   :  { %v4903_v2 = vadd.f32 %v4902_v48, %v4901_v17  ;;  %v4924_v60 = vrot.slane %v4923_v33, 4 }
 0x8d6   :  { %v4904_v14 = vrot.slane %v4903_v2, 2  ;;  %v4925_v31 = vadd.f32 %v4924_v60, %v4923_v33 }
 0x8d8   :  { %v4905_v3 = vadd.f32 %v4904_v14, %v4903_v2  ;;  %v4926_v0 = vrot.slane %v4925_v31, 2 }
 0x8da   :  { %v4906_v1 = vrot.slane %v4905_v3, 1  ;;  %v4927_v49 = vadd.f32 %v4926_v0, %v4925_v31 }
 0x8dc   :  { %v4928_v30 = vrot.slane %v4927_v49, 1  ;;  %v4907_v7 = vadd.f32 %v4906_v1, %v4905_v3 }
 0x8de   :  { %v4929_v23 = vadd.f32 %v4928_v30, %v4927_v49 }
 0x8e0   :  { %v4931_v8 = vsel %vm1148_vm3, %v4907_v7, %v4929_v23 }
 0x8e1   :  { %6341 = vmatmul.mubr.f32.vlgmr.msra.gmra.mrb[80].mxu1 %v4931_v8 }
 0x8e2   :  { %6623 = vmatpush3.bf16.msra.mxu1 %v9720_v19  ;;  %6351 = vmatprep.mubr.msk.f32.mxu1 %vm7225_vm6, %v7224_v36 }
 0x8e3   :  { %6624 = vmatprep.subr.bf16.mxu1 %v10569_v63 }
 0x8e6   :  { %6626 = vmatpush3.bf16.msra.mxu1 %v9729_v5 }
 0x8e7   :  { %6354 = vmatprep.subr.bf16.mxu1 %v7187_v44 }
 0x9b4   :  { %v5014_v54 = vpop.f32.mrb[80].mxu1 }
 0x9b5   :  { %v5018_v41 = vmul.f32 0.00390625, %v5014_v54  ;;  %v6342_v38 = vpop.f32.mrb[81].mxu1 }
 0x9b7   :  { %v5019_v12 = vmul.f32 %v5018_v41, %v5018_v41 }
 0x9b9   :  { %v5021_v43 = vrot.slane %v5019_v12, 7 }
 0x9bb   :  { %v5023_v11 = vsub.f32 %v5018_v41, %v5021_v43  ;;  %v7221_v43 = vld [vmem:[#allocation2] sm:$0xff] }
 0x9bd   :  { %v5024_v24 = vmax.f32 %v5023_v11, 0.0  ;;  %v7197_v11 = vld [vmem:[%s10385_s8 + $0x10] sm:$0xff]  }
 0x9bf   :  { %v5026_v19 = vadd.f32 1e-05, %v5024_v24  ;;  %v7198_v24 = vld [vmem:[%s10385_s8 + $0x18] sm:$0xff]  }
 0x9c1   :  { %7215 = vrsqrt.f32 %v5026_v19  ;;  %v7199_v19 = vld [vmem:[%s10385_s8 + $0x20] sm:$0xff]  }
 0x9cb   :  { %v7216_v21 = vpop.eup %7215 }
 0x9cc   :  { %v5029_v5 = vrot.slane %v7216_v21, 1  ;;  %v7200_v21 = vld [vmem:[%s10385_s8 + $0x28] sm:$0xff]  }
 0x9ce   :  { %v5031_v52 = vmul.f32 %v5029_v5, %v5025_v9  ;;  %v7201_v9 = vld [vmem:[%s10385_s8 + $0x30] sm:$0xff]   ;;  %v7202_v5 = vld [vmem:[%s10385_s8 + $0x38] sm:$0xff]  }
 0x9d0   :  { %v5033_v4 = vmul.f32 %v5031_v52, %v5018_v41  ;;  %v5038_v16 = vrot.slane %v5031_v52, %v8362_v46  ;;  %v7203_v52 = vld [vmem:[%s10386_s10] sm:$0xff]  }
 0x9d2   :  { %v5034_v18 = vsub.f32 %v5032_v20, %v5033_v4  ;;  %v7204_v20 = vld [vmem:[%s10386_s10 + $0x8] sm:$0xff]   ;;  %v7205_v4 = vld [vmem:[%s10386_s10 + $0x10] sm:$0xff]  }
 0x9d4   :  { %v5042_v6 = vrot.slane %v5034_v18, %v8362_v46  ;;  %v7206_v18 = vld [vmem:[%s10386_s10 + $0x18] sm:$0xff]  }
 0x9d6   :  { %v5043_v13 = vsel %vm1148_vm3, %v5038_v16, %v5042_v6  ;;  %v7207_v16 = vld [vmem:[%s10386_s10 + $0x20] sm:$0xff]   ;;  %v7208_v6 = vld [vmem:[%s10386_s10 + $0x28] sm:$0xff]  }
 0x9d7   :  { %6352 = vmatmul.mubr.msk.f32.vlgmr.msra.gmra.mrb[82].mxu1 %vm1394_vm4, %v5043_v13  ;;  %v7210_v13 = vld [vmem:[%s10386_s10 + $0x38] sm:$0xff]  }
 0x9d8   :  { %6355 = vmatpush3.bf16.msra.mxu1 %v7187_v44 }
 0x9d9   :  { %6356 = vmatprep.subr.bf16.mxu1 %v7188_v26 }
 0x9dc   :  { %6357 = vmatpush3.bf16.msra.mxu1 %v7188_v26  ;;  %v7209_v26 = vld [vmem:[%s10386_s10 + $0x30] sm:$0xff]  }
 0x9dd   :  { %6358 = vmatprep.subr.bf16.mxu1 %v7189_v45 }
 0x9e0   :  { %6359 = vmatpush3.bf16.msra.mxu1 %v7189_v45 }
 0x9e1   :  { %6360 = vmatprep.subr.bf16.mxu1 %v7190_v27 }
 0x9e4   :  { %6361 = vmatpush3.bf16.msra.mxu1 %v7190_v27 }
 0x9e5   :  { %6362 = vmatprep.subr.bf16.mxu1 %v7191_v47 }
 0x9e8   :  { %6363 = vmatpush3.bf16.msra.mxu1 %v7191_v47 }
 0x9e9   :  { %6364 = vmatprep.subr.bf16.mxu1 %v7192_v42 }
 0x9ec   :  { %6365 = vmatpush3.bf16.msra.mxu1 %v7192_v42 }
 0x9ed   :  { %6366 = vmatprep.subr.bf16.mxu1 %v7193_v40 }
 0x9f0   :  { %6367 = vmatpush3.bf16.msra.mxu1 %v7193_v40 }
 0x9f1   :  { %6368 = vmatprep.subr.bf16.mxu1 %v7194_v34 }
 0x9f4   :  { %6369 = vmatpush3.bf16.msra.mxu1 %v7194_v34 }
 0x9f5   :  { %6374 = vmatprep.subr.bf16.mxu1 %v7195_v57 }
 0xaaa   :  { %v5117_v22 = vpop.f32.mrb[82].mxu1 }
 0xaab   :  { %v5124_v61 = vrot.slane %v5117_v22, %v8362_v46  ;;  %v6353_v37 = vpop.f32.mrb[83].mxu1  ;;  %v5136_v17 = vrot.slane %v5117_v22, %v8467_v35 }
 0xaad   :  { %v5125_v59 = vmul.f32 %v5124_v61, %v10122_v32  ;;  %v5126_v15 = vmul.f32 %v5124_v61, %v10124_v62  ;;  %v5129_v48 = vmul.f32 %v5124_v61, %v10142_v28  ;;  %v5130_v33 = vmul.f32 %v5124_v61, %v10147_v56 }
 0xaae   :  { %v5127_v2 = vmul.f32 %v5124_v61, %v10132_v29  ;;  %v5128_v60 = vmul.f32 %v5124_v61, %v10137_v53  ;;  %v5131_v14 = vmul.f32 %v5124_v61, %v10152_v25  ;;  %v5132_v31 = vmul.f32 %v5124_v61, %v10157_v10  ;;  %v7196_v10 = vld [vmem:[%s10385_s8 + $0x8] sm:$0xff]  }
 0xaaf   :  { %v5137_v3 = vadd.f32 %v5136_v17, %v5125_v59  ;;  %v5138_v0 = vadd.f32 %v5136_v17, %v5126_v15  ;;  %v5141_v1 = vadd.f32 %v5136_v17, %v5129_v48  ;;  %v5142_v49 = vadd.f32 %v5136_v17, %v5130_v33 }
 0xab0   :  { %v5139_v30 = vadd.f32 %v5136_v17, %v5127_v2  ;;  %v5140_v32 = vadd.f32 %v5136_v17, %v5128_v60  ;;  %v5143_v7 = vadd.f32 %v5136_v17, %v5131_v14  ;;  %v5144_v62 = vadd.f32 %v5136_v17, %v5132_v31 }
 0xab1   :  { %v5145_v23 = vmax.f32 %v5137_v3, 0.0  ;;  %v5146_v28 = vmax.f32 %v5138_v0, 0.0  ;;  %v5149_v8 = vmax.f32 %v5141_v1, 0.0  ;;  %v5150_v56 = vmax.f32 %v5142_v49, 0.0 }
 0xab2   :  { %v5147_v44 = vmax.f32 %v5139_v30, 0.0  ;;  %v5148_v29 = vmax.f32 %v5140_v32, 0.0  ;;  %v5151_v54 = vmax.f32 %v5143_v7, 0.0  ;;  %v5152_v53 = vmax.f32 %v5144_v62, 0.0 }
 0xab3   :  { %v5153_v41 = vpack.c.bf16 %v5146_v28, %v5145_v23  ;;  %v5155_v25 = vpack.c.bf16 %v5150_v56, %v5149_v8 }
 0xab4   :  { %v5154_v38 = vpack.c.bf16 %v5148_v29, %v5147_v44  ;;  %v5156_v12 = vpack.c.bf16 %v5152_v53, %v5151_v54  ;;  %v5650_v44 = vld [vmem:[%s10568_s15] sm:$0xff] }
 0xab5   :  { %6370 = vmatprep.mubr.bf16.mxu1 %v5153_v41  ;;  %v5651_v29 = vld [vmem:[%s10568_s15 + $0x20] sm:$0xff] }
 0xab6   :  { %6371 = vmatmul.mubr.bf16.vlgmr.msra.gmra.mrb[84].mxu1 %v5155_v25  ;;  %v5652_v54 = vld [vmem:[%s10568_s15 + $0x40] sm:$0xff]  ;;  %v6640_v53 = vpack.c.bf16 %v5651_v29, %v5650_v44 }
 0xab7   :  { %6375 = vmatpush3.bf16.msra.mxu1 %v7195_v57  ;;  %6390 = vmatprep.mubr.bf16.mxu1 %v7221_v43  ;;  %v5653_v41 = vld [vmem:[%s10568_s15 + $0x60] sm:$0xff] }
 0xab8   :  { %6376 = vmatprep.subr.bf16.mxu1 %v7196_v10  ;;  %v6643_v25 = vpack.c.bf16 %v5653_v41, %v5652_v54 }
 0xabb   :  { %6377 = vmatpush3.bf16.msra.mxu1 %v7196_v10  ;;  %v5750_v10 = vld [vmem:[%s10387_s17 + $0x8] sm:$0xff] }
 0xabc   :  { %6378 = vmatprep.subr.bf16.mxu1 %v7197_v11 }
 0xabf   :  { %6379 = vmatpush3.bf16.msra.mxu1 %v7197_v11 }
 0xac0   :  { %6380 = vmatprep.subr.bf16.mxu1 %v7198_v24 }
 0xac3   :  { %6381 = vmatpush3.bf16.msra.mxu1 %v7198_v24 }
 0xac4   :  { %6382 = vmatprep.subr.bf16.mxu1 %v7199_v19 }
 0xac7   :  { %6383 = vmatpush3.bf16.msra.mxu1 %v7199_v19 }
 0xac8   :  { %6384 = vmatprep.subr.bf16.mxu1 %v7200_v21 }
 0xacb   :  { %6385 = vmatpush3.bf16.msra.mxu1 %v7200_v21 }
 0xacc   :  { %6386 = vmatprep.subr.bf16.mxu1 %v7201_v9 }
 0xacf   :  { %6387 = vmatpush3.bf16.msra.mxu1 %v7201_v9 }
 0xad0   :  { %6388 = vmatprep.subr.bf16.mxu1 %v7202_v5 }
 0xad3   :  { %6389 = vmatpush3.bf16.msra.mxu1 %v7202_v5 }
 0xad4   :  { %6394 = vmatprep.subr.bf16.mxu1 %v7203_v52 }
 0xad6   :  { %6391 = vmatmul.mubr.bf16.vlgmr.msra.gmra.mrb[84].mxu1 %v5154_v38 }
 0xad7   :  { %6395 = vmatpush3.bf16.msra.mxu1 %v7203_v52  ;;  %6410 = vmatprep.mubr.bf16.mxu1 %v5154_v38  ;;  %v5631_v52 = vld [vmem:[%s10388_s14] sm:$0x1] }
 0xad8   :  { %6396 = vmatprep.subr.bf16.mxu1 %v7204_v20 }
 0xadb   :  { %6397 = vmatpush3.bf16.msra.mxu1 %v7204_v20 }
 0xadc   :  { %6398 = vmatprep.subr.bf16.mxu1 %v7205_v4 }
 0xadf   :  { %6399 = vmatpush3.bf16.msra.mxu1 %v7205_v4 }
 0xae0   :  { %6400 = vmatprep.subr.bf16.mxu1 %v7206_v18 }
 0xae3   :  { %6401 = vmatpush3.bf16.msra.mxu1 %v7206_v18  ;;  %v5638_v18 = vld [vmem:[%s10388_s14 + $0x1] sm:$0x1] }
 0xae4   :  { %6402 = vmatprep.subr.bf16.mxu1 %v7207_v16 }
 0xae7   :  { %6403 = vmatpush3.bf16.msra.mxu1 %v7207_v16 }
 0xae8   :  { %6404 = vmatprep.subr.bf16.mxu1 %v7208_v6 }
 0xaeb   :  { %6405 = vmatpush3.bf16.msra.mxu1 %v7208_v6 }
 0xaec   :  { %6406 = vmatprep.subr.bf16.mxu1 %v7209_v26 }
 0xaef   :  { %6407 = vmatpush3.bf16.msra.mxu1 %v7209_v26 }
 0xaf0   :  { %6408 = vmatprep.subr.bf16.mxu1 %v7210_v13 }
 0xaf3   :  { %6409 = vmatpush3.bf16.msra.mxu1 %v7210_v13 }
 0xaf4   :  { %6627 = vmatprep.subr.bf16.mxu1 %v10569_v63 }
 0xaf6   :  { %6411 = vmatmul.mubr.bf16.vlgmr.msra.gmra.mrb[84].mxu1 %v5156_v12 }
 0xaf7   :  { %6629 = vmatpush3.bf16.msra.mxu1 %v10058_v55  ;;  %6430 = vmatprep.mubr.msk.f32.mxu1 %vm7225_vm6, %v7224_v36 }
 0xaf8   :  { %6630 = vmatprep.subr.bf16.mxu1 %v10569_v63 }
 0xafb   :  { %6632 = vmatpush3.bf16.msra.mxu1 %v10068_v39 }
 0xafc   :  { %6633 = vmatprep.subr.bf16.mxu1 %v10569_v63 }
 0xaff   :  { %6635 = vmatpush3.bf16.msra.mxu1 %v10077_v51 }
 0xb00   :  { %6636 = vmatprep.subr.bf16.mxu1 %v10569_v63 }
 0xb03   :  { %6638 = vmatpush3.bf16.msra.mxu1 %v10088_v50 }
 0xb04   :  { %6639 = vmatprep.subr.bf16.mxu1 %v10569_v63 }
 0xbc9   :  { %v10273_v45 = vpop.f32.mrb[84].mxu1 }
 0xbca   :  { %v10275_v55 = vpop.f32.mrb[85].mxu1  ;;  %v5526_v51 = vmul.f32 %v10273_v45, %v10273_v45  ;;  %v5513_v57 = vsel %vm66_vm2, %v10273_v45, 0.0 }
 0xbcb   :  { %v5524_v27 = vmul.f32 %v10275_v55, %v10275_v55  ;;  %v10279_v47 = vpop.f32.mrb[86].mxu1  ;;  %v5510_v42 = vsel %vm66_vm2, %v10275_v55, 0.0 }
 0xbcc   :  { %v10281_v39 = vpop.f32.mrb[87].mxu1  ;;  %v5527_v61 = vmul.f32 %v10279_v47, %v10279_v47  ;;  %v5531_v15 = vsel %vm66_vm2, %v5526_v51, 0.0  ;;  %v5515_v48 = vsel %vm66_vm2, %v10279_v47, 0.0  ;;  %v5751_v51 = vld [vmem:[%s10387_s17 + $0x10] sm:$0xff] }
 0xbcd   :  { %v5511_v50 = vsel %vm66_vm2, %v10281_v39, 0.0  ;;  %v5525_v40 = vmul.f32 %v10281_v39, %v10281_v39  ;;  %v5528_v22 = vsel %vm66_vm2, %v5524_v27, 0.0 }
 0xbce   :  { %v5512_v34 = vadd.f32 %v5511_v50, %v5510_v42  ;;  %v5533_v60 = vsel %vm66_vm2, %v5527_v61, 0.0  ;;  %v5752_v42 = vld [vmem:[%s10387_s17 + $0x18] sm:$0xff]  ;;  %v5753_v50 = vld [vmem:[%s10387_s17 + $0x20] sm:$0xff] }
 0xbcf   :  { %v5529_v37 = vsel %vm66_vm2, %v5525_v40, 0.0  ;;  %v6649_v40 = vpack.c.bf16 %v5752_v42, %v5751_v51 }
 0xbd0   :  { %v5514_v17 = vadd.f32 %v5513_v57, %v5512_v34  ;;  %v5530_v59 = vadd.f32 %v5529_v37, %v5528_v22  ;;  %v6653_v34 = vpack.c.bf16 %v5754_v58, %v5753_v50  ;;  %v5755_v57 = vld [vmem:[%s10387_s17 + $0x30] sm:$0xff]  ;;  %v5756_v22 = vld [vmem:[%s10387_s17 + $0x38] sm:$0xff] }
 0xbd1   :  { %v6657_v61 = vpack.c.bf16 %v5756_v22, %v5755_v57 }
 0xbd2   :  { %v5516_v33 = vadd.f32 %v5515_v48, %v5514_v17  ;;  %v5532_v2 = vadd.f32 %v5531_v15, %v5530_v59 }
 0xbd4   :  { %v5517_v14 = vrot.slane %v5516_v33, 4  ;;  %v5534_v31 = vadd.f32 %v5533_v60, %v5532_v2 }
 0xbd6   :  { %v5518_v3 = vadd.f32 %v5517_v14, %v5516_v33  ;;  %v5535_v0 = vrot.slane %v5534_v31, 4 }
 0xbd8   :  { %v5519_v1 = vrot.slane %v5518_v3, 2  ;;  %v5536_v49 = vadd.f32 %v5535_v0, %v5534_v31 }
 0xbda   :  { %v5520_v30 = vadd.f32 %v5519_v1, %v5518_v3  ;;  %v5537_v32 = vrot.slane %v5536_v49, 2 }
 0xbdc   :  { %v5521_v7 = vrot.slane %v5520_v30, 1  ;;  %v5538_v62 = vadd.f32 %v5537_v32, %v5536_v49 }
 0xbde   :  { %v5539_v23 = vrot.slane %v5538_v62, 1  ;;  %v5522_v28 = vadd.f32 %v5521_v7, %v5520_v30 }
 0xbe0   :  { %v5540_v8 = vadd.f32 %v5539_v23, %v5538_v62 }
 0xbe2   :  { %v5542_v56 = vsel %vm1148_vm3, %v5522_v28, %v5540_v8 }
 0xbe3   :  { %6431 = vmatmul.mubr.msk.f32.vlgmr.msra.gmra.mrb[88].mxu1 %vm66_vm2, %v5542_v56 }
 0xbe4   :  { %6441 = vmatprep.mubr.msk.f32.mxu1 %vm7225_vm6, %v7224_v36  ;;  %6641 = vmatpush3.bf16.msra.mxu1 %v6640_v53  ;;  %v5749_v36 = vld [vmem:[%s10387_s17] sm:$0xff] }
 0xbe5   :  { %6642 = vmatprep.subr.bf16.mxu1 %v10569_v63  ;;  %v6645_v38 = vpack.c.bf16 %v5750_v10, %v5749_v36 }
 0xbe8   :  { %6644 = vmatpush3.bf16.msra.mxu1 %v6643_v25 }
 0xbe9   :  { %6646 = vmatprep.subr.bf16.mxu1 %v6645_v38 }
 0xcb6   :  { %v5620_v12 = vpop.f32.mrb[88].mxu1 }
 0xcb7   :  { %v5624_v43 = vmul.f32 0.015625, %v5620_v12  ;;  %v6432_v11 = vpop.f32.mrb[89].mxu1 }
 0xcb9   :  { %v5625_v24 = vmul.f32 %v5624_v43, %v5624_v43 }
 0xcbb   :  { %v5627_v19 = vrot.slane %v5625_v24, 7 }
 0xcbd   :  { %v5629_v21 = vsub.f32 %v5624_v43, %v5627_v19 }
 0xcbf   :  { %v5630_v9 = vmax.f32 %v5629_v21, 0.0 }
 0xcc1   :  { %v5632_v5 = vadd.f32 1e-05, %v5630_v9 }
 0xcc3   :  { %7217 = vrsqrt.f32 %v5632_v5 }
 0xccd   :  { %v7218_v63 = vpop.eup %7217 }
 0xcce   :  { %v5635_v20 = vrot.slane %v7218_v63, 1 }
 0xcd0   :  { %v5637_v4 = vmul.f32 %v5635_v20, %v5631_v52 }
 0xcd2   :  { %v5639_v16 = vmul.f32 %v5637_v4, %v5624_v43  ;;  %v5644_v26 = vrot.slane %v5637_v4, %v8362_v46 }
 0xcd4   :  { %v5640_v6 = vsub.f32 %v5638_v18, %v5639_v16 }
 0xcd6   :  { %v5648_v13 = vrot.slane %v5640_v6, %v8362_v46 }
 0xcd8   :  { %v5649_v27 = vsel %vm1148_vm3, %v5644_v26, %v5648_v13 }
 0xcd9   :  { %6442 = vmatmul.mubr.msk.f32.vlgmr.msra.gmra.mrb[90].mxu1 %vm1394_vm4, %v5649_v27 }
 0xcda   :  { %6648 = vmatpush3.bf16.msra.mxu1 %v6645_v38 }
 0xcdb   :  { %6650 = vmatprep.subr.bf16.mxu1 %v6649_v40 }
 0xcde   :  { %6652 = vmatpush3.bf16.msra.mxu1 %v6649_v40 }
 0xcdf   :  { %6654 = vmatprep.subr.bf16.mxu1 %v6653_v34 }
 0xce2   :  { %6656 = vmatpush3.bf16.msra.mxu1 %v6653_v34 }
 0xce3   :  { %6658 = vmatprep.subr.bf16.mxu1 %v6657_v61 }
 0xce6   :  { %6660 = vmatpush3.bf16.msra.mxu1 %v6657_v61 }
 0xdac   :  { %v5723_v37 = vpop.f32.mrb[90].mxu1 }
 0xdad   :  { %v5730_v17 = vrot.slane %v5723_v37, %v8362_v46  ;;  %v6443_v59 = vpop.f32.mrb[91].mxu1  ;;  %v5738_v15 = vrot.slane %v5723_v37, %v8467_v35  ;;  %v6194_v35 = vld [vmem:[%s10389_s18] ss:$0 sm:$0xff] }
 0xdaf   :  { %v5731_v48 = vmul.f32 %v5730_v17, %v10275_v55  ;;  %v5732_v33 = vmul.f32 %v5730_v17, %v10281_v39  ;;  %v5733_v2 = vmul.f32 %v10273_v45, %v5730_v17  ;;  %v5734_v60 = vmul.f32 %v10279_v47, %v5730_v17 }
 0xdb1   :  { %v5739_v14 = vadd.f32 %v5738_v15, %v5731_v48  ;;  %v5740_v31 = vadd.f32 %v5738_v15, %v5732_v33  ;;  %v5741_v3 = vadd.f32 %v5738_v15, %v5733_v2  ;;  %v5742_v0 = vadd.f32 %v5738_v15, %v5734_v60 }
 0xdb3   :  { %v5744_v1 = vmax.f32 %v5740_v31, 0.0  ;;  %v5746_v49 = vmax.f32 %v5742_v0, 0.0  ;;  %v5743_v30 = vmax.f32 %v5739_v14, 0.0  ;;  %v5745_v32 = vmax.f32 %v5741_v3, 0.0 }
 0xdb5   :  { %v5747_v46 = vadd.f32 %v5745_v32, %v5743_v30  ;;  %v5748_v7 = vadd.f32 %v5746_v49, %v5744_v1 }
 0xdb7   :  { %6460 = vmatprep.mubr.msk.f32.mxu1 %vm66_vm2, %v5747_v46 }
 0xdb8   :  { %6461 = vmatmul.mubr.msk.f32.vlgmr.msra.gmra.mrb[92].mxu1 %vm66_vm2, %v5748_v7 }
 0xe8b   :  { %v6462_v45 = vpop.f32.mrb[92].mxu1 }
 0xe8c   :  { %v5842_v55 = vadd.f32 %v6462_v45, %v6194_v35  ;;  %v5836_v47 = vpop.f32.mrb[93].mxu1 }
 0xe8d   :  { %v5837_v39 = vadd.f32 %v6194_v35, %v5836_v47 }
 0xe8e   :  { %5846 = vst [vmem:[%s10390_s19 + $0x8] sm:$0xff] %v5842_v55 }
 0xe8f   :  { %5845 = vst [vmem:[%s10390_s19] sm:$0xff] %v5837_v39 }

</bundles_post_ra>
